<compile_context>
chip_gen: v5e
topology: v5e:2x2
jax: 0.10.0
libtpu: 0.0.40
codegen_flags: <defaults>
</compile_context>

<pallas_src>
import jax
import jax.numpy as jnp
from jax import lax
from jax.experimental import pallas as pl
from jax.experimental.pallas import tpu as pltpu


def _basic_block_kernel(x_ref, scale_ref, shift_ref, w_ref, out_ref,
                        a_pad_ref, col_ref):
    """Fused BN(eval) + ReLU + 3x3 conv (stride 1, pad 1, no bias) + concat.

    Grid = (N, H // TH).  Batch axis is 'parallel' (megacore friendly); the
    row-tile axis is 'arbitrary' because the per-batch activation scratch is
    filled at r == 0 and reused by the later row tiles on the same core.

    x_ref     : (1, H, W, Cin)        full batch element (resident across r)
    scale_ref : (1, 1, 1, Cin)        folded BN scale  = gamma / sqrt(var+eps)
    shift_ref : (1, 1, 1, Cin)        folded BN shift  = beta - mean * scale
    w_ref     : (9*Cin, Cout)         conv weight reshaped for one matmul
    out_ref   : (1, TH, W, Cin+Cout)  concat([x, conv(relu(bn(x)))]) row tile
    a_pad_ref : (H+2, W+2, Cin) f32   persistent zero-padded relu(bn(x))
    col_ref   : (TH, W, 9*Cin)        contiguous im2col LHS scratch (bf16)
    """
    _, H, W, Cin = x_ref.shape
    Cout = w_ref.shape[-1]
    TH = out_ref.shape[1]
    Hp, Wp = H + 2, W + 2
    cdtype = col_ref.dtype

    r = pl.program_id(1)

    @pl.when(r == 0)
    def _():
        # BN (running stats folded into scale/shift) + ReLU in f32 on the VPU.
        x = x_ref[...]                                             # (1,H,W,Cin)
        a = jnp.maximum(x * scale_ref[...] + shift_ref[...], 0.0)  # (1,H,W,Cin)
        # Zero only the halo ring (not the whole buffer).
        zrow = jnp.zeros((1, Wp, Cin), a_pad_ref.dtype)
        zcol = jnp.zeros((Hp, 1, Cin), a_pad_ref.dtype)
        a_pad_ref[0:1, :, :] = zrow
        a_pad_ref[Hp - 1:Hp, :, :] = zrow
        a_pad_ref[:, 0:1, :] = zcol
        a_pad_ref[:, Wp - 1:Wp, :] = zcol
        # Interior written exactly once.
        a_pad_ref[1:H + 1, 1:W + 1, :] = a[0]

    row0 = pl.multiple_of(r * TH, TH)   # first row of this tile (x coords)

    # --- identity branch of torch.cat([x, out], 1): cheap VMEM->VMEM copy ---
    out_ref[:, :, :, 0:Cin] = x_ref[:, pl.ds(row0, TH), :, :].astype(out_ref.dtype)

    # --- im2col: copy each of the 9 taps once into a contiguous buffer ------
    for kh in range(3):
        for kw in range(3):
            t = kh * 3 + kw
            tap = a_pad_ref[pl.ds(row0 + kh, TH), kw:kw + W, :]    # (TH,W,Cin) f32
            col_ref[:, :, t * Cin:(t + 1) * Cin] = tap.astype(cdtype)

    # --- one MXU matmul over the fused K = 9*Cin dimension ------------------
    lhs = col_ref[...].reshape(TH * W, 9 * Cin)                    # bf16
    acc = jnp.dot(lhs, w_ref[...], preferred_element_type=jnp.float32)
    out_ref[:, :, :, Cin:Cin + Cout] = (
        acc.reshape(1, TH, W, Cout).astype(out_ref.dtype))


def basic_block_forward(x_nchw, gamma, beta, running_mean, running_var,
                        conv_weight_oihw, eps=1e-5, drop_rate=0.0,
                        row_tile=8, compute_dtype=jnp.bfloat16):
    """Wrapper mirroring BasicBlock.forward (eval mode).  x_nchw: (N,Cin,H,W)."""
    # TODO(synk): drop_rate > 0 (training-mode F.dropout) not implemented;
    # default module config uses dropRate=0.0 and eval-mode dropout is identity.
    del drop_rate

    N, Cin, H, W = x_nchw.shape
    Cout, Cin_w, KH, KW = conv_weight_oihw.shape
    assert (Cin_w, KH, KW) == (Cin, 3, 3)
    Ctot = Cin + Cout

    itemsize = jnp.dtype(compute_dtype).itemsize
    # Whole-image tile when the im2col scratch is small (fewer grid steps);
    # otherwise fall back to row tiling to bound the VMEM footprint.
    if H * W * 9 * Cin * itemsize <= (2 << 20):
        TH = H
    elif H % row_tile == 0:
        TH = row_tile
    else:
        TH = H
    HT = H // TH

    # Layout glue + BN folding (pure data movement / elementwise; XLA fuses
    # it).  NOTE: when stacking blocks, keep activations NHWC between blocks
    # and only transpose at network entry/exit.
    x_nhwc = jnp.transpose(x_nchw, (0, 2, 3, 1)).astype(jnp.float32)
    inv_std = lax.rsqrt(running_var.astype(jnp.float32) + eps)
    scale = (gamma * inv_std).reshape(1, 1, 1, Cin).astype(jnp.float32)
    shift = (beta - running_mean * gamma * inv_std).reshape(1, 1, 1, Cin)
    shift = shift.astype(jnp.float32)
    # (Cout,Cin,3,3) -> (3,3,Cin,Cout) -> (9*Cin, Cout); K index = (kh*3+kw)*Cin + ci
    w = jnp.transpose(conv_weight_oihw, (2, 3, 1, 0)).reshape(9 * Cin, Cout)
    w = w.astype(compute_dtype)

    flops = 2 * N * H * W * 9 * Cin * Cout
    bytes_accessed = int(N * H * W * Cin * 4 + 9 * Cin * Cout * itemsize
                         + 2 * Cin * 4 + N * H * W * Ctot * 4)

    out_nhwc = pl.pallas_call(
        _basic_block_kernel,
        out_shape=jax.ShapeDtypeStruct((N, H, W, Ctot), jnp.float32),
        grid_spec=pltpu.PrefetchScalarGridSpec(
            num_scalar_prefetch=0,
            grid=(N, HT),
            in_specs=[
                # Full batch element; block index constant in r so it is only
                # DMA'd when n changes (resident across the row tiles).
                pl.BlockSpec((1, H, W, Cin), lambda n, r: (n, 0, 0, 0)),
                pl.BlockSpec((1, 1, 1, Cin), lambda n, r: (0, 0, 0, 0)),
                pl.BlockSpec((1, 1, 1, Cin), lambda n, r: (0, 0, 0, 0)),
                pl.BlockSpec((9 * Cin, Cout), lambda n, r: (0, 0)),
            ],
            out_specs=pl.BlockSpec((1, TH, W, Ctot), lambda n, r: (n, r, 0, 0)),
            scratch_shapes=[
                pltpu.VMEM((H + 2, W + 2, Cin), jnp.float32),   # padded relu(bn(x))
                pltpu.VMEM((TH, W, 9 * Cin), compute_dtype),    # im2col LHS
            ],
        ),
        compiler_params=pltpu.CompilerParams(
            dimension_semantics=("parallel", "arbitrary"),
            vmem_limit_bytes=32 * 1024 * 1024,
        ),
        cost_estimate=pl.CostEstimate(
            flops=flops, transcendentals=0, bytes_accessed=bytes_accessed),
    )(x_nhwc, scale, shift, w)

    # The concat is already in the kernel output; only layout glue remains.
    return jnp.transpose(out_nhwc, (0, 3, 1, 2))


def _reference_forward(x_nchw, gamma, beta, running_mean, running_var,
                       conv_weight_oihw, eps=1e-5, matmul_dtype=jnp.float32):
    """Pure-JAX reference.  matmul_dtype lets us mirror the kernel's bf16 MXU
    operands (f32 accumulation) for a tight structural check."""
    x = x_nchw.astype(jnp.float32)
    mean = running_mean.reshape(1, -1, 1, 1)
    var = running_var.reshape(1, -1, 1, 1)
    g = gamma.reshape(1, -1, 1, 1)
    b = beta.reshape(1, -1, 1, 1)
    a = jnp.maximum((x - mean) / jnp.sqrt(var + eps) * g + b, 0.0)
    a = a.astype(matmul_dtype).astype(jnp.float32)
    w = conv_weight_oihw.astype(matmul_dtype).astype(jnp.float32)
    conv = lax.conv_general_dilated(
        a, w, window_strides=(1, 1), padding=((1, 1), (1, 1)),
        dimension_numbers=("NCHW", "OIHW", "NCHW"),
        precision=lax.Precision.HIGHEST)
    return jnp.concatenate([x, conv], axis=1)


if __name__ == "__main__":
    N, Cin, H, W = 2, 4, 16, 16
    Cout = 8

    key = jax.random.PRNGKey(0)
    kx, kw = jax.random.split(key)

    x = jax.random.normal(kx, (N, Cin, H, W), dtype=jnp.float32)

    # Deterministic, non-trivial BatchNorm parameters / running stats.
    gamma = 1.0 + 0.1 * jnp.arange(Cin, dtype=jnp.float32)
    beta = 0.05 * jnp.arange(Cin, dtype=jnp.float32)
    running_mean = 0.02 * jnp.arange(Cin, dtype=jnp.float32) - 0.03
    running_var = 1.0 + 0.05 * jnp.arange(Cin, dtype=jnp.float32)

    # Conv weight, PyTorch layout (Cout, Cin, 3, 3), kaiming-ish scale.
    fan = Cin * 3 * 3
    conv_weight = jax.random.normal(kw, (Cout, Cin, 3, 3), dtype=jnp.float32)
    conv_weight = conv_weight * (2.0 / fan) ** 0.5

    out = basic_block_forward(x, gamma, beta, running_mean, running_var,
                              conv_weight)
    out = jax.block_until_ready(out)
    assert out.shape == (N, Cin + Cout, H, W), out.shape

    # Identity channels of the concat must be bit-exact copies of x.
    assert bool(jnp.array_equal(out[:, :Cin], x)), "identity concat mismatch"

    # Structural check against a reference whose conv operands are rounded to
    # bf16 exactly like the kernel's MXU inputs (only accumulation order and
    # BN-folding rounding differ).
    ref_bf16 = _reference_forward(x, gamma, beta, running_mean, running_var,
                                  conv_weight, matmul_dtype=jnp.bfloat16)
    err_bf16 = float(jnp.abs(out - ref_bf16).max())
    assert jnp.allclose(out, ref_bf16, atol=2e-2, rtol=2e-2), err_bf16

    # Sanity check against the exact f32 module semantics (looser tolerance
    # because the kernel feeds bf16 operands to the MXU).
    ref_f32 = _reference_forward(x, gamma, beta, running_mean, running_var,
                                 conv_weight, matmul_dtype=jnp.float32)
    err_f32 = float(jnp.abs(out - ref_f32).max())
    assert jnp.allclose(out, ref_f32, atol=1e-1, rtol=1e-1), err_f32

    print("KERNEL_OK")
</pallas_src>

<mosaic_0001>
module attributes {stable_mosaic.version = 11 : i64} {
  func.func @_basic_block_kernel(%arg0: i32, %arg1: i32, %arg2: memref<1x16x16x4xf32, #tpu.memory_space<vmem>>, %arg3: memref<1x1x1x4xf32, #tpu.memory_space<vmem>>, %arg4: memref<1x1x1x4xf32, #tpu.memory_space<vmem>>, %arg5: memref<36x8xbf16, #tpu.memory_space<vmem>>, %arg6: memref<1x16x16x12xf32, #tpu.memory_space<vmem>>, %arg7: memref<18x18x4xf32, #tpu.memory_space<vmem>>, %arg8: memref<16x16x36xbf16, #tpu.memory_space<vmem>>) attributes {dimension_semantics = [#tpu.dimension_semantics<parallel>, #tpu.dimension_semantics<arbitrary>], iteration_bounds = array<i64: 2, 1>, scalar_prefetch = 0 : i64, scratch_operands = 2 : i64, tpu.core_type = #tpu.core_type<tc>, window_params = [{transform_indices = @transform_0, window_bounds = array<i64: 1, 16, 16, 4>}, {pipeline_mode = #tpu.pipeline_mode<synchronous>, transform_indices = @transform_1, window_bounds = array<i64: 1, 1, 1, 4>}, {pipeline_mode = #tpu.pipeline_mode<synchronous>, transform_indices = @transform_2, window_bounds = array<i64: 1, 1, 1, 4>}, {pipeline_mode = #tpu.pipeline_mode<synchronous>, transform_indices = @transform_3, window_bounds = array<i64: 36, 8>}, {transform_indices = @transform_4, window_bounds = array<i64: 1, 16, 16, 12>}]} {
    %c0_i32 = arith.constant 0 : i32
    %0 = arith.cmpi eq, %arg1, %c0_i32 : i32
    %1 = arith.extui %0 : i1 to i32
    %c0_i32_0 = arith.constant 0 : i32
    %2 = arith.cmpi ne, %1, %c0_i32_0 : i32
    scf.if %2 {
      %c0_58 = arith.constant 0 : index
      %c0_59 = arith.constant 0 : index
      %c0_60 = arith.constant 0 : index
      %c0_61 = arith.constant 0 : index
      %59 = vector.load %arg2[%c0_58, %c0_59, %c0_60, %c0_61] : memref<1x16x16x4xf32, #tpu.memory_space<vmem>>, vector<1x16x16x4xf32>
      %c0_62 = arith.constant 0 : index
      %c0_63 = arith.constant 0 : index
      %c0_64 = arith.constant 0 : index
      %c0_65 = arith.constant 0 : index
      %60 = vector.load %arg3[%c0_62, %c0_63, %c0_64, %c0_65] : memref<1x1x1x4xf32, #tpu.memory_space<vmem>>, vector<1x1x1x4xf32>
      %61 = vector.broadcast %60 : vector<1x1x1x4xf32> to vector<1x16x16x4xf32>
      %62 = arith.mulf %59, %61 : vector<1x16x16x4xf32>
      %c0_66 = arith.constant 0 : index
      %c0_67 = arith.constant 0 : index
      %c0_68 = arith.constant 0 : index
      %c0_69 = arith.constant 0 : index
      %63 = vector.load %arg4[%c0_66, %c0_67, %c0_68, %c0_69] : memref<1x1x1x4xf32, #tpu.memory_space<vmem>>, vector<1x1x1x4xf32>
      %64 = vector.broadcast %63 : vector<1x1x1x4xf32> to vector<1x16x16x4xf32>
      %65 = arith.addf %62, %64 : vector<1x16x16x4xf32>
      %cst_70 = arith.constant 0.000000e+00 : f32
      %66 = vector.broadcast %cst_70 : f32 to vector<1x16x16x4xf32>
      %67 = arith.maximumf %65, %66 : vector<1x16x16x4xf32>
      %cst_71 = arith.constant 0.000000e+00 : f32
      %68 = vector.broadcast %cst_71 : f32 to vector<1x18x4xf32>
      %cst_72 = arith.constant 0.000000e+00 : f32
      %69 = vector.broadcast %cst_72 : f32 to vector<18x1x4xf32>
      %c0_73 = arith.constant 0 : index
      %c0_74 = arith.constant 0 : index
      %c0_75 = arith.constant 0 : index
      %70 = vector.load %arg7[%c0_73, %c0_74, %c0_75] : memref<18x18x4xf32, #tpu.memory_space<vmem>>, vector<1x18x4xf32>
      tpu.vector_store %arg7[%c0_73, %c0_74, %c0_75], %68 {strides = array<i32>} : memref<18x18x4xf32, #tpu.memory_space<vmem>>, vector<1x18x4xf32>,
      %c17 = arith.constant 17 : index
      %c0_76 = arith.constant 0 : index
      %c0_77 = arith.constant 0 : index
      %71 = vector.load %arg7[%c17, %c0_76, %c0_77] : memref<18x18x4xf32, #tpu.memory_space<vmem>>, vector<1x18x4xf32>
      tpu.vector_store %arg7[%c17, %c0_76, %c0_77], %68 {strides = array<i32>} : memref<18x18x4xf32, #tpu.memory_space<vmem>>, vector<1x18x4xf32>,
      %c0_78 = arith.constant 0 : index
      %c0_79 = arith.constant 0 : index
      %c0_80 = arith.constant 0 : index
      %72 = vector.load %arg7[%c0_78, %c0_79, %c0_80] : memref<18x18x4xf32, #tpu.memory_space<vmem>>, vector<18x1x4xf32>
      tpu.vector_store %arg7[%c0_78, %c0_79, %c0_80], %69 {strides = array<i32>} : memref<18x18x4xf32, #tpu.memory_space<vmem>>, vector<18x1x4xf32>,
      %c0_81 = arith.constant 0 : index
      %c17_82 = arith.constant 17 : index
      %c0_83 = arith.constant 0 : index
      %73 = vector.load %arg7[%c0_81, %c17_82, %c0_83] : memref<18x18x4xf32, #tpu.memory_space<vmem>>, vector<18x1x4xf32>
      tpu.vector_store %arg7[%c0_81, %c17_82, %c0_83], %69 {strides = array<i32>} : memref<18x18x4xf32, #tpu.memory_space<vmem>>, vector<18x1x4xf32>,
      %74 = vector.shape_cast %67 : vector<1x16x16x4xf32> to vector<16x16x4xf32>
      %c1_84 = arith.constant 1 : index
      %c1_85 = arith.constant 1 : index
      %c0_86 = arith.constant 0 : index
      %75 = vector.load %arg7[%c1_84, %c1_85, %c0_86] : memref<18x18x4xf32, #tpu.memory_space<vmem>>, vector<16x16x4xf32>
      tpu.vector_store %arg7[%c1_84, %c1_85, %c0_86], %74 {strides = array<i32>} : memref<18x18x4xf32, #tpu.memory_space<vmem>>, vector<16x16x4xf32>,
    } else {
    }
    %c16_i32 = arith.constant 16 : i32
    %3 = arith.muli %arg1, %c16_i32 : i32
    %4 = tpu.assume_multiple %3, 16 : i32
    %c0 = arith.constant 0 : index
    %5 = arith.index_cast %4 : i32 to index
    %c0_1 = arith.constant 0 : index
    %c0_2 = arith.constant 0 : index
    %6 = vector.load %arg2[%c0, %5, %c0_1, %c0_2] : memref<1x16x16x4xf32, #tpu.memory_space<vmem>>, vector<1x16x16x4xf32>
    %c0_3 = arith.constant 0 : index
    %c0_4 = arith.constant 0 : index
    %c0_5 = arith.constant 0 : index
    %c0_6 = arith.constant 0 : index
    %7 = vector.load %arg6[%c0_3, %c0_4, %c0_5, %c0_6] : memref<1x16x16x12xf32, #tpu.memory_space<vmem>>, vector<1x16x16x4xf32>
    tpu.vector_store %arg6[%c0_3, %c0_4, %c0_5, %c0_6], %6 {strides = array<i32>} : memref<1x16x16x12xf32, #tpu.memory_space<vmem>>, vector<1x16x16x4xf32>,
    %c0_i32_7 = arith.constant 0 : i32
    %8 = arith.addi %4, %c0_i32_7 : i32
    %9 = arith.index_cast %8 : i32 to index
    %c0_8 = arith.constant 0 : index
    %c0_9 = arith.constant 0 : index
    %10 = vector.load %arg7[%9, %c0_8, %c0_9] : memref<18x18x4xf32, #tpu.memory_space<vmem>>, vector<16x16x4xf32>
    %11 = arith.truncf %10 : vector<16x16x4xf32> to vector<16x16x4xbf16>
    %c0_10 = arith.constant 0 : index
    %c0_11 = arith.constant 0 : index
    %c0_12 = arith.constant 0 : index
    %12 = vector.load %arg8[%c0_10, %c0_11, %c0_12] : memref<16x16x36xbf16, #tpu.memory_space<vmem>>, vector<16x16x4xbf16>
    tpu.vector_store %arg8[%c0_10, %c0_11, %c0_12], %11 {strides = array<i32>} : memref<16x16x36xbf16, #tpu.memory_space<vmem>>, vector<16x16x4xbf16>,
    %c0_i32_13 = arith.constant 0 : i32
    %13 = arith.addi %4, %c0_i32_13 : i32
    %14 = arith.index_cast %13 : i32 to index
    %c1 = arith.constant 1 : index
    %c0_14 = arith.constant 0 : index
    %15 = vector.load %arg7[%14, %c1, %c0_14] : memref<18x18x4xf32, #tpu.memory_space<vmem>>, vector<16x16x4xf32>
    %16 = arith.truncf %15 : vector<16x16x4xf32> to vector<16x16x4xbf16>
    %c0_15 = arith.constant 0 : index
    %c0_16 = arith.constant 0 : index
    %c4 = arith.constant 4 : index
    %17 = vector.load %arg8[%c0_15, %c0_16, %c4] : memref<16x16x36xbf16, #tpu.memory_space<vmem>>, vector<16x16x4xbf16>
    tpu.vector_store %arg8[%c0_15, %c0_16, %c4], %16 {strides = array<i32>} : memref<16x16x36xbf16, #tpu.memory_space<vmem>>, vector<16x16x4xbf16>,
    %c0_i32_17 = arith.constant 0 : i32
    %18 = arith.addi %4, %c0_i32_17 : i32
    %19 = arith.index_cast %18 : i32 to index
    %c2 = arith.constant 2 : index
    %c0_18 = arith.constant 0 : index
    %20 = vector.load %arg7[%19, %c2, %c0_18] : memref<18x18x4xf32, #tpu.memory_space<vmem>>, vector<16x16x4xf32>
    %21 = arith.truncf %20 : vector<16x16x4xf32> to vector<16x16x4xbf16>
    %c0_19 = arith.constant 0 : index
    %c0_20 = arith.constant 0 : index
    %c8 = arith.constant 8 : index
    %22 = vector.load %arg8[%c0_19, %c0_20, %c8] : memref<16x16x36xbf16, #tpu.memory_space<vmem>>, vector<16x16x4xbf16>
    tpu.vector_store %arg8[%c0_19, %c0_20, %c8], %21 {strides = array<i32>} : memref<16x16x36xbf16, #tpu.memory_space<vmem>>, vector<16x16x4xbf16>,
    %c1_i32 = arith.constant 1 : i32
    %23 = arith.addi %4, %c1_i32 : i32
    %24 = arith.index_cast %23 : i32 to index
    %c0_21 = arith.constant 0 : index
    %c0_22 = arith.constant 0 : index
    %25 = vector.load %arg7[%24, %c0_21, %c0_22] : memref<18x18x4xf32, #tpu.memory_space<vmem>>, vector<16x16x4xf32>
    %26 = arith.truncf %25 : vector<16x16x4xf32> to vector<16x16x4xbf16>
    %c0_23 = arith.constant 0 : index
    %c0_24 = arith.constant 0 : index
    %c12 = arith.constant 12 : index
    %27 = vector.load %arg8[%c0_23, %c0_24, %c12] : memref<16x16x36xbf16, #tpu.memory_space<vmem>>, vector<16x16x4xbf16>
    tpu.vector_store %arg8[%c0_23, %c0_24, %c12], %26 {strides = array<i32>} : memref<16x16x36xbf16, #tpu.memory_space<vmem>>, vector<16x16x4xbf16>,
    %c1_i32_25 = arith.constant 1 : i32
    %28 = arith.addi %4, %c1_i32_25 : i32
    %29 = arith.index_cast %28 : i32 to index
    %c1_26 = arith.constant 1 : index
    %c0_27 = arith.constant 0 : index
    %30 = vector.load %arg7[%29, %c1_26, %c0_27] : memref<18x18x4xf32, #tpu.memory_space<vmem>>, vector<16x16x4xf32>
    %31 = arith.truncf %30 : vector<16x16x4xf32> to vector<16x16x4xbf16>
    %c0_28 = arith.constant 0 : index
    %c0_29 = arith.constant 0 : index
    %c16 = arith.constant 16 : index
    %32 = vector.load %arg8[%c0_28, %c0_29, %c16] : memref<16x16x36xbf16, #tpu.memory_space<vmem>>, vector<16x16x4xbf16>
    tpu.vector_store %arg8[%c0_28, %c0_29, %c16], %31 {strides = array<i32>} : memref<16x16x36xbf16, #tpu.memory_space<vmem>>, vector<16x16x4xbf16>,
    %c1_i32_30 = arith.constant 1 : i32
    %33 = arith.addi %4, %c1_i32_30 : i32
    %34 = arith.index_cast %33 : i32 to index
    %c2_31 = arith.constant 2 : index
    %c0_32 = arith.constant 0 : index
    %35 = vector.load %arg7[%34, %c2_31, %c0_32] : memref<18x18x4xf32, #tpu.memory_space<vmem>>, vector<16x16x4xf32>
    %36 = arith.truncf %35 : vector<16x16x4xf32> to vector<16x16x4xbf16>
    %c0_33 = arith.constant 0 : index
    %c0_34 = arith.constant 0 : index
    %c20 = arith.constant 20 : index
    %37 = vector.load %arg8[%c0_33, %c0_34, %c20] : memref<16x16x36xbf16, #tpu.memory_space<vmem>>, vector<16x16x4xbf16>
    tpu.vector_store %arg8[%c0_33, %c0_34, %c20], %36 {strides = array<i32>} : memref<16x16x36xbf16, #tpu.memory_space<vmem>>, vector<16x16x4xbf16>,
    %c2_i32 = arith.constant 2 : i32
    %38 = arith.addi %4, %c2_i32 : i32
    %39 = arith.index_cast %38 : i32 to index
    %c0_35 = arith.constant 0 : index
    %c0_36 = arith.constant 0 : index
    %40 = vector.load %arg7[%39, %c0_35, %c0_36] : memref<18x18x4xf32, #tpu.memory_space<vmem>>, vector<16x16x4xf32>
    %41 = arith.truncf %40 : vector<16x16x4xf32> to vector<16x16x4xbf16>
    %c0_37 = arith.constant 0 : index
    %c0_38 = arith.constant 0 : index
    %c24 = arith.constant 24 : index
    %42 = vector.load %arg8[%c0_37, %c0_38, %c24] : memref<16x16x36xbf16, #tpu.memory_space<vmem>>, vector<16x16x4xbf16>
    tpu.vector_store %arg8[%c0_37, %c0_38, %c24], %41 {strides = array<i32>} : memref<16x16x36xbf16, #tpu.memory_space<vmem>>, vector<16x16x4xbf16>,
    %c2_i32_39 = arith.constant 2 : i32
    %43 = arith.addi %4, %c2_i32_39 : i32
    %44 = arith.index_cast %43 : i32 to index
    %c1_40 = arith.constant 1 : index
    %c0_41 = arith.constant 0 : index
    %45 = vector.load %arg7[%44, %c1_40, %c0_41] : memref<18x18x4xf32, #tpu.memory_space<vmem>>, vector<16x16x4xf32>
    %46 = arith.truncf %45 : vector<16x16x4xf32> to vector<16x16x4xbf16>
    %c0_42 = arith.constant 0 : index
    %c0_43 = arith.constant 0 : index
    %c28 = arith.constant 28 : index
    %47 = vector.load %arg8[%c0_42, %c0_43, %c28] : memref<16x16x36xbf16, #tpu.memory_space<vmem>>, vector<16x16x4xbf16>
    tpu.vector_store %arg8[%c0_42, %c0_43, %c28], %46 {strides = array<i32>} : memref<16x16x36xbf16, #tpu.memory_space<vmem>>, vector<16x16x4xbf16>,
    %c2_i32_44 = arith.constant 2 : i32
    %48 = arith.addi %4, %c2_i32_44 : i32
    %49 = arith.index_cast %48 : i32 to index
    %c2_45 = arith.constant 2 : index
    %c0_46 = arith.constant 0 : index
    %50 = vector.load %arg7[%49, %c2_45, %c0_46] : memref<18x18x4xf32, #tpu.memory_space<vmem>>, vector<16x16x4xf32>
    %51 = arith.truncf %50 : vector<16x16x4xf32> to vector<16x16x4xbf16>
    %c0_47 = arith.constant 0 : index
    %c0_48 = arith.constant 0 : index
    %c32 = arith.constant 32 : index
    %52 = vector.load %arg8[%c0_47, %c0_48, %c32] : memref<16x16x36xbf16, #tpu.memory_space<vmem>>, vector<16x16x4xbf16>
    tpu.vector_store %arg8[%c0_47, %c0_48, %c32], %51 {strides = array<i32>} : memref<16x16x36xbf16, #tpu.memory_space<vmem>>, vector<16x16x4xbf16>,
    %c0_49 = arith.constant 0 : index
    %c0_50 = arith.constant 0 : index
    %c0_51 = arith.constant 0 : index
    %53 = vector.load %arg8[%c0_49, %c0_50, %c0_51] : memref<16x16x36xbf16, #tpu.memory_space<vmem>>, vector<16x16x36xbf16>
    %54 = vector.shape_cast %53 : vector<16x16x36xbf16> to vector<256x36xbf16>
    %c0_52 = arith.constant 0 : index
    %c0_53 = arith.constant 0 : index
    %55 = vector.load %arg5[%c0_52, %c0_53] : memref<36x8xbf16, #tpu.memory_space<vmem>>, vector<36x8xbf16>
    %cst = arith.constant dense<0.000000e+00> : vector<256x8xf32>
    %56 = tpu.matmul %54, %55, %cst {dimension_numbers = #tpu.dot_dimension_numbers<[1], [0], [0], [1], [0, 0, 1, 1], [], []>} : vector<256x36xbf16>, vector<36x8xbf16>, vector<256x8xf32> -> vector<256x8xf32>
    %57 = vector.shape_cast %56 : vector<256x8xf32> to vector<1x16x16x8xf32>
    %c0_54 = arith.constant 0 : index
    %c0_55 = arith.constant 0 : index
    %c0_56 = arith.constant 0 : index
    %c4_57 = arith.constant 4 : index
    %58 = vector.load %arg6[%c0_54, %c0_55, %c0_56, %c4_57] : memref<1x16x16x12xf32, #tpu.memory_space<vmem>>, vector<1x16x16x8xf32>
    tpu.vector_store %arg6[%c0_54, %c0_55, %c0_56, %c4_57], %57 {strides = array<i32>} : memref<1x16x16x12xf32, #tpu.memory_space<vmem>>, vector<1x16x16x8xf32>,
    return
  }
  func.func @transform_0(%arg0: i32, %arg1: i32) -> (i32, i32, i32, i32) {
    %c0_i32 = arith.constant 0 : i32
    %c0_i32_0 = arith.constant 0 : i32
    %c0_i32_1 = arith.constant 0 : i32
    %c0_i32_2 = arith.constant 0 : i32
    return %arg0, %c0_i32, %c0_i32_0, %c0_i32_1 : i32, i32, i32, i32
  }
  func.func @transform_1(%arg0: i32, %arg1: i32) -> (i32, i32, i32, i32) {
    %c0_i32 = arith.constant 0 : i32
    %c0_i32_0 = arith.constant 0 : i32
    %c0_i32_1 = arith.constant 0 : i32
    %c0_i32_2 = arith.constant 0 : i32
    %c0_i32_3 = arith.constant 0 : i32
    return %c0_i32, %c0_i32_0, %c0_i32_1, %c0_i32_2 : i32, i32, i32, i32
  }
  func.func @transform_2(%arg0: i32, %arg1: i32) -> (i32, i32, i32, i32) {
    %c0_i32 = arith.constant 0 : i32
    %c0_i32_0 = arith.constant 0 : i32
    %c0_i32_1 = arith.constant 0 : i32
    %c0_i32_2 = arith.constant 0 : i32
    %c0_i32_3 = arith.constant 0 : i32
    return %c0_i32, %c0_i32_0, %c0_i32_1, %c0_i32_2 : i32, i32, i32, i32
  }
  func.func @transform_3(%arg0: i32, %arg1: i32) -> (i32, i32) {
    %c0_i32 = arith.constant 0 : i32
    %c0_i32_0 = arith.constant 0 : i32
    %c0_i32_1 = arith.constant 0 : i32
    return %c0_i32, %c0_i32_0 : i32, i32
  }
  func.func @transform_4(%arg0: i32, %arg1: i32) -> (i32, i32, i32, i32) {
    %c0_i32 = arith.constant 0 : i32
    %c0_i32_0 = arith.constant 0 : i32
    %c0_i32_1 = arith.constant 0 : i32
    return %arg0, %arg1, %c0_i32, %c0_i32_0 : i32, i32, i32, i32
  }
}

</mosaic_0001>

<bundles_post_ra>
// kernel: tpu_custom_call.1
= control target key start
LH: loop header
LB: loop body
LE: loop exit
PB: predicated region body
PF: predicated region fallthrough
CT: control target
= control target key end

     0   :  { %s3365_s15 = smov 0   ;;  %s3367_s16 = smov 0   ;;  %s4682_s0 = inlined_call_operand.vmem [shape: f32[2,16,16,4], index: 0, kind: input, shape index: {}]   ;;  %s4683_s1 = inlined_call_operand.vmem [shape: f32[1,1,1,4], index: 1, kind: input, shape index: {}]   ;;  %s4684_s2 = inlined_call_operand.vmem [shape: f32[1,1,1,4], index: 2, kind: input, shape index: {}]   ;;  %s4685_s3 = inlined_call_operand.vmem [shape: bf16[36,8], index: 3, kind: input, shape index: {}]   ;;  %s4686_s4 = inlined_call_operand.vmem [shape: f32[2,16,16,12], index: 4, kind: output, shape index: {}]  }
   0x1   :  { %s3369_s17 = smov 0  }
   0x2 LB: > { %s26_s18 = sadd.s32 1, %s3325_s16  ;;  %p2954_p0 = scmp.ge.s32.totalorder %s3329_s17, 1  ;;  %s3329_s17 = sphi %s3369_s17, %s14_s17   ;;  %s3325_s16 = sphi %s3367_s16, %s4688_s16   ;;  %s3321_s15 = sphi %s3365_s15, %s4687_s15  }
   0x3   : > { %p28_p1 = scmp.ge.s32.totalorder %s26_s18, 2  ;;  %p176_p2 = scmp.lt.s32.totalorder %s3329_s17, 3 }
   0x5   : > { %s4690_s18 = smov (%p28_p1, %s26_s18), 0  ;;  %p177_p3 = pnand %p2954_p0, %p176_p2 }
   0x6   : > { %s3332_s19 = smov (!%p177_p3), 4   ;;  %p207_p4 = scmp.lt.s32.totalorder (!%p177_p3), %s3321_s15, 1 }
   0x7   : > { %180 = sbr.rel (%p177_p3) target bundleno = 1166 (0x48e), region = 36  ;;  %s3333_s28 = smov (!%p177_p3), 8  }
   0x8   : > { %s3334_s29 = smov (!%p177_p3), 12   ;;  %s3335_s8 = smov (!%p177_p3), 16  }
   0x9   : > { %s3336_s9 = smov (!%p177_p3), 20   ;;  %s3337_s10 = smov (!%p177_p3), 24  }
   0xa   : > { %s3338_s11 = smov (!%p177_p3), 28   ;;  %s3339_s12 = smov (!%p177_p3), 32  }
   0xc   : > { %vm364_vm0 = vcmask 31744   ;;  %v3331_v0 = vmov 0.0   ;;  %vm373_vm1 = vcmask 24576   ;;  %s4692_s15 = smov (!%p207_p4, %s3321_s15), 1  ;;  %v3455_v3 = vld [vmem:[%s4683_s1] ss:$0 sm:$0xff] }
   0xd   : > { %365 = vst.msk [vmem:[#allocation2] sm:$0xff] %vm364_vm0, %v3331_v0  ;;  %s3241_s20 = sshll.u32 %s4692_s15, 8  ;;  %v3472_v8 = vld [vmem:[%s4684_s2] ss:$0 sm:$0xff]  ;;  %vm367_vm2 = vcmask 25600   ;;  %vm577_vm3 = vcmask 27648  }
   0xe   : > { %366 = vst.msk [vmem:[#allocation2 + $0x8] sm:$0xff] %vm364_vm0, %v3331_v0  ;;  %s3446_s23 = scalar_lea.vmem %s4682_s0, %s3241_s20  ;;  %vm802_vm4 = vcmask 60448   ;;  %vm1027_vm5 = vcmask 93248   ;;  %vm1255_vm6 = vcmask 126048   ;;  %vm1480_vm7 = vcmask 158848  }
   0xf   : > { %374 = vst.msk [vmem:[#allocation2] sm:$0x1] %vm373_vm1, %v3331_v0  ;;  %v228_v4 = vld [vmem:[%s3446_s23] sm:$0xff]  ;;  %v229_v6 = vld [vmem:[%s3446_s23 + $0x8] sm:$0xff]  ;;  %v235_v9 = vld [vmem:[%s3446_s23 + $0x38] sm:$0xff]  ;;  %vm1705_vm8 = vcmask 191648  }
  0x10   : > { %370 = vst.msk [vmem:[#allocation2 + $0x198] sm:$0xff] %vm364_vm0, %v3331_v0  ;;  %v232_v5 = vld [vmem:[%s3446_s23 + $0x20] sm:$0xff]  ;;  %v264_v7 = vmul.f32 %v3455_v3, %v228_v4  ;;  %v233_v11 = vld [vmem:[%s3446_s23 + $0x28] sm:$0xff]  ;;  %v265_v12 = vmul.f32 %v3455_v3, %v229_v6  ;;  %v238_v13 = vld [vmem:[%s3446_s23 + $0x50] sm:$0xff]  ;;  %v271_v14 = vmul.f32 %v3455_v3, %v235_v9  ;;  %vm1933_vm9 = vcmask 224448  }
  0x11   : > { %371 = vst.msk [vmem:[#allocation2 + $0x1a0] sm:$0xff] %vm364_vm0, %v3331_v0  ;;  %v268_v10 = vmul.f32 %v3455_v3, %v232_v5  ;;  %v230_v15 = vld [vmem:[%s3446_s23 + $0x10] sm:$0xff]  ;;  %v269_v17 = vmul.f32 %v3455_v3, %v233_v11  ;;  %v236_v18 = vld [vmem:[%s3446_s23 + $0x40] sm:$0xff]  ;;  %v274_v20 = vmul.f32 %v3455_v3, %v238_v13  ;;  %v241_v21 = vld [vmem:[%s3446_s23 + $0x68] sm:$0xff]  ;;  %vm2597_vm10 = vcmask 1041408  }
  0x12   : > { %375 = vst.msk [vmem:[#allocation2 + $0x18] sm:$0x1] %vm373_vm1, %v3331_v0  ;;  %v300_v16 = vadd.f32 %v3472_v8, %v264_v7  ;;  %v301_v22 = vadd.f32 %v3472_v8, %v265_v12  ;;  %v266_v23 = vmul.f32 %v3455_v3, %v230_v15  ;;  %v231_v24 = vld [vmem:[%s3446_s23 + $0x18] sm:$0xff]  ;;  %v307_v25 = vadd.f32 %v3472_v8, %v271_v14  ;;  %v244_v34 = vld [vmem:[%s3446_s23 + $0x80] sm:$0xff]  ;;  %v234_v35 = vld [vmem:[%s3446_s23 + $0x30] sm:$0xff] }
  0x13   : > { %376 = vst.msk [vmem:[#allocation2 + $0x30] sm:$0x1] %vm373_vm1, %v3331_v0  ;;  %v304_v19 = vadd.f32 %v3472_v8, %v268_v10  ;;  %v272_v26 = vmul.f32 %v3455_v3, %v236_v18  ;;  %v239_v27 = vld [vmem:[%s3446_s23 + $0x58] sm:$0xff]  ;;  %v305_v29 = vadd.f32 %v3472_v8, %v269_v17  ;;  %v277_v30 = vmul.f32 %v3455_v3, %v241_v21  ;;  %v242_v47 = vld [vmem:[%s3446_s23 + $0x70] sm:$0xff]  ;;  %v237_v60 = vld [vmem:[%s3446_s23 + $0x48] sm:$0xff] }
  0x14   : > { %377 = vst.msk [vmem:[#allocation2 + $0x48] sm:$0x1] %vm373_vm1, %v3331_v0  ;;  %v332_v28 = vmax.f32 %v300_v16, 0.0  ;;  %v310_v32 = vadd.f32 %v3472_v8, %v274_v20  ;;  %v267_v33 = vmul.f32 %v3455_v3, %v231_v24  ;;  %v333_v36 = vmax.f32 %v301_v22, 0.0  ;;  %v247_v59 = vld [vmem:[%s3446_s23 + $0x98] sm:$0xff]  ;;  %v245_v11 = vld [vmem:[%s3446_s23 + $0x88] sm:$0xff] }
  0x15   : > { %v610_v1 = vld [vmem:[#allocation2 + $0x1] sm:$0xff]  ;;  %378 = vst.msk [vmem:[#allocation2 + $0x60] sm:$0x1] %vm373_vm1, %v3331_v0  ;;  %v336_v31 = vmax.f32 %v304_v19, 0.0  ;;  %v302_v37 = vadd.f32 %v3472_v8, %v266_v23  ;;  %v275_v38 = vmul.f32 %v3455_v3, %v239_v27  ;;  %v339_v39 = vmax.f32 %v307_v25, 0.0  ;;  %v250_v19 = vld [vmem:[%s3446_s23 + $0xb0] sm:$0xff] }
  0x16   : > { %v642_v2 = vpack.c.bf16 %v610_v1, %v610_v1  ;;  %379 = vst.msk [vmem:[#allocation2 + $0x78] sm:$0x1] %vm373_vm1, %v3331_v0  ;;  %v308_v40 = vadd.f32 %v3472_v8, %v272_v26  ;;  %v280_v41 = vmul.f32 %v3455_v3, %v244_v34  ;;  %v337_v42 = vmax.f32 %v305_v29, 0.0  ;;  %v240_v20 = vld [vmem:[%s3446_s23 + $0x60] sm:$0xff] }
  0x17   : > { %380 = vst.msk [vmem:[#allocation2 + $0x90] sm:$0x1] %vm373_vm1, %v3331_v0  ;;  %v313_v43 = vadd.f32 %v3472_v8, %v277_v30  ;;  %v270_v44 = vmul.f32 %v3455_v3, %v234_v35  ;;  %v342_v45 = vmax.f32 %v310_v32, 0.0  ;;  %v303_v46 = vadd.f32 %v3472_v8, %v267_v33  ;;  %v248_v30 = vld [vmem:[%s3446_s23 + $0xa0] sm:$0xff] }
  0x18   : > { %706 = vrot.lane.b32.xlu0 %v642_v2, %s3332_s19  ;;  %381 = vst.msk [vmem:[#allocation2 + $0xa8] sm:$0x1] %vm373_vm1, %v3331_v0  ;;  %v334_v49 = vmax.f32 %v302_v37, 0.0  ;;  %v311_v50 = vadd.f32 %v3472_v8, %v275_v38  ;;  %v278_v51 = vmul.f32 %v3455_v3, %v242_v47  ;;  %v340_v53 = vmax.f32 %v308_v40, 0.0  ;;  %v253_v37 = vld [vmem:[%s3446_s23 + $0xc8] sm:$0xff]  ;;  %v243_v38 = vld [vmem:[%s3446_s23 + $0x78] sm:$0xff] }
  0x19   : > { %382 = vst.msk [vmem:[#allocation2 + $0xc0] sm:$0x1] %vm373_vm1, %v3331_v0  ;;  %v316_v54 = vadd.f32 %v3472_v8, %v280_v41  ;;  %v345_v55 = vmax.f32 %v313_v43, 0.0  ;;  %v306_v56 = vadd.f32 %v3472_v8, %v270_v44  ;;  %v335_v57 = vmax.f32 %v303_v46, 0.0 }
  0x1a   : > { %383 = vst.msk [vmem:[#allocation2 + $0xd8] sm:$0x1] %vm373_vm1, %v3331_v0  ;;  %v314_v58 = vadd.f32 %v3472_v8, %v278_v51  ;;  %v343_v61 = vmax.f32 %v311_v50, 0.0  ;;  %v283_v62 = vmul.f32 %v3455_v3, %v247_v59  ;;  %v273_v63 = vmul.f32 %v3455_v3, %v237_v60 }
  0x1b   : > { %384 = vst.msk [vmem:[#allocation2 + $0xf0] sm:$0x1] %vm373_vm1, %v3331_v0  ;;  %v348_v1 = vmax.f32 %v316_v54, 0.0  ;;  %v338_v5 = vmax.f32 %v306_v56, 0.0  ;;  %v281_v14 = vmul.f32 %v3455_v3, %v245_v11  ;;  %v286_v24 = vmul.f32 %v3455_v3, %v250_v19  ;;  %v246_v56 = vld [vmem:[%s3446_s23 + $0x90] sm:$0xff]  ;;  %v249_v11 = vld [vmem:[%s3446_s23 + $0xa8] sm:$0xff] }
  0x1c   : > { %385 = vst.msk [vmem:[#allocation2 + $0x108] sm:$0x1] %vm373_vm1, %v3331_v0  ;;  %v319_v6 = vadd.f32 %v3472_v8, %v283_v62  ;;  %v309_v7 = vadd.f32 %v3472_v8, %v273_v63  ;;  %v346_v10 = vmax.f32 %v314_v58, 0.0  ;;  %v276_v25 = vmul.f32 %v3455_v3, %v240_v20  ;;  %v257_v19 = vld [vmem:[%s3446_s23 + $0xe8] sm:$0xff] }
  0x1d   : > { %386 = vst.msk [vmem:[#allocation2 + $0x120] sm:$0x1] %vm373_vm1, %v3331_v0  ;;  %v317_v16 = vadd.f32 %v3472_v8, %v281_v14  ;;  %v322_v26 = vadd.f32 %v3472_v8, %v286_v24  ;;  %v284_v33 = vmul.f32 %v3455_v3, %v248_v30  ;;  %v279_v43 = vmul.f32 %v3455_v3, %v243_v38 }
  0x1e   : > { %387 = vst.msk [vmem:[#allocation2 + $0x138] sm:$0x1] %vm373_vm1, %v3331_v0  ;;  %v351_v13 = vmax.f32 %v319_v6, 0.0  ;;  %v341_v15 = vmax.f32 %v309_v7, 0.0  ;;  %v312_v27 = vadd.f32 %v3472_v8, %v276_v25  ;;  %v252_v25 = vld [vmem:[%s3446_s23 + $0xc0] sm:$0xff]  ;;  %vm2158_vm11 = vcmask 257248  }
  0x1f   : > { %388 = vst.msk [vmem:[#allocation2 + $0x150] sm:$0x1] %vm373_vm1, %v3331_v0  ;;  %v349_v23 = vmax.f32 %v317_v16, 0.0  ;;  %vm2383_vm12 = vcmask 290048   ;;  %vm2548_vm13 = vcmask 293888   ;;  %vm2818_vm14 = vcmask 97312  }
  0x20   : > { %389 = vst.msk [vmem:[#allocation2 + $0x168] sm:$0x1] %vm373_vm1, %v3331_v0  ;;  %v344_v32 = vmax.f32 %v312_v27, 0.0 }
  0x21   : > { %390 = vst.msk [vmem:[#allocation2 + $0x180] sm:$0x1] %vm373_vm1, %v3331_v0 }
  0x22   : > { %393 = vst.msk [vmem:[#allocation2 + $0x29] sm:$0x1] %vm373_vm1, %v3331_v0 }
  0x23   : > { %394 = vst.msk [vmem:[#allocation2 + $0x41] sm:$0x1] %vm373_vm1, %v3331_v0 }
  0x24   : > { %395 = vst.msk [vmem:[#allocation2 + $0x59] sm:$0x1] %vm373_vm1, %v3331_v0 }
  0x25   : > { %396 = vst.msk [vmem:[#allocation2 + $0x71] sm:$0x1] %vm373_vm1, %v3331_v0 }
  0x26   : > { %397 = vst.msk [vmem:[#allocation2 + $0x89] sm:$0x1] %vm373_vm1, %v3331_v0 }
  0x27   : > { %398 = vst.msk [vmem:[#allocation2 + $0xa1] sm:$0x1] %vm373_vm1, %v3331_v0 }
  0x28   : > { %399 = vst.msk [vmem:[#allocation2 + $0xb9] sm:$0x1] %vm373_vm1, %v3331_v0 }
  0x29   : > { %400 = vst.msk [vmem:[#allocation2 + $0xd1] sm:$0x1] %vm373_vm1, %v3331_v0 }
  0x2a   : > { %401 = vst.msk [vmem:[#allocation2 + $0xe9] sm:$0x1] %vm373_vm1, %v3331_v0 }
  0x2b   : > { %402 = vst.msk [vmem:[#allocation2 + $0x101] sm:$0x1] %vm373_vm1, %v3331_v0 }
  0x2c   : > { %403 = vst.msk [vmem:[#allocation2 + $0x119] sm:$0x1] %vm373_vm1, %v3331_v0 }
  0x2d   : > { %404 = vst.msk [vmem:[#allocation2 + $0x131] sm:$0x1] %vm373_vm1, %v3331_v0 }
  0x2e   : > { %405 = vst.msk [vmem:[#allocation2 + $0x149] sm:$0x1] %vm373_vm1, %v3331_v0 }
  0x2f   : > { %406 = vst.msk [vmem:[#allocation2 + $0x161] sm:$0x1] %vm373_vm1, %v3331_v0 }
  0x30   : > { %407 = vst.msk [vmem:[#allocation2 + $0x179] sm:$0x1] %vm373_vm1, %v3331_v0 }
  0x31   : > { %408 = vst.msk [vmem:[#allocation2 + $0x191] sm:$0x1] %vm373_vm1, %v3331_v0 }
  0x32   : > { %368 = vst.msk [vmem:[#allocation2 + $0x10] sm:$0x3] %vm367_vm2, %v3331_v0 }
  0x33   : > { %372 = vst.msk [vmem:[#allocation2 + $0x1a8] sm:$0x3] %vm367_vm2, %v3331_v0 }
  0x34   : > { %391 = vst.msk [vmem:[#allocation2 + $0x198] sm:$0x1] %vm373_vm1, %v3331_v0 }
  0x35   : > { %392 = vst.msk [vmem:[#allocation2 + $0x11] sm:$0x1] %vm373_vm1, %v3331_v0 }
  0x36   : > { %409 = vst.msk [vmem:[#allocation2 + $0x1a9] sm:$0x1] %vm373_vm1, %v3331_v0 }
  0x37   : > { %411 = vst.msk [vmem:[#allocation2 + $0x19] sm:$0xff] %vm364_vm0, %v332_v28 }
  0x38   : > { %415 = vst.msk [vmem:[#allocation2 + $0x49] sm:$0xff] %vm364_vm0, %v336_v31  ;;  %v354_v31 = vmax.f32 %v322_v26, 0.0 }
  0x39   : > { %v611_v48 = vld [vmem:[#allocation2 + $0x9] sm:$0xff]  ;;  %412 = vst.msk [vmem:[#allocation2 + $0x21] sm:$0xff] %vm364_vm0, %v333_v36  ;;  %v320_v36 = vadd.f32 %v3472_v8, %v284_v33 }
  0x3a   : > { %v643_v52 = vpack.c.bf16 %v611_v48, %v611_v48  ;;  %418 = vst.msk [vmem:[#allocation2 + $0x69] sm:$0xff] %vm364_vm0, %v339_v39  ;;  %v251_v48 = vld [vmem:[%s3446_s23 + $0xb8] sm:$0xff] }
  0x3b   : > { %416 = vst.msk [vmem:[#allocation2 + $0x51] sm:$0xff] %vm364_vm0, %v337_v42  ;;  %v352_v41 = vmax.f32 %v320_v36, 0.0  ;;  %v289_v42 = vmul.f32 %v3455_v3, %v253_v37  ;;  %v287_v51 = vmul.f32 %v3455_v3, %v251_v48  ;;  %v255_v36 = vld [vmem:[%s3446_s23 + $0xd8] sm:$0xff] }
  0x3c   : > { %708 = vrot.lane.b32.xlu0 %v643_v52, %s3332_s19  ;;  %421 = vst.msk [vmem:[#allocation2 + $0x91] sm:$0xff] %vm364_vm0, %v342_v45  ;;  %v315_v45 = vadd.f32 %v3472_v8, %v279_v43 }
  0x3d   : > { %413 = vst.msk [vmem:[#allocation2 + $0x31] sm:$0xff] %vm364_vm0, %v334_v49  ;;  %v325_v44 = vadd.f32 %v3472_v8, %v289_v42  ;;  %v323_v54 = vadd.f32 %v3472_v8, %v287_v51 }
  0x3e   : > { %v612_v0 = vld [vmem:[#allocation2 + $0x19] sm:$0xff]  ;;  %419 = vst.msk [vmem:[#allocation2 + $0x79] sm:$0xff] %vm364_vm0, %v340_v53  ;;  %v347_v50 = vmax.f32 %v315_v45, 0.0 }
  0x3f   : > { %v644_v2 = vpack.c.bf16 %v612_v0, %v612_v0  ;;  %v616_v4 = vld [vmem:[#allocation2 + $0x49] sm:$0xff]  ;;  %424 = vst.msk [vmem:[#allocation2 + $0xb1] sm:$0xff] %vm364_vm0, %v345_v55  ;;  %v357_v49 = vmax.f32 %v325_v44, 0.0  ;;  %v256_v55 = vld [vmem:[%s3446_s23 + $0xe0] sm:$0xff]  ;;  %v355_v59 = vmax.f32 %v323_v54, 0.0 }
  0x40   : > { %v648_v9 = vpack.c.bf16 %v616_v4, %v616_v4  ;;  %414 = vst.msk [vmem:[#allocation2 + $0x39] sm:$0xff] %vm364_vm0, %v335_v57  ;;  %v613_v12 = vld [vmem:[#allocation2 + $0x21] sm:$0xff]  ;;  %v292_v60 = vmul.f32 %v3455_v3, %v256_v55 }
  0x41   : > { %710 = vrot.lane.b32.xlu1 %v644_v2, %s3332_s19  ;;  %422 = vst.msk [vmem:[#allocation2 + $0x99] sm:$0xff] %vm364_vm0, %v343_v61  ;;  %v645_v17 = vpack.c.bf16 %v613_v12, %v613_v12  ;;  %v619_v21 = vld [vmem:[#allocation2 + $0x69] sm:$0xff]  ;;  %v282_v61 = vmul.f32 %v3455_v3, %v246_v56  ;;  %v513_v56 = vld [vmem:[#allocation2] sm:$0xff] }
  0x42   : > { %427 = vst.msk [vmem:[#allocation2 + $0xd9] sm:$0xff] %vm364_vm0, %v348_v1  ;;  %v651_v28 = vpack.c.bf16 %v619_v21, %v619_v21  ;;  %v617_v34 = vld [vmem:[#allocation2 + $0x51] sm:$0xff]  ;;  %v328_v62 = vadd.f32 %v3472_v8, %v292_v60  ;;  %v293_v21 = vmul.f32 %v3455_v3, %v257_v19 }
  0x43   : > { %417 = vst.msk [vmem:[#allocation2 + $0x61] sm:$0xff] %vm364_vm0, %v338_v5  ;;  %v649_v39 = vpack.c.bf16 %v617_v34, %v617_v34  ;;  %v622_v40 = vld [vmem:[#allocation2 + $0x91] sm:$0xff]  ;;  %v318_v63 = vadd.f32 %v3472_v8, %v282_v61 }
  0x44   : > { %718 = vrot.lane.b32.xlu0 %v648_v9, %s3332_s19  ;;  %v614_v18 = vld [vmem:[#allocation2 + $0x31] sm:$0xff]  ;;  %425 = vst.msk [vmem:[#allocation2 + $0xc1] sm:$0xff] %vm364_vm0, %v346_v10  ;;  %v654_v46 = vpack.c.bf16 %v622_v40, %v622_v40  ;;  %v360_v4 = vmax.f32 %v328_v62, 0.0  ;;  %v329_v24 = vadd.f32 %v3472_v8, %v293_v21  ;;  %v838_v21 = vld [vmem:[#allocation2 + $0x22] sm:$0xff] }
  0x45   : > { %v646_v22 = vpack.c.bf16 %v614_v18, %v614_v18  ;;  %430 = vst.msk [vmem:[#allocation2 + $0xf9] sm:$0xff] %vm364_vm0, %v351_v13  ;;  %v620_v52 = vld [vmem:[#allocation2 + $0x79] sm:$0xff]  ;;  %v254_v2 = vld [vmem:[%s3446_s23 + $0xd0] sm:$0xff]  ;;  %v350_v5 = vmax.f32 %v318_v63, 0.0 }
  0x46   : > { %420 = vst.msk [vmem:[#allocation2 + $0x81] sm:$0xff] %vm364_vm0, %v341_v15  ;;  %v652_v57 = vpack.c.bf16 %v620_v52, %v620_v52  ;;  %v625_v58 = vld [vmem:[#allocation2 + $0xb1] sm:$0xff]  ;;  %v290_v6 = vmul.f32 %v3455_v3, %v254_v2  ;;  %v285_v15 = vmul.f32 %v3455_v3, %v249_v11 }
  0x47   : > { %714 = vrot.lane.b32.xlu2 %v646_v22, %s3332_s19  ;;  %428 = vst.msk [vmem:[#allocation2 + $0xe1] sm:$0xff] %vm364_vm0, %v349_v23  ;;  %v615_v29 = vld [vmem:[#allocation2 + $0x39] sm:$0xff]  ;;  %v657_v0 = vpack.c.bf16 %v625_v58, %v625_v58  ;;  %v836_v58 = vld [vmem:[#allocation2 + $0xa] sm:$0xff] }
  0x48   : > { %v647_v35 = vpack.c.bf16 %v615_v29, %v615_v29  ;;  %433 = vst.msk [vmem:[#allocation2 + $0x121] sm:$0xff] %vm364_vm0, %v354_v31  ;;  %v623_v7 = vld [vmem:[#allocation2 + $0x99] sm:$0xff]  ;;  %v326_v10 = vadd.f32 %v3472_v8, %v290_v6  ;;  %v321_v16 = vadd.f32 %v3472_v8, %v285_v15  ;;  %v288_v29 = vmul.f32 %v3455_v3, %v252_v25  ;;  %v517_v6 = vld [vmem:[#allocation2 + $0x30] sm:$0xff] }
  0x49   : > { %712 = vrot.lane.b32.xlu1 %v645_v17, %s3332_s19  ;;  %423 = vst.msk [vmem:[#allocation2 + $0xa9] sm:$0xff] %vm364_vm0, %v344_v32  ;;  %v655_v12 = vpack.c.bf16 %v623_v7, %v623_v7  ;;  %v628_v13 = vld [vmem:[#allocation2 + $0xd9] sm:$0xff]  ;;  %v868_v60 = vpack.c.bf16 %v836_v58, %v836_v58 }
  0x4a   : > { %431 = vst.msk [vmem:[#allocation2 + $0x109] sm:$0xff] %vm364_vm0, %v352_v41  ;;  %v618_v47 = vld [vmem:[#allocation2 + $0x61] sm:$0xff]  ;;  %v358_v14 = vmax.f32 %v326_v10, 0.0  ;;  %v660_v17 = vpack.c.bf16 %v628_v13, %v628_v13  ;;  %v353_v20 = vmax.f32 %v321_v16, 0.0  ;;  %v324_v30 = vadd.f32 %v3472_v8, %v288_v29  ;;  %v515_v11 = vld [vmem:[#allocation2 + $0x18] sm:$0xff] }
  0x4b   : > { %v650_v53 = vpack.c.bf16 %v618_v47, %v618_v47  ;;  %436 = vst.msk [vmem:[#allocation2 + $0x141] sm:$0xff] %vm364_vm0, %v357_v49  ;;  %v626_v22 = vld [vmem:[#allocation2 + $0xc1] sm:$0xff]  ;;  %v3646_v10 = vpack.c.bf16 %v517_v6, %v517_v6  ;;  %v842_v16 = vld [vmem:[#allocation2 + $0x52] sm:$0xff] }
  0x4c   : > { %724 = vrot.lane.b32.xlu0 %v651_v28, %s3332_s19  ;;  %426 = vst.msk [vmem:[#allocation2 + $0xc9] sm:$0xff] %vm364_vm0, %v347_v50  ;;  %v658_v26 = vpack.c.bf16 %v626_v22, %v626_v22  ;;  %v631_v27 = vld [vmem:[#allocation2 + $0xf9] sm:$0xff]  ;;  %v361_v28 = vmax.f32 %v329_v24, 0.0  ;;  %v356_v33 = vmax.f32 %v324_v30, 0.0 }
  0x4d   : > { %434 = vst.msk [vmem:[#allocation2 + $0x129] sm:$0xff] %vm364_vm0, %v355_v59  ;;  %v621_v1 = vld [vmem:[#allocation2 + $0x81] sm:$0xff]  ;;  %v663_v31 = vpack.c.bf16 %v631_v27, %v631_v27  ;;  %v545_v59 = vpack.c.bf16 %v513_v56, %v513_v56  ;;  %v518_v19 = vld [vmem:[#allocation2 + $0x38] sm:$0xff] }
  0x4e   : > { %v653_v9 = vpack.c.bf16 %v621_v1, %v621_v1  ;;  %439 = vst.msk [vmem:[#allocation2 + $0x169] sm:$0xff] %vm364_vm0, %v360_v4  ;;  %v629_v34 = vld [vmem:[#allocation2 + $0xe1] sm:$0xff]  ;;  %v839_v4 = vld [vmem:[#allocation2 + $0x32] sm:$0xff]  ;;  %v3659_v22 = vpack.c.bf16 %v518_v19, %v518_v19 }
  0x4f   : > { %716 = vrot.lane.b32.xlu2 %v647_v35, %s3332_s19  ;;  %429 = vst.msk [vmem:[#allocation2 + $0xf1] sm:$0xff] %vm364_vm0, %v350_v5  ;;  %v661_v37 = vpack.c.bf16 %v629_v34, %v629_v34  ;;  %v634_v38 = vld [vmem:[#allocation2 + $0x121] sm:$0xff]  ;;  %v871_v7 = vpack.c.bf16 %v839_v4, %v839_v4  ;;  %v847_v58 = vld [vmem:[#allocation2 + $0x92] sm:$0xff] }
  0x50   : > { %437 = vst.msk [vmem:[#allocation2 + $0x151] sm:$0xff] %vm364_vm0, %v358_v14  ;;  %v624_v18 = vld [vmem:[#allocation2 + $0xa9] sm:$0xff]  ;;  %v666_v41 = vpack.c.bf16 %v634_v38, %v634_v38  ;;  %v837_v13 = vld [vmem:[#allocation2 + $0x1a] sm:$0xff] }
  0x51   : > { %720 = vrot.lane.b32.xlu1 %v649_v39, %s3332_s19  ;;  %v656_v23 = vpack.c.bf16 %v624_v18, %v624_v18  ;;  %432 = vst.msk [vmem:[#allocation2 + $0x111] sm:$0xff] %vm364_vm0, %v353_v20  ;;  %v291_v39 = vmul.f32 %v3455_v3, %v255_v36  ;;  %v632_v44 = vld [vmem:[#allocation2 + $0x109] sm:$0xff]  ;;  %v869_v15 = vpack.c.bf16 %v837_v13, %v837_v13  ;;  %v840_v25 = vld [vmem:[#allocation2 + $0x3a] sm:$0xff]  ;;  %v850_v13 = vld [vmem:[#allocation2 + $0xb2] sm:$0xff] }
  0x52   : > { %440 = vst.msk [vmem:[#allocation2 + $0x171] sm:$0xff] %vm364_vm0, %v361_v28  ;;  %v637_v47 = vld [vmem:[#allocation2 + $0x141] sm:$0xff]  ;;  %v874_v20 = vpack.c.bf16 %v842_v16, %v842_v16  ;;  %v872_v28 = vpack.c.bf16 %v840_v25, %v840_v25 }
  0x53   : > { %v627_v32 = vld [vmem:[#allocation2 + $0xc9] sm:$0xff]  ;;  %435 = vst.msk [vmem:[#allocation2 + $0x139] sm:$0xff] %vm364_vm0, %v356_v33  ;;  %v327_v40 = vadd.f32 %v3472_v8, %v291_v39  ;;  %v669_v3 = vpack.c.bf16 %v637_v47, %v637_v47  ;;  %v845_v29 = vld [vmem:[#allocation2 + $0x7a] sm:$0xff] }
  0x54   : > { %730 = vrot.lane.b32.xlu0 %v654_v46, %s3332_s19  ;;  %v659_v35 = vpack.c.bf16 %v627_v32, %v627_v32  ;;  %v664_v46 = vpack.c.bf16 %v632_v44, %v632_v44  ;;  %v635_v8 = vld [vmem:[#allocation2 + $0x129] sm:$0xff]  ;;  %578 = vst.msk [vmem:[#allocation3] sm:$0xf] %vm577_vm3, %v545_v59  ;;  %v877_v32 = vpack.c.bf16 %v845_v29, %v845_v29  ;;  %v524_v44 = vld [vmem:[#allocation2 + $0x80] sm:$0xff] }
  0x55   : > { %v359_v43 = vmax.f32 %v327_v40, 0.0  ;;  %v667_v50 = vpack.c.bf16 %v635_v8, %v635_v8  ;;  %v640_v51 = vld [vmem:[#allocation2 + $0x169] sm:$0xff]  ;;  %582 = vst.msk [vmem:[#allocation3 + $0x10] sm:$0xf] %vm577_vm3, %v3646_v10  ;;  %v3692_v47 = vpack.c.bf16 %v524_v44, %v524_v44 }
  0x56   : > { %v630_v42 = vld [vmem:[#allocation2 + $0xf1] sm:$0xff]  ;;  %v672_v52 = vpack.c.bf16 %v640_v51, %v640_v51  ;;  %v514_v1 = vld [vmem:[#allocation2 + $0x8] sm:$0xff]  ;;  %583 = vst.msk [vmem:[#allocation3 + $0x14] sm:$0xf] %vm577_vm3, %v3659_v22 }
  0x57   : > { %722 = vrot.lane.b32.xlu2 %v650_v53, %s3332_s19  ;;  %v662_v45 = vpack.c.bf16 %v630_v42, %v630_v42  ;;  %438 = vst.msk [vmem:[#allocation2 + $0x159] sm:$0xff] %vm364_vm0, %v359_v43  ;;  %v638_v54 = vld [vmem:[#allocation2 + $0x151] sm:$0xff]  ;;  %v546_v5 = vpack.c.bf16 %v514_v1, %v514_v1  ;;  %v522_v27 = vld [vmem:[#allocation2 + $0x68] sm:$0xff]  ;;  %v848_v42 = vld [vmem:[#allocation2 + $0x9a] sm:$0xff]  ;;  %v3718_v1 = vpack.c.bf16 %v847_v58, %v847_v58 }
  0x58   : > { %v633_v48 = vld [vmem:[#allocation2 + $0x111] sm:$0xff]  ;;  %v3671_v30 = vpack.c.bf16 %v522_v27, %v522_v27  ;;  %v843_v38 = vld [vmem:[#allocation2 + $0x62] sm:$0xff]  ;;  %589 = vst.msk [vmem:[#allocation3 + $0x2c] sm:$0xf] %vm577_vm3, %v3692_v47 }
  0x59   : > { %726 = vrot.lane.b32.xlu1 %v652_v57, %s3332_s19  ;;  %v665_v49 = vpack.c.bf16 %v633_v48, %v633_v48  ;;  %v670_v57 = vpack.c.bf16 %v638_v54, %v638_v54  ;;  %v641_v62 = vld [vmem:[#allocation2 + $0x171] sm:$0xff]  ;;  %579 = vst.msk [vmem:[#allocation3 + $0x4] sm:$0xf] %vm577_vm3, %v546_v5  ;;  %v527_v56 = vld [vmem:[#allocation2 + $0xa8] sm:$0xff] }
  0x5a   : > { %v636_v53 = vld [vmem:[#allocation2 + $0x139] sm:$0xff]  ;;  %v673_v2 = vpack.c.bf16 %v641_v62, %v641_v62  ;;  %587 = vst.msk [vmem:[#allocation3 + $0x24] sm:$0xf] %vm577_vm3, %v3671_v30  ;;  %v841_v33 = vld [vmem:[#allocation2 + $0x4a] sm:$0xff]  ;;  %v3712_v59 = vpack.c.bf16 %v527_v56, %v527_v56  ;;  %v854_v5 = vld [vmem:[#allocation2 + $0xe2] sm:$0xff] }
  0x5b   : > { %v668_v55 = vpack.c.bf16 %v636_v53, %v636_v53  ;;  %v873_v39 = vpack.c.bf16 %v841_v33, %v841_v33  ;;  %v525_v40 = vld [vmem:[#allocation2 + $0x90] sm:$0xff]  ;;  %v851_v53 = vld [vmem:[#allocation2 + $0xc2] sm:$0xff] }
  0x5c   : > { %736 = vrot.lane.b32.xlu0 %v657_v0, %s3332_s19  ;;  %v3687_v43 = vpack.c.bf16 %v525_v40, %v525_v40  ;;  %v528_v51 = vld [vmem:[#allocation2 + $0xb0] sm:$0xff]  ;;  %592 = vst.msk [vmem:[#allocation3 + $0x38] sm:$0xf] %vm577_vm3, %v3712_v59 }
  0x5d   : > { %v3705_v54 = vpack.c.bf16 %v528_v51, %v528_v51  ;;  %v852_v19 = vld [vmem:[#allocation2 + $0xca] sm:$0xff]  ;;  %v856_v51 = vld [vmem:[#allocation2 + $0xfa] sm:$0xff] }
  0x5e   : > { %v639_v61 = vld [vmem:[#allocation2 + $0x159] sm:$0xff]  ;;  %590 = vst.msk [vmem:[#allocation3 + $0x30] sm:$0xf] %vm577_vm3, %v3687_v43  ;;  %v884_v25 = vpack.c.bf16 %v852_v19, %v852_v19  ;;  %v533_v29 = vld [vmem:[#allocation2 + $0xf0] sm:$0xff] }
  0x5f   : > { %728 = vrot.lane.b32.xlu2 %v653_v9, %s3332_s19  ;;  %v671_v0 = vpack.c.bf16 %v639_v61, %v639_v61  ;;  %v835_v9 = vld [vmem:[#allocation2 + $0x2] sm:$0xff]  ;;  %593 = vst.msk [vmem:[#allocation3 + $0x3c] sm:$0xf] %vm577_vm3, %v3705_v54  ;;  %v3754_v33 = vpack.c.bf16 %v533_v29, %v533_v29  ;;  %v861_v19 = vld [vmem:[#allocation2 + $0x13a] sm:$0xff] }
  0x60   : > { %v867_v14 = vpack.c.bf16 %v835_v9, %v835_v9  ;;  %v530_v9 = vld [vmem:[#allocation2 + $0xc8] sm:$0xff] }
  0x61   : > { %732 = vrot.lane.b32.xlu1 %v655_v12, %s3332_s19  ;;  %v3649_v12 = vpack.c.bf16 %v515_v11, %v515_v11  ;;  %v886_v11 = vpack.c.bf16 %v854_v5, %v854_v5  ;;  %598 = vst.msk [vmem:[#allocation3 + $0x50] sm:$0xf] %vm577_vm3, %v3754_v33  ;;  %v539_v5 = vld [vmem:[#allocation2 + $0x138] sm:$0xff] }
  0x63   : > { %580 = vst.msk [vmem:[#allocation3 + $0x8] sm:$0xf] %vm577_vm3, %v3649_v12 }
  0x64   : > { %742 = vrot.lane.b32.xlu0 %v660_v17, %s3332_s19  ;;  %v519_v17 = vld [vmem:[#allocation2 + $0x48] sm:$0xff] }
  0x65   : > { %v3657_v18 = vpack.c.bf16 %v519_v17, %v519_v17 }
  0x67   : > { %734 = vrot.lane.b32.xlu2 %v656_v23, %s3332_s19  ;;  %v516_v23 = vld [vmem:[#allocation2 + $0x20] sm:$0xff]  ;;  %584 = vst.msk [vmem:[#allocation3 + $0x18] sm:$0xf] %vm577_vm3, %v3657_v18 }
  0x68   : > { %v3664_v24 = vpack.c.bf16 %v516_v23, %v516_v23  ;;  %v534_v23 = vld [vmem:[#allocation2 + $0xf8] sm:$0xff] }
  0x69   : > { %738 = vrot.lane.b32.xlu1 %v658_v26, %s3332_s19  ;;  %v870_v26 = vpack.c.bf16 %v838_v21, %v838_v21  ;;  %v3739_v21 = vpack.c.bf16 %v850_v13, %v850_v13  ;;  %v3747_v27 = vpack.c.bf16 %v534_v23, %v534_v23  ;;  %v538_v13 = vld [vmem:[#allocation2 + $0x128] sm:$0xff] }
  0x6a   : > { %581 = vst.msk [vmem:[#allocation3 + $0xc] sm:$0xf] %vm577_vm3, %v3664_v24 }
  0x6b   : > { %599 = vst.msk [vmem:[#allocation3 + $0x54] sm:$0xf] %vm577_vm3, %v3747_v27 }
  0x6c   : > { %748 = vrot.lane.b32.xlu0 %v663_v31, %s3332_s19  ;;  %v521_v31 = vld [vmem:[#allocation2 + $0x60] sm:$0xff] }
  0x6d   : > { %v3676_v34 = vpack.c.bf16 %v521_v31, %v521_v31 }
  0x6f   : > { %740 = vrot.lane.b32.xlu2 %v659_v35, %s3332_s19  ;;  %v520_v35 = vld [vmem:[#allocation2 + $0x50] sm:$0xff]  ;;  %586 = vst.msk [vmem:[#allocation3 + $0x20] sm:$0xf] %vm577_vm3, %v3676_v34 }
  0x71   : > { %744 = vrot.lane.b32.xlu1 %v661_v37, %s3332_s19  ;;  %v3679_v37 = vpack.c.bf16 %v520_v35, %v520_v35  ;;  %v532_v35 = vld [vmem:[#allocation2 + $0xe0] sm:$0xff] }
  0x73   : > { %585 = vst.msk [vmem:[#allocation3 + $0x1c] sm:$0xf] %vm577_vm3, %v3679_v37 }
  0x74   : > { %754 = vrot.lane.b32.xlu0 %v666_v41, %s3332_s19  ;;  %v875_v41 = vpack.c.bf16 %v843_v38, %v843_v38  ;;  %v3757_v38 = vpack.c.bf16 %v532_v35, %v532_v35 }
  0x76   : > { %597 = vst.msk [vmem:[#allocation3 + $0x4c] sm:$0xf] %vm577_vm3, %v3757_v38 }
  0x77   : > { %746 = vrot.lane.b32.xlu2 %v662_v45, %s3332_s19  ;;  %v880_v45 = vpack.c.bf16 %v848_v42, %v848_v42  ;;  %v537_v42 = vld [vmem:[#allocation2 + $0x120] sm:$0xff] }
  0x79   : > { %750 = vrot.lane.b32.xlu1 %v664_v46, %s3332_s19  ;;  %v844_v46 = vld [vmem:[#allocation2 + $0x6a] sm:$0xff] }
  0x7c   : > { %760 = vrot.lane.b32.xlu0 %v669_v3, %s3332_s19  ;;  %v523_v3 = vld [vmem:[#allocation2 + $0x78] sm:$0xff] }
  0x7d   : > { %v3695_v8 = vpack.c.bf16 %v523_v3, %v523_v3 }
  0x7f   : > { %752 = vrot.lane.b32.xlu2 %v665_v49, %s3332_s19  ;;  %v846_v49 = vld [vmem:[#allocation2 + $0x82] sm:$0xff]  ;;  %588 = vst.msk [vmem:[#allocation3 + $0x28] sm:$0xf] %vm577_vm3, %v3695_v8 }
  0x81   : > { %756 = vrot.lane.b32.xlu1 %v667_v50, %s3332_s19  ;;  %v3698_v50 = vpack.c.bf16 %v844_v46, %v844_v46  ;;  %v3768_v46 = vpack.c.bf16 %v537_v42, %v537_v42 }
  0x83   : > { %602 = vst.msk [vmem:[#allocation3 + $0x60] sm:$0xf] %vm577_vm3, %v3768_v46 }
  0x84   : > { %766 = vrot.lane.b32.xlu0 %v672_v52, %s3332_s19  ;;  %v878_v52 = vpack.c.bf16 %v846_v49, %v846_v49 }
  0x87   : > { %758 = vrot.lane.b32.xlu2 %v668_v55, %s3332_s19 }
  0x89   : > { %762 = vrot.lane.b32.xlu1 %v670_v57, %s3332_s19  ;;  %v883_v57 = vpack.c.bf16 %v851_v53, %v851_v53  ;;  %v535_v53 = vld [vmem:[#allocation2 + $0x108] sm:$0xff] }
  0x8a   : > { %v707_v63 = vpop.permute.xlu0 %706  ;;  %v3778_v56 = vpack.c.bf16 %v535_v53, %v535_v53  ;;  %v865_v53 = vld [vmem:[#allocation2 + $0x16a] sm:$0xff] }
  0x8b   : > { %803 = vst.msk [vmem:[#allocation3] sm:$0xf] %vm802_vm4, %v707_v63  ;;  %v849_v63 = vld [vmem:[#allocation2 + $0xaa] sm:$0xff] }
  0x8c   : > { %933 = vrot.lane.b32.xlu0 %v868_v60, %s3333_s28  ;;  %v526_v60 = vld [vmem:[#allocation2 + $0x98] sm:$0xff]  ;;  %v881_v4 = vpack.c.bf16 %v849_v63, %v849_v63  ;;  %600 = vst.msk [vmem:[#allocation3 + $0x58] sm:$0xf] %vm577_vm3, %v3778_v56 }
  0x8d   : > { %v3715_v62 = vpack.c.bf16 %v526_v60, %v526_v60  ;;  %v3781_v60 = vpack.c.bf16 %v856_v51, %v856_v51 }
  0x8f   : > { %764 = vrot.lane.b32.xlu2 %v671_v0, %s3332_s19  ;;  %591 = vst.msk [vmem:[#allocation3 + $0x34] sm:$0xf] %vm577_vm3, %v3715_v62 }
  0x91   : > { %768 = vrot.lane.b32.xlu1 %v673_v2, %s3332_s19  ;;  %v531_v2 = vld [vmem:[#allocation2 + $0xd8] sm:$0xff] }
  0x92   : > { %v3726_v6 = vpack.c.bf16 %v531_v2, %v531_v2 }
  0x94   : > { %939 = vrot.lane.b32.xlu0 %v871_v7, %s3333_s28  ;;  %596 = vst.msk [vmem:[#allocation3 + $0x48] sm:$0xf] %vm577_vm3, %v3726_v6 }
  0x97   : > { %931 = vrot.lane.b32.xlu2 %v867_v14, %s3333_s28  ;;  %v3733_v14 = vpack.c.bf16 %v530_v9, %v530_v9  ;;  %v859_v9 = vld [vmem:[#allocation2 + $0x122] sm:$0xff] }
  0x98   : > { %v3802_v23 = vpack.c.bf16 %v859_v9, %v859_v9 }
  0x99   : > { %935 = vrot.lane.b32.xlu1 %v869_v15, %s3333_s28  ;;  %v529_v15 = vld [vmem:[#allocation2 + $0xc0] sm:$0xff]  ;;  %595 = vst.msk [vmem:[#allocation3 + $0x44] sm:$0xf] %vm577_vm3, %v3733_v14 }
  0x9a   : > { %v3736_v17 = vpack.c.bf16 %v529_v15, %v529_v15 }
  0x9c   : > { %945 = vrot.lane.b32.xlu0 %v874_v20, %s3333_s28  ;;  %594 = vst.msk [vmem:[#allocation3 + $0x40] sm:$0xf] %vm577_vm3, %v3736_v17 }
  0x9f   : > { %937 = vrot.lane.b32.xlu2 %v870_v26, %s3333_s28  ;;  %v857_v26 = vld [vmem:[#allocation2 + $0x10a] sm:$0xff] }
  0xa0   : > { %v889_v31 = vpack.c.bf16 %v857_v26, %v857_v26  ;;  %v893_v26 = vpack.c.bf16 %v861_v19, %v861_v19 }
  0xa1   : > { %941 = vrot.lane.b32.xlu1 %v872_v28, %s3333_s28  ;;  %v715_v36 = vpop.permute.xlu2 %714 }
  0xa2   : > { %807 = vst.msk [vmem:[#allocation3 + $0x10] sm:$0xf] %vm802_vm4, %v715_v36 }
  0xa4   : > { %951 = vrot.lane.b32.xlu0 %v877_v32, %s3333_s28  ;;  %v853_v32 = vld [vmem:[#allocation2 + $0xda] sm:$0xff] }
  0xa7   : > { %943 = vrot.lane.b32.xlu2 %v873_v39, %s3333_s28  ;;  %v855_v39 = vld [vmem:[#allocation2 + $0xf2] sm:$0xff] }
  0xa8   : > { %v887_v44 = vpack.c.bf16 %v855_v39, %v855_v39 }
  0xa9   : > { %947 = vrot.lane.b32.xlu1 %v875_v41, %s3333_s28  ;;  %v717_v48 = vpop.permute.xlu2 %716  ;;  %v3760_v41 = vpack.c.bf16 %v853_v32, %v853_v32  ;;  %v542_v32 = vld [vmem:[#allocation2 + $0x158] sm:$0xff] }
  0xaa   : > { %808 = vst.msk [vmem:[#allocation3 + $0x14] sm:$0xf] %vm802_vm4, %v717_v48  ;;  %v536_v48 = vld [vmem:[#allocation2 + $0x110] sm:$0xff]  ;;  %v3817_v39 = vpack.c.bf16 %v542_v32, %v542_v32 }
  0xac   : > { %957 = vrot.lane.b32.xlu0 %v880_v45, %s3333_s28  ;;  %v860_v45 = vld [vmem:[#allocation2 + $0x12a] sm:$0xff]  ;;  %607 = vst.msk [vmem:[#allocation3 + $0x74] sm:$0xf] %vm577_vm3, %v3817_v39 }
  0xad   : > { %v892_v49 = vpack.c.bf16 %v860_v45, %v860_v45  ;;  %v864_v45 = vld [vmem:[#allocation2 + $0x15a] sm:$0xff] }
  0xae   : > { %v709_v55 = vpop.permute.xlu0 %708 }
  0xaf   : > { %804 = vst.msk [vmem:[#allocation3 + $0x4] sm:$0xf] %vm802_vm4, %v709_v55  ;;  %949 = vrot.lane.b32.xlu2 %v3698_v50, %s3333_s28 }
  0xb1   : > { %953 = vrot.lane.b32.xlu1 %v878_v52, %s3333_s28  ;;  %v723_v61 = vpop.permute.xlu2 %722  ;;  %v3775_v52 = vpack.c.bf16 %v536_v48, %v536_v48 }
  0xb2   : > { %811 = vst.msk [vmem:[#allocation3 + $0x20] sm:$0xf] %vm802_vm4, %v723_v61  ;;  %v540_v61 = vld [vmem:[#allocation2 + $0x140] sm:$0xff] }
  0xb3   : > { %v711_v0 = vpop.permute.xlu1 %710  ;;  %601 = vst.msk [vmem:[#allocation3 + $0x5c] sm:$0xf] %vm577_vm3, %v3775_v52  ;;  %v3789_v2 = vpack.c.bf16 %v540_v61, %v540_v61 }
  0xb4   : > { %805 = vst.msk [vmem:[#allocation3 + $0x8] sm:$0xf] %vm802_vm4, %v711_v0  ;;  %963 = vrot.lane.b32.xlu0 %v883_v57, %s3333_s28  ;;  %v858_v57 = vld [vmem:[#allocation2 + $0x112] sm:$0xff] }
  0xb5   : > { %v890_v63 = vpack.c.bf16 %v858_v57, %v858_v57  ;;  %v863_v0 = vld [vmem:[#allocation2 + $0x152] sm:$0xff]  ;;  %605 = vst.msk [vmem:[#allocation3 + $0x6c] sm:$0xf] %vm577_vm3, %v3789_v2 }
  0xb6   : > { %v719_v7 = vpop.permute.xlu0 %718 }
  0xb7   : > { %809 = vst.msk [vmem:[#allocation3 + $0x18] sm:$0xf] %vm802_vm4, %v719_v7  ;;  %955 = vrot.lane.b32.xlu2 %v3718_v1, %s3333_s28  ;;  %v895_v7 = vpack.c.bf16 %v863_v0, %v863_v0 }
  0xb9   : > { %959 = vrot.lane.b32.xlu1 %v881_v4, %s3333_s28  ;;  %v729_v16 = vpop.permute.xlu2 %728 }
  0xba   : > { %814 = vst.msk [vmem:[#allocation3 + $0x2c] sm:$0xf] %vm802_vm4, %v729_v16  ;;  %v3799_v16 = vpack.c.bf16 %v538_v13, %v538_v13 }
  0xbb   : > { %v713_v20 = vpop.permute.xlu1 %712 }
  0xbc   : > { %806 = vst.msk [vmem:[#allocation3 + $0xc] sm:$0xf] %vm802_vm4, %v713_v20  ;;  %969 = vrot.lane.b32.xlu0 %v886_v11, %s3333_s28  ;;  %v3796_v11 = vpack.c.bf16 %v539_v5, %v539_v5 }
  0xbd   : > { %603 = vst.msk [vmem:[#allocation3 + $0x64] sm:$0xf] %vm577_vm3, %v3799_v16 }
  0xbe   : > { %v725_v28 = vpop.permute.xlu0 %724  ;;  %604 = vst.msk [vmem:[#allocation3 + $0x68] sm:$0xf] %vm577_vm3, %v3796_v11 }
  0xbf   : > { %812 = vst.msk [vmem:[#allocation3 + $0x24] sm:$0xf] %vm802_vm4, %v725_v28  ;;  %961 = vrot.lane.b32.xlu2 %v3739_v21, %s3333_s28  ;;  %v866_v28 = vld [vmem:[#allocation2 + $0x172] sm:$0xff] }
  0xc0   : > { %v898_v35 = vpack.c.bf16 %v866_v28, %v866_v28 }
  0xc1   : > { %965 = vrot.lane.b32.xlu1 %v884_v25, %s3333_s28  ;;  %v735_v36 = vpop.permute.xlu2 %734  ;;  %v543_v25 = vld [vmem:[#allocation2 + $0x168] sm:$0xff] }
  0xc2   : > { %817 = vst.msk [vmem:[#allocation3 + $0x38] sm:$0xf] %vm802_vm4, %v735_v36  ;;  %v3810_v29 = vpack.c.bf16 %v543_v25, %v543_v25  ;;  %v862_v36 = vld [vmem:[#allocation2 + $0x142] sm:$0xff] }
  0xc3   : > { %v721_v40 = vpop.permute.xlu1 %720  ;;  %v3823_v48 = vpack.c.bf16 %v862_v36, %v862_v36 }
  0xc4   : > { %810 = vst.msk [vmem:[#allocation3 + $0x1c] sm:$0xf] %vm802_vm4, %v721_v40  ;;  %975 = vrot.lane.b32.xlu0 %v889_v31, %s3333_s28  ;;  %v541_v40 = vld [vmem:[#allocation2 + $0x150] sm:$0xff] }
  0xc5   : > { %608 = vst.msk [vmem:[#allocation3 + $0x78] sm:$0xf] %vm577_vm3, %v3810_v29 }
  0xc6   : > { %v731_v3 = vpop.permute.xlu0 %730 }
  0xc7   : > { %815 = vst.msk [vmem:[#allocation3 + $0x30] sm:$0xf] %vm802_vm4, %v731_v3  ;;  %967 = vrot.lane.b32.xlu2 %v3760_v41, %s3333_s28 }
  0xc9   : > { %971 = vrot.lane.b32.xlu1 %v887_v44, %s3333_s28  ;;  %v741_v55 = vpop.permute.xlu2 %740  ;;  %v3820_v44 = vpack.c.bf16 %v541_v40, %v541_v40 }
  0xca   : > { %820 = vst.msk [vmem:[#allocation3 + $0x44] sm:$0xf] %vm802_vm4, %v741_v55  ;;  %v544_v55 = vld [vmem:[#allocation2 + $0x170] sm:$0xff] }
  0xcb   : > { %v727_v58 = vpop.permute.xlu1 %726  ;;  %606 = vst.msk [vmem:[#allocation3 + $0x70] sm:$0xf] %vm577_vm3, %v3820_v44 }
  0xcc   : > { %813 = vst.msk [vmem:[#allocation3 + $0x28] sm:$0xf] %vm802_vm4, %v727_v58  ;;  %981 = vrot.lane.b32.xlu0 %v892_v49, %s3333_s28  ;;  %v896_v49 = vpack.c.bf16 %v864_v45, %v864_v45  ;;  %v3835_v58 = vpack.c.bf16 %v544_v55, %v544_v55  ;;  %v2994_v45 = vld [vmem:[#allocation2 + $0x39] sm:$0xff] }
  0xce   : > { %v737_v4 = vpop.permute.xlu0 %736  ;;  %609 = vst.msk [vmem:[#allocation3 + $0x7c] sm:$0xf] %vm577_vm3, %v3835_v58 }
  0xcf   : > { %818 = vst.msk [vmem:[#allocation3 + $0x3c] sm:$0xf] %vm802_vm4, %v737_v4  ;;  %973 = vrot.lane.b32.xlu2 %v3781_v60, %s3333_s28 }
  0xd1   : > { %977 = vrot.lane.b32.xlu1 %v890_v63, %s3333_s28  ;;  %v747_v15 = vpop.permute.xlu2 %746  ;;  %v3838_v63 = vpack.c.bf16 %v865_v53, %v865_v53 }
  0xd2   : > { %823 = vst.msk [vmem:[#allocation3 + $0x50] sm:$0xf] %vm802_vm4, %v747_v15 }
  0xd3   : > { %v733_v20 = vpop.permute.xlu1 %732 }
  0xd4   : > { %816 = vst.msk [vmem:[#allocation3 + $0x34] sm:$0xf] %vm802_vm4, %v733_v20  ;;  %987 = vrot.lane.b32.xlu0 %v895_v7, %s3333_s28 }
  0xd6   : > { %v743_v31 = vpop.permute.xlu0 %742 }
  0xd7   : > { %821 = vst.msk [vmem:[#allocation3 + $0x48] sm:$0xf] %vm802_vm4, %v743_v31  ;;  %979 = vrot.lane.b32.xlu2 %v3802_v23, %s3333_s28 }
  0xd9   : > { %983 = vrot.lane.b32.xlu1 %v893_v26, %s3333_s28  ;;  %v753_v42 = vpop.permute.xlu2 %752  ;;  %v259_v26 = vld [vmem:[%s3446_s23 + $0xf8] sm:$0xff] }
  0xda   : > { %826 = vst.msk [vmem:[#allocation3 + $0x5c] sm:$0xf] %vm802_vm4, %v753_v42 }
  0xdb   : > { %v739_v3 = vpop.permute.xlu1 %738 }
  0xdc   : > { %819 = vst.msk [vmem:[#allocation3 + $0x40] sm:$0xf] %vm802_vm4, %v739_v3  ;;  %993 = vrot.lane.b32.xlu0 %v898_v35, %s3333_s28  ;;  %v2991_v35 = vld [vmem:[#allocation2 + $0x19] sm:$0xff] }
  0xde   : > { %v749_v51 = vpop.permute.xlu0 %748 }
  0xdf   : > { %824 = vst.msk [vmem:[#allocation3 + $0x54] sm:$0xf] %vm802_vm4, %v749_v51  ;;  %985 = vrot.lane.b32.xlu2 %v3823_v48, %s3333_s28  ;;  %v2992_v51 = vld [vmem:[#allocation2 + $0x21] sm:$0xff] }
  0xe1   : > { %989 = vrot.lane.b32.xlu1 %v896_v49, %s3333_s28  ;;  %v759_v57 = vpop.permute.xlu2 %758 }
  0xe2   : > { %829 = vst.msk [vmem:[#allocation3 + $0x68] sm:$0xf] %vm802_vm4, %v759_v57  ;;  %v1321_v57 = vpack.c.bf16 %v2992_v51, %v2992_v51 }
  0xe3   : > { %v745_v61 = vpop.permute.xlu1 %744 }
  0xe4   : > { %822 = vst.msk [vmem:[#allocation3 + $0x4c] sm:$0xf] %vm802_vm4, %v745_v61  ;;  %1163 = vrot.lane.b32.xlu0 %v3646_v10, %s3334_s29 }
  0xe6   : > { %v755_v0 = vpop.permute.xlu0 %754 }
  0xe7   : > { %827 = vst.msk [vmem:[#allocation3 + $0x60] sm:$0xf] %vm802_vm4, %v755_v0  ;;  %991 = vrot.lane.b32.xlu2 %v3838_v63, %s3333_s28  ;;  %v2993_v0 = vld [vmem:[#allocation2 + $0x31] sm:$0xff]  ;;  %s4483_s28 = scalar_lea.vmem %s4686_s4, %s3241_s20 }
  0xe9   : > { %1159 = vrot.lane.b32.xlu1 %v3649_v12, %s3334_s29  ;;  %v765_v4 = vpop.permute.xlu2 %764 }
  0xea   : > { %832 = vst.msk [vmem:[#allocation3 + $0x74] sm:$0xf] %vm802_vm4, %v765_v4 }
  0xeb   : > { %v751_v5 = vpop.permute.xlu1 %750 }
  0xec   : > { %825 = vst.msk [vmem:[#allocation3 + $0x58] sm:$0xf] %vm802_vm4, %v751_v5  ;;  %1169 = vrot.lane.b32.xlu0 %v3679_v37, %s3334_s29  ;;  %v2995_v5 = vld [vmem:[#allocation2 + $0x49] sm:$0xff] }
  0xee   : > { %v761_v7 = vpop.permute.xlu0 %760 }
  0xef   : > { %830 = vst.msk [vmem:[#allocation3 + $0x6c] sm:$0xf] %vm802_vm4, %v761_v7  ;;  %1161 = vrot.lane.b32.xlu2 %v3664_v24, %s3334_s29 }
  0xf1   : > { %1165 = vrot.lane.b32.xlu1 %v3659_v22, %s3334_s29  ;;  %v932_v10 = vpop.permute.xlu2 %931 }
  0xf2   : > { %1028 = vst.msk [vmem:[#allocation3] sm:$0xf] %vm1027_vm5, %v932_v10  ;;  %v3961_v10 = vpack.c.bf16 %v2993_v0, %v2993_v0  ;;  %v3011_v0 = vld [vmem:[#allocation2 + $0x109] sm:$0xff] }
  0xf3   : > { %v757_v12 = vpop.permute.xlu1 %756 }
  0xf4   : > { %828 = vst.msk [vmem:[#allocation3 + $0x64] sm:$0xf] %vm802_vm4, %v757_v12  ;;  %1175 = vrot.lane.b32.xlu0 %v3695_v8, %s3334_s29  ;;  %v1324_v12 = vpack.c.bf16 %v2995_v5, %v2995_v5  ;;  %v3013_v5 = vld [vmem:[#allocation2 + $0x121] sm:$0xff] }
  0xf6   : > { %v767_v37 = vpop.permute.xlu0 %766 }
  0xf7   : > { %833 = vst.msk [vmem:[#allocation3 + $0x78] sm:$0xf] %vm802_vm4, %v767_v37  ;;  %1167 = vrot.lane.b32.xlu2 %v3657_v18, %s3334_s29  ;;  %v3000_v37 = vld [vmem:[#allocation2 + $0x81] sm:$0xff] }
  0xf9   : > { %1171 = vrot.lane.b32.xlu1 %v3676_v34, %s3334_s29  ;;  %v938_v22 = vpop.permute.xlu2 %937 }
  0xfa   : > { %1031 = vst.msk [vmem:[#allocation3 + $0xc] sm:$0xf] %vm1027_vm5, %v938_v22 }
  0xfb   : > { %v763_v24 = vpop.permute.xlu1 %762 }
  0xfc   : > { %831 = vst.msk [vmem:[#allocation3 + $0x70] sm:$0xf] %vm802_vm4, %v763_v24  ;;  %1181 = vrot.lane.b32.xlu0 %v3715_v62, %s3334_s29  ;;  %v258_v62 = vld [vmem:[%s3446_s23 + $0xf0] sm:$0xff]  ;;  %v1329_v24 = vpack.c.bf16 %v3000_v37, %v3000_v37  ;;  %v1342_v37 = vpack.c.bf16 %v3013_v5, %v3013_v5 }
  0xfe   : > { %v934_v8 = vpop.permute.xlu0 %933 }
  0xff   : > { %1029 = vst.msk [vmem:[#allocation3 + $0x4] sm:$0xf] %vm1027_vm5, %v934_v8  ;;  %1173 = vrot.lane.b32.xlu2 %v3671_v30, %s3334_s29  ;;  %v2996_v8 = vld [vmem:[#allocation2 + $0x51] sm:$0xff] }
 0x101   : > { %1177 = vrot.lane.b32.xlu1 %v3692_v47, %s3334_s29  ;;  %v944_v18 = vpop.permute.xlu2 %943  ;;  %v3305_v47 = vld [vmem:[%s4683_s1] ss:$0 sm:$0xff] }
 0x102   : > { %1034 = vst.msk [vmem:[#allocation3 + $0x18] sm:$0xf] %vm1027_vm5, %v944_v18  ;;  %v294_v13 = vmul.f32 %v3305_v47, %v258_v62  ;;  %v3970_v62 = vpack.c.bf16 %v2996_v8, %v2996_v8 }
 0x103   : > { %v769_v34 = vpop.permute.xlu1 %768 }
 0x104   : > { %834 = vst.msk [vmem:[#allocation3 + $0x7c] sm:$0xf] %vm802_vm4, %v769_v34  ;;  %1187 = vrot.lane.b32.xlu0 %v3736_v17, %s3334_s29  ;;  %v3306_v17 = vld [vmem:[%s4684_s2] ss:$0 sm:$0xff]  ;;  %v2998_v34 = vld [vmem:[#allocation2 + $0x69] sm:$0xff] }
 0x105   : > { %v330_v19 = vadd.f32 %v3306_v17, %v294_v13 }
 0x106   : > { %v940_v9 = vpop.permute.xlu0 %939 }
 0x107   : > { %1032 = vst.msk [vmem:[#allocation3 + $0x10] sm:$0xf] %vm1027_vm5, %v940_v9  ;;  %1179 = vrot.lane.b32.xlu2 %v3687_v43, %s3334_s29  ;;  %v362_v43 = vmax.f32 %v330_v19, 0.0 }
 0x109   : > { %1183 = vrot.lane.b32.xlu1 %v3712_v59, %s3334_s29  ;;  %v950_v30 = vpop.permute.xlu2 %949  ;;  %441 = vst.msk [vmem:[#allocation2 + $0x181] sm:$0xff] %vm364_vm0, %v362_v43  ;;  %v3001_v43 = vld [vmem:[#allocation2 + $0x91] sm:$0xff] }
 0x10a   : > { %1037 = vst.msk [vmem:[#allocation3 + $0x24] sm:$0xf] %vm1027_vm5, %v950_v30  ;;  %v1327_v30 = vpack.c.bf16 %v2998_v34, %v2998_v34 }
 0x10b   : > { %v936_v15 = vpop.permute.xlu1 %935 }
 0x10c   : > { %1030 = vst.msk [vmem:[#allocation3 + $0x8] sm:$0xf] %vm1027_vm5, %v936_v15  ;;  %1193 = vrot.lane.b32.xlu0 %v3757_v38, %s3334_s29 }
 0x10e   : > { %v946_v59 = vpop.permute.xlu0 %945 }
 0x10f   : > { %1035 = vst.msk [vmem:[#allocation3 + $0x1c] sm:$0xf] %vm1027_vm5, %v946_v59  ;;  %1185 = vrot.lane.b32.xlu2 %v3705_v54, %s3334_s29 }
 0x110   : > { %v2989_v40 = vld [vmem:[#allocation2 + $0x180] sm:$0xff] }
 0x111   : > { %1189 = vrot.lane.b32.xlu1 %v3733_v14, %s3334_s29  ;;  %v956_v20 = vpop.permute.xlu2 %955 }
 0x112   : > { %1040 = vst.msk [vmem:[#allocation3 + $0x30] sm:$0xf] %vm1027_vm5, %v956_v20 }
 0x113   : > { %v942_v25 = vpop.permute.xlu1 %941 }
 0x114   : > { %1033 = vst.msk [vmem:[#allocation3 + $0x14] sm:$0xf] %vm1027_vm5, %v942_v25  ;;  %1199 = vrot.lane.b32.xlu0 %v3778_v56, %s3334_s29  ;;  %v295_v56 = vmul.f32 %v3305_v47, %v259_v26  ;;  %v3003_v47 = vld [vmem:[#allocation2 + $0xa9] sm:$0xff]  ;;  %v3981_v25 = vpack.c.bf16 %v3001_v43, %v3001_v43  ;;  %v3002_v26 = vld [vmem:[#allocation2 + $0x99] sm:$0xff]  ;;  %v3017_v43 = vld [vmem:[#allocation2 + $0x151] sm:$0xff] }
 0x115   : > { %v1332_v15 = vpack.c.bf16 %v3003_v47, %v3003_v47 }
 0x116   : > { %v952_v38 = vpop.permute.xlu0 %951 }
 0x117   : > { %1038 = vst.msk [vmem:[#allocation3 + $0x28] sm:$0xf] %vm1027_vm5, %v952_v38  ;;  %1191 = vrot.lane.b32.xlu2 %v3726_v6, %s3334_s29  ;;  %v331_v6 = vadd.f32 %v3306_v17, %v295_v56  ;;  %v2999_v17 = vld [vmem:[#allocation2 + $0x79] sm:$0xff]  ;;  %v3006_v38 = vld [vmem:[#allocation2 + $0xc9] sm:$0xff] }
 0x118   : > { %v1328_v20 = vpack.c.bf16 %v2999_v17, %v2999_v17 }
 0x119   : > { %1195 = vrot.lane.b32.xlu1 %v3754_v33, %s3334_s29  ;;  %v962_v54 = vpop.permute.xlu2 %961  ;;  %v363_v31 = vmax.f32 %v331_v6, 0.0 }
 0x11a   : > { %1043 = vst.msk [vmem:[#allocation3 + $0x3c] sm:$0xf] %vm1027_vm5, %v962_v54 }
 0x11b   : > { %v948_v14 = vpop.permute.xlu1 %947  ;;  %442 = vst.msk [vmem:[#allocation2 + $0x189] sm:$0xff] %vm364_vm0, %v363_v31 }
 0x11c   : > { %1036 = vst.msk [vmem:[#allocation3 + $0x20] sm:$0xf] %vm1027_vm5, %v948_v14  ;;  %1205 = vrot.lane.b32.xlu0 %v3799_v16, %s3334_s29  ;;  %v1335_v14 = vpack.c.bf16 %v3006_v38, %v3006_v38 }
 0x11e   : > { %v958_v28 = vpop.permute.xlu0 %957 }
 0x11f   : > { %1041 = vst.msk [vmem:[#allocation3 + $0x34] sm:$0xf] %vm1027_vm5, %v958_v28  ;;  %1197 = vrot.lane.b32.xlu2 %v3747_v27, %s3334_s29  ;;  %v3004_v28 = vld [vmem:[#allocation2 + $0xb1] sm:$0xff] }
 0x120   : > { %v1333_v31 = vpack.c.bf16 %v3004_v28, %v3004_v28 }
 0x121   : > { %1201 = vrot.lane.b32.xlu1 %v3775_v52, %s3334_s29  ;;  %v968_v33 = vpop.permute.xlu2 %967 }
 0x122   : > { %1046 = vst.msk [vmem:[#allocation3 + $0x48] sm:$0xf] %vm1027_vm5, %v968_v33  ;;  %v3988_v33 = vpack.c.bf16 %v3002_v26, %v3002_v26  ;;  %v3024_v26 = vld [vmem:[#allocation2 + $0x22] sm:$0xff] }
 0x123   : > { %v954_v32 = vpop.permute.xlu1 %953  ;;  %v1546_v28 = vpack.c.bf16 %v3024_v26, %v3024_v26 }
 0x124   : > { %1039 = vst.msk [vmem:[#allocation3 + $0x2c] sm:$0xf] %vm1027_vm5, %v954_v32  ;;  %1211 = vrot.lane.b32.xlu0 %v3820_v44, %s3334_s29  ;;  %v1125_v44 = vpack.c.bf16 %v2989_v40, %v2989_v40  ;;  %v3009_v32 = vld [vmem:[#allocation2 + $0xf1] sm:$0xff] }
 0x126   : > { %v964_v16 = vpop.permute.xlu0 %963 }
 0x127   : > { %1044 = vst.msk [vmem:[#allocation3 + $0x40] sm:$0xf] %vm1027_vm5, %v964_v16  ;;  %1203 = vrot.lane.b32.xlu2 %v3768_v46, %s3334_s29  ;;  %v1320_v46 = vpack.c.bf16 %v2991_v35, %v2991_v35 }
 0x129   : > { %1207 = vrot.lane.b32.xlu1 %v3796_v11, %s3334_s29  ;;  %v974_v27 = vpop.permute.xlu2 %973 }
 0x12a   : > { %1049 = vst.msk [vmem:[#allocation3 + $0x54] sm:$0xf] %vm1027_vm5, %v974_v27  ;;  %v3995_v27 = vpack.c.bf16 %v3009_v32, %v3009_v32  ;;  %v3022_v32 = vld [vmem:[#allocation2 + $0x189] sm:$0xff] }
 0x12b   : > { %v960_v52 = vpop.permute.xlu1 %959 }
 0x12c   : > { %1042 = vst.msk [vmem:[#allocation3 + $0x38] sm:$0xf] %vm1027_vm5, %v960_v52  ;;  %1217 = vrot.lane.b32.xlu0 %v3835_v58, %s3334_s29  ;;  %v2997_v58 = vld [vmem:[#allocation2 + $0x61] sm:$0xff] }
 0x12d   : > { %v1326_v61 = vpack.c.bf16 %v2997_v58, %v2997_v58  ;;  %v3005_v52 = vld [vmem:[#allocation2 + $0xc1] sm:$0xff]  ;;  %v3015_v58 = vld [vmem:[#allocation2 + $0x139] sm:$0xff] }
 0x12e   : > { %v970_v36 = vpop.permute.xlu0 %969 }
 0x12f   : > { %1047 = vst.msk [vmem:[#allocation3 + $0x4c] sm:$0xf] %vm1027_vm5, %v970_v36  ;;  %1209 = vrot.lane.b32.xlu2 %v3789_v2, %s3334_s29  ;;  %v3947_v2 = vpack.c.bf16 %v2994_v45, %v2994_v45  ;;  %v3007_v36 = vld [vmem:[#allocation2 + $0xd9] sm:$0xff] }
 0x130   : > { %v1336_v40 = vpack.c.bf16 %v3007_v36, %v3007_v36  ;;  %v3027_v36 = vld [vmem:[#allocation2 + $0x4a] sm:$0xff] }
 0x131   : > { %1213 = vrot.lane.b32.xlu1 %v3817_v39, %s3334_s29  ;;  %v980_v11 = vpop.permute.xlu2 %979  ;;  %v2990_v39 = vld [vmem:[#allocation2 + $0x188] sm:$0xff] }
 0x132   : > { %1052 = vst.msk [vmem:[#allocation3 + $0x60] sm:$0xf] %vm1027_vm5, %v980_v11  ;;  %v3951_v55 = vpack.c.bf16 %v2990_v39, %v2990_v39  ;;  %v1334_v11 = vpack.c.bf16 %v3005_v52, %v3005_v52 }
 0x133   : > { %v966_v42 = vpop.permute.xlu1 %965 }
 0x134   : > { %1045 = vst.msk [vmem:[#allocation3 + $0x44] sm:$0xf] %vm1027_vm5, %v966_v42  ;;  %1384 = vrot.lane.b32.xlu0 %v1320_v46, %s3335_s8  ;;  %v3012_v42 = vld [vmem:[#allocation2 + $0x111] sm:$0xff] }
 0x135   : > { %v4004_v45 = vpack.c.bf16 %v3012_v42, %v3012_v42 }
 0x136   : > { %v976_v3 = vpop.permute.xlu0 %975 }
 0x137   : > { %1050 = vst.msk [vmem:[#allocation3 + $0x58] sm:$0xf] %vm1027_vm5, %v976_v3  ;;  %1215 = vrot.lane.b32.xlu2 %v3810_v29, %s3334_s29  ;;  %v3008_v3 = vld [vmem:[#allocation2 + $0xe1] sm:$0xff] }
 0x139   : > { %1219 = vrot.lane.b32.xlu1 %v1125_v44, %s3334_s29  ;;  %v986_v49 = vpop.permute.xlu2 %985 }
 0x13a   : > { %1055 = vst.msk [vmem:[#allocation3 + $0x6c] sm:$0xf] %vm1027_vm5, %v986_v49  ;;  %v3010_v49 = vld [vmem:[#allocation2 + $0xf9] sm:$0xff] }
 0x13b   : > { %v972_v53 = vpop.permute.xlu1 %971 }
 0x13c   : > { %1048 = vst.msk [vmem:[#allocation3 + $0x50] sm:$0xf] %vm1027_vm5, %v972_v53  ;;  %1390 = vrot.lane.b32.xlu0 %v3947_v2, %s3335_s8  ;;  %v1337_v53 = vpack.c.bf16 %v3008_v3, %v3008_v3 }
 0x13e   : > { %v982_v29 = vpop.permute.xlu0 %981 }
 0x13f   : > { %1053 = vst.msk [vmem:[#allocation3 + $0x64] sm:$0xf] %vm1027_vm5, %v982_v29  ;;  %1221 = vrot.lane.b32.xlu2 %v3951_v55, %s3334_s29 }
 0x141   : > { %1386 = vrot.lane.b32.xlu1 %v1321_v57, %s3335_s8  ;;  %v992_v4 = vpop.permute.xlu2 %991  ;;  %v4011_v57 = vpack.c.bf16 %v3010_v49, %v3010_v49 }
 0x142   : > { %1058 = vst.msk [vmem:[#allocation3 + $0x78] sm:$0xf] %vm1027_vm5, %v992_v4 }
 0x143   : > { %v978_v7 = vpop.permute.xlu1 %977 }
 0x144   : > { %1051 = vst.msk [vmem:[#allocation3 + $0x5c] sm:$0xf] %vm1027_vm5, %v978_v7  ;;  %1396 = vrot.lane.b32.xlu0 %v1326_v61, %s3335_s8  ;;  %v1344_v61 = vpack.c.bf16 %v3015_v58, %v3015_v58 }
 0x146   : > { %v988_v22 = vpop.permute.xlu0 %987 }
 0x147   : > { %1056 = vst.msk [vmem:[#allocation3 + $0x70] sm:$0xf] %vm1027_vm5, %v988_v22  ;;  %1388 = vrot.lane.b32.xlu2 %v3961_v10, %s3335_s8  ;;  %v3018_v22 = vld [vmem:[#allocation2 + $0x159] sm:$0xff] }
 0x148   : > { %v4025_v8 = vpack.c.bf16 %v3018_v22, %v3018_v22  ;;  %v3031_v22 = vld [vmem:[#allocation2 + $0x7a] sm:$0xff] }
 0x149   : > { %1392 = vrot.lane.b32.xlu1 %v1324_v12, %s3335_s8  ;;  %v1162_v18 = vpop.permute.xlu2 %1161  ;;  %v4018_v12 = vpack.c.bf16 %v3011_v0, %v3011_v0 }
 0x14a   : > { %1257 = vst.msk [vmem:[#allocation3 + $0x4] sm:$0xf] %vm1255_vm6, %v1162_v18  ;;  %v3014_v18 = vld [vmem:[#allocation2 + $0x129] sm:$0xff] }
 0x14b   : > { %v984_v9 = vpop.permute.xlu1 %983  ;;  %v4029_v47 = vpack.c.bf16 %v3014_v18, %v3014_v18 }
 0x14c   : > { %1054 = vst.msk [vmem:[#allocation3 + $0x68] sm:$0xf] %vm1027_vm5, %v984_v9  ;;  %1402 = vrot.lane.b32.xlu0 %v1329_v24, %s3335_s8  ;;  %v3016_v9 = vld [vmem:[#allocation2 + $0x141] sm:$0xff] }
 0x14e   : > { %v994_v13 = vpop.permute.xlu0 %993 }
 0x14f   : > { %1059 = vst.msk [vmem:[#allocation3 + $0x7c] sm:$0xf] %vm1027_vm5, %v994_v13  ;;  %1394 = vrot.lane.b32.xlu2 %v3970_v62, %s3335_s8  ;;  %v1345_v13 = vpack.c.bf16 %v3016_v9, %v3016_v9  ;;  %v3032_v9 = vld [vmem:[#allocation2 + $0x82] sm:$0xff] }
 0x151   : > { %1398 = vrot.lane.b32.xlu1 %v1327_v30, %s3335_s8  ;;  %v1168_v19 = vpop.permute.xlu2 %1167 }
 0x152   : > { %1260 = vst.msk [vmem:[#allocation3 + $0x10] sm:$0xf] %vm1255_vm6, %v1168_v19 }
 0x153   : > { %v990_v59 = vpop.permute.xlu1 %989 }
 0x154   : > { %1057 = vst.msk [vmem:[#allocation3 + $0x74] sm:$0xf] %vm1027_vm5, %v990_v59  ;;  %1408 = vrot.lane.b32.xlu0 %v1332_v15, %s3335_s8  ;;  %v3021_v15 = vld [vmem:[#allocation2 + $0x181] sm:$0xff] }
 0x155   : > { %v1350_v19 = vpack.c.bf16 %v3021_v15, %v3021_v15 }
 0x156   : > { %v1164_v54 = vpop.permute.xlu0 %1163 }
 0x157   : > { %1258 = vst.msk [vmem:[#allocation3 + $0x8] sm:$0xf] %vm1255_vm6, %v1164_v54  ;;  %1400 = vrot.lane.b32.xlu2 %v1328_v20, %s3335_s8  ;;  %v3019_v20 = vld [vmem:[#allocation2 + $0x169] sm:$0xff]  ;;  %v4039_v54 = vpack.c.bf16 %v3017_v43, %v3017_v43 }
 0x158   : > { %v3035_v43 = vld [vmem:[#allocation2 + $0xaa] sm:$0xff] }
 0x159   : > { %1404 = vrot.lane.b32.xlu1 %v3981_v25, %s3335_s8  ;;  %v1174_v56 = vpop.permute.xlu2 %1173  ;;  %v4102_v26 = vpack.c.bf16 %v3035_v43, %v3035_v43 }
 0x15a   : > { %1263 = vst.msk [vmem:[#allocation3 + $0x1c] sm:$0xf] %vm1255_vm6, %v1174_v56 }
 0x15b   : > { %v1160_v6 = vpop.permute.xlu1 %1159 }
 0x15c   : > { %1256 = vst.msk [vmem:[#allocation3] sm:$0xf] %vm1255_vm6, %v1160_v6  ;;  %1414 = vrot.lane.b32.xlu0 %v1335_v14, %s3335_s8  ;;  %v4043_v14 = vpack.c.bf16 %v3019_v20, %v3019_v20  ;;  %v3020_v6 = vld [vmem:[#allocation2 + $0x171] sm:$0xff]  ;;  %v3037_v20 = vld [vmem:[#allocation2 + $0xc2] sm:$0xff] }
 0x15d   : > { %v4051_v52 = vpack.c.bf16 %v3020_v6, %v3020_v6 }
 0x15e   : > { %v1170_v16 = vpop.permute.xlu0 %1169 }
 0x15f   : > { %1261 = vst.msk [vmem:[#allocation3 + $0x14] sm:$0xf] %vm1255_vm6, %v1170_v16  ;;  %1406 = vrot.lane.b32.xlu2 %v3988_v33, %s3335_s8 }
 0x161   : > { %1410 = vrot.lane.b32.xlu1 %v1333_v31, %s3335_s8  ;;  %v1180_v35 = vpop.permute.xlu2 %1179 }
 0x162   : > { %1266 = vst.msk [vmem:[#allocation3 + $0x28] sm:$0xf] %vm1255_vm6, %v1180_v35  ;;  %v1351_v35 = vpack.c.bf16 %v3022_v32, %v3022_v32 }
 0x163   : > { %v1166_v46 = vpop.permute.xlu1 %1165 }
 0x164   : > { %1259 = vst.msk [vmem:[#allocation3 + $0xc] sm:$0xf] %vm1255_vm6, %v1166_v46  ;;  %1420 = vrot.lane.b32.xlu0 %v3995_v27, %s3335_s8 }
 0x166   : > { %v1176_v44 = vpop.permute.xlu0 %1175 }
 0x167   : > { %1264 = vst.msk [vmem:[#allocation3 + $0x20] sm:$0xf] %vm1255_vm6, %v1176_v44  ;;  %1412 = vrot.lane.b32.xlu2 %v1334_v11, %s3335_s8  ;;  %v4058_v11 = vpack.c.bf16 %v3027_v36, %v3027_v36  ;;  %v3025_v44 = vld [vmem:[#allocation2 + $0x32] sm:$0xff] }
 0x168   : > { %v4065_v49 = vpack.c.bf16 %v3025_v44, %v3025_v44  ;;  %v3041_v36 = vld [vmem:[#allocation2 + $0xf2] sm:$0xff] }
 0x169   : > { %1416 = vrot.lane.b32.xlu1 %v1336_v40, %s3335_s8  ;;  %v1186_v39 = vpop.permute.xlu2 %1185  ;;  %v3023_v40 = vld [vmem:[#allocation2 + $0x1a] sm:$0xff]  ;;  %v4125_v44 = vpack.c.bf16 %v3041_v36, %v3041_v36 }
 0x16a   : > { %1269 = vst.msk [vmem:[#allocation3 + $0x34] sm:$0xf] %vm1255_vm6, %v1186_v39  ;;  %v1545_v39 = vpack.c.bf16 %v3023_v40, %v3023_v40  ;;  %v3043_v40 = vld [vmem:[#allocation2 + $0x10a] sm:$0xff]  ;;  %v3056_v36 = vld [vmem:[#allocation2 + $0x38] sm:$0xff] }
 0x16b   : > { %v1172_v51 = vpop.permute.xlu1 %1171 }
 0x16c   : > { %1262 = vst.msk [vmem:[#allocation3 + $0x18] sm:$0xf] %vm1255_vm6, %v1172_v51  ;;  %1426 = vrot.lane.b32.xlu0 %v4004_v45, %s3335_s8 }
 0x16e   : > { %v1182_v29 = vpop.permute.xlu0 %1181 }
 0x16f   : > { %1267 = vst.msk [vmem:[#allocation3 + $0x2c] sm:$0xf] %vm1255_vm6, %v1182_v29  ;;  %1418 = vrot.lane.b32.xlu2 %v1337_v53, %s3335_s8  ;;  %v3026_v53 = vld [vmem:[#allocation2 + $0x3a] sm:$0xff]  ;;  %v3028_v29 = vld [vmem:[#allocation2 + $0x52] sm:$0xff] }
 0x170   : > { %v4072_v0 = vpack.c.bf16 %v3026_v53, %v3026_v53  ;;  %v3046_v53 = vld [vmem:[#allocation2 + $0x12a] sm:$0xff] }
 0x171   : > { %1422 = vrot.lane.b32.xlu1 %v4011_v57, %s3335_s8  ;;  %v1192_v4 = vpop.permute.xlu2 %1191 }
 0x172   : > { %1272 = vst.msk [vmem:[#allocation3 + $0x40] sm:$0xf] %vm1255_vm6, %v1192_v4  ;;  %v4077_v4 = vpack.c.bf16 %v3028_v29, %v3028_v29 }
 0x173   : > { %v1178_v7 = vpop.permute.xlu1 %1177 }
 0x174   : > { %1265 = vst.msk [vmem:[#allocation3 + $0x24] sm:$0xf] %vm1255_vm6, %v1178_v7  ;;  %1432 = vrot.lane.b32.xlu0 %v1344_v61, %s3335_s8  ;;  %v3029_v7 = vld [vmem:[#allocation2 + $0x62] sm:$0xff] }
 0x175   : > { %v1551_v18 = vpack.c.bf16 %v3029_v7, %v3029_v7 }
 0x176   : > { %v1188_v24 = vpop.permute.xlu0 %1187 }
 0x177   : > { %1270 = vst.msk [vmem:[#allocation3 + $0x38] sm:$0xf] %vm1255_vm6, %v1188_v24  ;;  %1424 = vrot.lane.b32.xlu2 %v4018_v12, %s3335_s8 }
 0x179   : > { %1428 = vrot.lane.b32.xlu1 %v1342_v37, %s3335_s8  ;;  %v1198_v34 = vpop.permute.xlu2 %1197 }
 0x17a   : > { %1275 = vst.msk [vmem:[#allocation3 + $0x4c] sm:$0xf] %vm1255_vm6, %v1198_v34 }
 0x17b   : > { %v1184_v30 = vpop.permute.xlu1 %1183 }
 0x17c   : > { %1268 = vst.msk [vmem:[#allocation3 + $0x30] sm:$0xf] %vm1255_vm6, %v1184_v30  ;;  %1438 = vrot.lane.b32.xlu0 %v4025_v8, %s3335_s8 }
 0x17e   : > { %v1194_v17 = vpop.permute.xlu0 %1193 }
 0x17f   : > { %1273 = vst.msk [vmem:[#allocation3 + $0x44] sm:$0xf] %vm1255_vm6, %v1194_v17  ;;  %1430 = vrot.lane.b32.xlu2 %v4029_v47, %s3335_s8  ;;  %v1554_v17 = vpack.c.bf16 %v3032_v9, %v3032_v9  ;;  %v3050_v9 = vld [vmem:[#allocation2 + $0x15a] sm:$0xff] }
 0x181   : > { %1434 = vrot.lane.b32.xlu1 %v1345_v13, %s3335_s8  ;;  %v1204_v59 = vpop.permute.xlu2 %1203  ;;  %v3034_v13 = vld [vmem:[#allocation2 + $0x9a] sm:$0xff] }
 0x182   : > { %1278 = vst.msk [vmem:[#allocation3 + $0x58] sm:$0xf] %vm1255_vm6, %v1204_v59 }
 0x183   : > { %v1190_v38 = vpop.permute.xlu1 %1189 }
 0x184   : > { %1271 = vst.msk [vmem:[#allocation3 + $0x3c] sm:$0xf] %vm1255_vm6, %v1190_v38  ;;  %1444 = vrot.lane.b32.xlu0 %v1350_v19, %s3335_s8 }
 0x186   : > { %v1200_v56 = vpop.permute.xlu0 %1199 }
 0x187   : > { %1276 = vst.msk [vmem:[#allocation3 + $0x50] sm:$0xf] %vm1255_vm6, %v1200_v56  ;;  %1436 = vrot.lane.b32.xlu2 %v4039_v54, %s3335_s8 }
 0x189   : > { %1440 = vrot.lane.b32.xlu1 %v4043_v14, %s3335_s8  ;;  %v1210_v31 = vpop.permute.xlu2 %1209 }
 0x18a   : > { %1281 = vst.msk [vmem:[#allocation3 + $0x64] sm:$0xf] %vm1255_vm6, %v1210_v31  ;;  %v3040_v31 = vld [vmem:[#allocation2 + $0xe2] sm:$0xff] }
 0x18b   : > { %v1196_v16 = vpop.permute.xlu1 %1195 }
 0x18c   : > { %1274 = vst.msk [vmem:[#allocation3 + $0x48] sm:$0xf] %vm1255_vm6, %v1196_v16  ;;  %1611 = vrot.lane.b32.xlu0 %v1546_v28, %s3336_s9  ;;  %v3038_v28 = vld [vmem:[#allocation2 + $0xca] sm:$0xff] }
 0x18d   : > { %v4115_v16 = vpack.c.bf16 %v3038_v28, %v3038_v28 }
 0x18e   : > { %v1206_v46 = vpop.permute.xlu0 %1205 }
 0x18f   : > { %1279 = vst.msk [vmem:[#allocation3 + $0x5c] sm:$0xf] %vm1255_vm6, %v1206_v46  ;;  %1442 = vrot.lane.b32.xlu2 %v4051_v52, %s3335_s8 }
 0x191   : > { %1446 = vrot.lane.b32.xlu1 %v1351_v35, %s3335_s8  ;;  %v1216_v42 = vpop.permute.xlu2 %1215 }
 0x192   : > { %1284 = vst.msk [vmem:[#allocation3 + $0x70] sm:$0xf] %vm1255_vm6, %v1216_v42 }
 0x193   : > { %v1202_v3 = vpop.permute.xlu1 %1201 }
 0x194   : > { %1277 = vst.msk [vmem:[#allocation3 + $0x54] sm:$0xf] %vm1255_vm6, %v1202_v3  ;;  %1617 = vrot.lane.b32.xlu0 %v4058_v11, %s3336_s9 }
 0x196   : > { %v1212_v51 = vpop.permute.xlu0 %1211 }
 0x197   : > { %1282 = vst.msk [vmem:[#allocation3 + $0x68] sm:$0xf] %vm1255_vm6, %v1212_v51  ;;  %1609 = vrot.lane.b32.xlu2 %v1545_v39, %s3336_s9  ;;  %v3044_v39 = vld [vmem:[#allocation2 + $0x112] sm:$0xff] }
 0x198   : > { %v4138_v29 = vpack.c.bf16 %v3044_v39, %v3044_v39 }
 0x199   : > { %1613 = vrot.lane.b32.xlu1 %v4065_v49, %s3336_s9  ;;  %v1222_v58 = vpop.permute.xlu2 %1221 }
 0x19a   : > { %1287 = vst.msk [vmem:[#allocation3 + $0x7c] sm:$0xf] %vm1255_vm6, %v1222_v58 }
 0x19b   : > { %v1208_v61 = vpop.permute.xlu1 %1207 }
 0x19c   : > { %1280 = vst.msk [vmem:[#allocation3 + $0x60] sm:$0xf] %vm1255_vm6, %v1208_v61  ;;  %1623 = vrot.lane.b32.xlu0 %v3698_v50, %s3336_s9  ;;  %v1553_v50 = vpack.c.bf16 %v3031_v22, %v3031_v22 }
 0x19e   : > { %v1218_v5 = vpop.permute.xlu0 %1217 }
 0x19f   : > { %1285 = vst.msk [vmem:[#allocation3 + $0x74] sm:$0xf] %vm1255_vm6, %v1218_v5  ;;  %1615 = vrot.lane.b32.xlu2 %v4072_v0, %s3336_s9  ;;  %v3047_v5 = vld [vmem:[#allocation2 + $0x13a] sm:$0xff] }
 0x1a1   : > { %1619 = vrot.lane.b32.xlu1 %v4077_v4, %s3336_s9  ;;  %v1389_v37 = vpop.permute.xlu2 %1388 }
 0x1a2   : > { %1483 = vst.msk [vmem:[#allocation3 + $0x8] sm:$0xf] %vm1480_vm7, %v1389_v37  ;;  %v3049_v37 = vld [vmem:[#allocation2 + $0x152] sm:$0xff] }
 0x1a3   : > { %v1214_v24 = vpop.permute.xlu1 %1213 }
 0x1a4   : > { %1283 = vst.msk [vmem:[#allocation3 + $0x6c] sm:$0xf] %vm1255_vm6, %v1214_v24  ;;  %1629 = vrot.lane.b32.xlu0 %v3718_v1, %s3336_s9  ;;  %v4095_v1 = vpack.c.bf16 %v3034_v13, %v3034_v13  ;;  %v4151_v24 = vpack.c.bf16 %v3047_v5, %v3047_v5  ;;  %v3052_v13 = vld [vmem:[#allocation2 + $0x172] sm:$0xff] }
 0x1a6   : > { %v1385_v34 = vpop.permute.xlu0 %1384 }
 0x1a7   : > { %1481 = vst.msk [vmem:[#allocation3] sm:$0xf] %vm1480_vm7, %v1385_v34  ;;  %1621 = vrot.lane.b32.xlu2 %v1551_v18, %s3336_s9  ;;  %v3054_v18 = vld [vmem:[#allocation2 + $0x18a] sm:$0xff] }
 0x1a8   : > { %v4161_v34 = vpack.c.bf16 %v3054_v18, %v3054_v18 }
 0x1a9   : > { %1625 = vrot.lane.b32.xlu1 %v1553_v50, %s3336_s9  ;;  %v1395_v30 = vpop.permute.xlu2 %1394 }
 0x1aa   : > { %1486 = vst.msk [vmem:[#allocation3 + $0x14] sm:$0xf] %vm1480_vm7, %v1395_v30 }
 0x1ab   : > { %v1220_v15 = vpop.permute.xlu1 %1219 }
 0x1ac   : > { %1286 = vst.msk [vmem:[#allocation3 + $0x78] sm:$0xf] %vm1255_vm6, %v1220_v15  ;;  %1635 = vrot.lane.b32.xlu0 %v3739_v21, %s3336_s9  ;;  %v4107_v21 = vpack.c.bf16 %v3037_v20, %v3037_v20  ;;  %v4166_v15 = vpack.c.bf16 %v3050_v9, %v3050_v9  ;;  %v3053_v20 = vld [vmem:[#allocation2 + $0x182] sm:$0xff] }
 0x1ae   : > { %v1391_v19 = vpop.permute.xlu0 %1390 }
 0x1af   : > { %1484 = vst.msk [vmem:[#allocation3 + $0xc] sm:$0xf] %vm1480_vm7, %v1391_v19  ;;  %1627 = vrot.lane.b32.xlu2 %v1554_v17, %s3336_s9  ;;  %v4171_v17 = vpack.c.bf16 %v3052_v13, %v3052_v13  ;;  %v3057_v19 = vld [vmem:[#allocation2 + $0x48] sm:$0xff]  ;;  %v3062_v13 = vld [vmem:[#allocation2 + $0x80] sm:$0xff] }
 0x1b1   : > { %1631 = vrot.lane.b32.xlu1 %v4095_v1, %s3336_s9  ;;  %v1401_v59 = vpop.permute.xlu2 %1400 }
 0x1b2   : > { %1489 = vst.msk [vmem:[#allocation3 + $0x20] sm:$0xf] %vm1480_vm7, %v1401_v59  ;;  %v1775_v59 = vpack.c.bf16 %v3057_v19, %v3057_v19  ;;  %v3064_v19 = vld [vmem:[#allocation2 + $0x98] sm:$0xff] }
 0x1b3   : > { %v1387_v38 = vpop.permute.xlu1 %1386 }
 0x1b4   : > { %1482 = vst.msk [vmem:[#allocation3 + $0x4] sm:$0xf] %vm1480_vm7, %v1387_v38  ;;  %1641 = vrot.lane.b32.xlu0 %v3760_v41, %s3336_s9  ;;  %v1562_v41 = vpack.c.bf16 %v3040_v31, %v3040_v31 }
 0x1b6   : > { %v1397_v56 = vpop.permute.xlu0 %1396 }
 0x1b7   : > { %1487 = vst.msk [vmem:[#allocation3 + $0x18] sm:$0xf] %vm1480_vm7, %v1397_v56  ;;  %1633 = vrot.lane.b32.xlu2 %v4102_v26, %s3336_s9  ;;  %v3055_v56 = vld [vmem:[#allocation2 + $0x30] sm:$0xff] }
 0x1b8   : > { %v1773_v31 = vpack.c.bf16 %v3055_v56, %v3055_v56 }
 0x1b9   : > { %1637 = vrot.lane.b32.xlu1 %v4107_v21, %s3336_s9  ;;  %v1407_v6 = vpop.permute.xlu2 %1406 }
 0x1ba   : > { %1492 = vst.msk [vmem:[#allocation3 + $0x2c] sm:$0xf] %vm1480_vm7, %v1407_v6  ;;  %v4179_v6 = vpack.c.bf16 %v3053_v20, %v3053_v20  ;;  %v1782_v20 = vpack.c.bf16 %v3064_v19, %v3064_v19  ;;  %v3078_v19 = vld [vmem:[#allocation2 + $0x140] sm:$0xff] }
 0x1bb   : > { %v1393_v32 = vpop.permute.xlu1 %1392 }
 0x1bc   : > { %1485 = vst.msk [vmem:[#allocation3 + $0x10] sm:$0xf] %vm1480_vm7, %v1393_v32  ;;  %1647 = vrot.lane.b32.xlu0 %v3781_v60, %s3336_s9  ;;  %v4130_v60 = vpack.c.bf16 %v3043_v40, %v3043_v40  ;;  %v3060_v32 = vld [vmem:[#allocation2 + $0x68] sm:$0xff]  ;;  %v3058_v40 = vld [vmem:[#allocation2 + $0x50] sm:$0xff] }
 0x1bd   : > { %v1776_v39 = vpack.c.bf16 %v3058_v40, %v3058_v40  ;;  %v3072_v40 = vld [vmem:[#allocation2 + $0xf8] sm:$0xff] }
 0x1be   : > { %v1403_v35 = vpop.permute.xlu0 %1402 }
 0x1bf   : > { %1490 = vst.msk [vmem:[#allocation3 + $0x24] sm:$0xf] %vm1480_vm7, %v1403_v35  ;;  %1639 = vrot.lane.b32.xlu2 %v4115_v16, %s3336_s9  ;;  %v1778_v35 = vpack.c.bf16 %v3060_v32, %v3060_v32 }
 0x1c1   : > { %1643 = vrot.lane.b32.xlu1 %v1562_v41, %s3336_s9  ;;  %v1413_v46 = vpop.permute.xlu2 %1412 }
 0x1c2   : > { %1495 = vst.msk [vmem:[#allocation3 + $0x38] sm:$0xf] %vm1480_vm7, %v1413_v46 }
 0x1c3   : > { %v1399_v42 = vpop.permute.xlu1 %1398 }
 0x1c4   : > { %1488 = vst.msk [vmem:[#allocation3 + $0x1c] sm:$0xf] %vm1480_vm7, %v1399_v42  ;;  %1653 = vrot.lane.b32.xlu0 %v3802_v23, %s3336_s9  ;;  %v4143_v23 = vpack.c.bf16 %v3046_v53, %v3046_v53 }
 0x1c6   : > { %v1409_v3 = vpop.permute.xlu0 %1408 }
 0x1c7   : > { %1493 = vst.msk [vmem:[#allocation3 + $0x30] sm:$0xf] %vm1480_vm7, %v1409_v3  ;;  %1645 = vrot.lane.b32.xlu2 %v4125_v44, %s3336_s9  ;;  %v1774_v3 = vpack.c.bf16 %v3056_v36, %v3056_v36 }
 0x1c9   : > { %1649 = vrot.lane.b32.xlu1 %v4130_v60, %s3336_s9  ;;  %v1419_v51 = vpop.permute.xlu2 %1418 }
 0x1ca   : > { %1498 = vst.msk [vmem:[#allocation3 + $0x44] sm:$0xf] %vm1480_vm7, %v1419_v51  ;;  %v3063_v51 = vld [vmem:[#allocation2 + $0x90] sm:$0xff] }
 0x1cb   : > { %v1405_v58 = vpop.permute.xlu1 %1404 }
 0x1cc   : > { %1491 = vst.msk [vmem:[#allocation3 + $0x28] sm:$0xf] %vm1480_vm7, %v1405_v58  ;;  %1659 = vrot.lane.b32.xlu0 %v3823_v48, %s3336_s9  ;;  %v4156_v48 = vpack.c.bf16 %v3049_v37, %v3049_v37  ;;  %v1781_v58 = vpack.c.bf16 %v3063_v51, %v3063_v51 }
 0x1ce   : > { %v1415_v61 = vpop.permute.xlu0 %1414 }
 0x1cf   : > { %1496 = vst.msk [vmem:[#allocation3 + $0x3c] sm:$0xf] %vm1480_vm7, %v1415_v61  ;;  %1651 = vrot.lane.b32.xlu2 %v4138_v29, %s3336_s9  ;;  %v3059_v61 = vld [vmem:[#allocation2 + $0x60] sm:$0xff] }
 0x1d1   : > { %1655 = vrot.lane.b32.xlu1 %v4143_v23, %s3336_s9  ;;  %v1425_v7 = vpop.permute.xlu2 %1424 }
 0x1d2   : > { %1501 = vst.msk [vmem:[#allocation3 + $0x50] sm:$0xf] %vm1480_vm7, %v1425_v7  ;;  %v3061_v7 = vld [vmem:[#allocation2 + $0x78] sm:$0xff] }
 0x1d3   : > { %v1411_v22 = vpop.permute.xlu1 %1410  ;;  %v1779_v18 = vpack.c.bf16 %v3061_v7, %v3061_v7  ;;  %v3075_v7 = vld [vmem:[#allocation2 + $0x120] sm:$0xff] }
 0x1d4   : > { %1494 = vst.msk [vmem:[#allocation3 + $0x34] sm:$0xf] %vm1480_vm7, %v1411_v22  ;;  %1665 = vrot.lane.b32.xlu0 %v3838_v63, %s3336_s9  ;;  %v1777_v22 = vpack.c.bf16 %v3059_v61, %v3059_v61 }
 0x1d6   : > { %v1421_v50 = vpop.permute.xlu0 %1420 }
 0x1d7   : > { %1499 = vst.msk [vmem:[#allocation3 + $0x48] sm:$0xf] %vm1480_vm7, %v1421_v50  ;;  %1657 = vrot.lane.b32.xlu2 %v4151_v24, %s3336_s9  ;;  %v3066_v50 = vld [vmem:[#allocation2 + $0xb0] sm:$0xff] }
 0x1d9   : > { %1661 = vrot.lane.b32.xlu1 %v4156_v48, %s3336_s9  ;;  %v1431_v30 = vpop.permute.xlu2 %1430 }
 0x1da   : > { %1504 = vst.msk [vmem:[#allocation3 + $0x5c] sm:$0xf] %vm1480_vm7, %v1431_v30  ;;  %v1784_v30 = vpack.c.bf16 %v3066_v50, %v3066_v50 }
 0x1db   : > { %v1417_v63 = vpop.permute.xlu1 %1416 }
 0x1dc   : > { %1497 = vst.msk [vmem:[#allocation3 + $0x40] sm:$0xf] %vm1480_vm7, %v1417_v63  ;;  %1671 = vrot.lane.b32.xlu0 %v4161_v34, %s3336_s9 }
 0x1de   : > { %v1427_v43 = vpop.permute.xlu0 %1426 }
 0x1df   : > { %1502 = vst.msk [vmem:[#allocation3 + $0x54] sm:$0xf] %vm1480_vm7, %v1427_v43  ;;  %1663 = vrot.lane.b32.xlu2 %v4166_v15, %s3336_s9 }
 0x1e1   : > { %1667 = vrot.lane.b32.xlu1 %v4171_v17, %s3336_s9  ;;  %v1437_v38 = vpop.permute.xlu2 %1436 }
 0x1e2   : > { %1507 = vst.msk [vmem:[#allocation3 + $0x68] sm:$0xf] %vm1480_vm7, %v1437_v38  ;;  %v3069_v38 = vld [vmem:[#allocation2 + $0xd8] sm:$0xff] }
 0x1e3   : > { %v1423_v28 = vpop.permute.xlu1 %1422 }
 0x1e4   : > { %1500 = vst.msk [vmem:[#allocation3 + $0x4c] sm:$0xf] %vm1480_vm7, %v1423_v28  ;;  %1841 = vrot.lane.b32.xlu0 %v1775_v59, %s3337_s10  ;;  %v1780_v59 = vpack.c.bf16 %v3062_v13, %v3062_v13  ;;  %v1787_v28 = vpack.c.bf16 %v3069_v38, %v3069_v38 }
 0x1e6   : > { %v1433_v41 = vpop.permute.xlu0 %1432 }
 0x1e7   : > { %1505 = vst.msk [vmem:[#allocation3 + $0x60] sm:$0xf] %vm1480_vm7, %v1433_v41  ;;  %1669 = vrot.lane.b32.xlu2 %v4179_v6, %s3336_s9  ;;  %v3067_v41 = vld [vmem:[#allocation2 + $0xc0] sm:$0xff] }
 0x1e9   : > { %1837 = vrot.lane.b32.xlu1 %v1773_v31, %s3337_s10  ;;  %v1443_v46 = vpop.permute.xlu2 %1442  ;;  %v3065_v31 = vld [vmem:[#allocation2 + $0xa8] sm:$0xff] }
 0x1ea   : > { %1510 = vst.msk [vmem:[#allocation3 + $0x74] sm:$0xf] %vm1480_vm7, %v1443_v46  ;;  %v1783_v36 = vpack.c.bf16 %v3065_v31, %v3065_v31  ;;  %v1785_v46 = vpack.c.bf16 %v3067_v41, %v3067_v41  ;;  %v3081_v41 = vld [vmem:[#allocation2 + $0x168] sm:$0xff] }
 0x1eb   : > { %v1429_v42 = vpop.permute.xlu1 %1428 }
 0x1ec   : > { %1503 = vst.msk [vmem:[#allocation3 + $0x58] sm:$0xf] %vm1480_vm7, %v1429_v42  ;;  %1847 = vrot.lane.b32.xlu0 %v1778_v35, %s3337_s10 }
 0x1ee   : > { %v1439_v53 = vpop.permute.xlu0 %1438 }
 0x1ef   : > { %1508 = vst.msk [vmem:[#allocation3 + $0x6c] sm:$0xf] %vm1480_vm7, %v1439_v53  ;;  %1839 = vrot.lane.b32.xlu2 %v1774_v3, %s3337_s10  ;;  %v1790_v3 = vpack.c.bf16 %v3072_v40, %v3072_v40  ;;  %v3070_v53 = vld [vmem:[#allocation2 + $0xe0] sm:$0xff] }
 0x1f1   : > { %1843 = vrot.lane.b32.xlu1 %v1776_v39, %s3337_s10  ;;  %v1610_v5 = vpop.permute.xlu2 %1609  ;;  %v3068_v39 = vld [vmem:[#allocation2 + $0xc8] sm:$0xff] }
 0x1f2   : > { %1706 = vst.msk [vmem:[#allocation3] sm:$0xf] %vm1705_vm8, %v1610_v5  ;;  %v1786_v61 = vpack.c.bf16 %v3068_v39, %v3068_v39  ;;  %v1788_v5 = vpack.c.bf16 %v3070_v53, %v3070_v53 }
 0x1f3   : > { %v1435_v37 = vpop.permute.xlu1 %1434 }
 0x1f4   : > { %1506 = vst.msk [vmem:[#allocation3 + $0x64] sm:$0xf] %vm1480_vm7, %v1435_v37  ;;  %1853 = vrot.lane.b32.xlu0 %v1781_v58, %s3337_s10 }
 0x1f6   : > { %v1445_v9 = vpop.permute.xlu0 %1444 }
 0x1f7   : > { %1511 = vst.msk [vmem:[#allocation3 + $0x78] sm:$0xf] %vm1480_vm7, %v1445_v9  ;;  %1845 = vrot.lane.b32.xlu2 %v1777_v22, %s3337_s10  ;;  %v1793_v22 = vpack.c.bf16 %v3075_v7, %v3075_v7  ;;  %v3073_v9 = vld [vmem:[#allocation2 + $0x108] sm:$0xff] }
 0x1f9   : > { %1849 = vrot.lane.b32.xlu1 %v1779_v18, %s3337_s10  ;;  %v1616_v63 = vpop.permute.xlu2 %1615  ;;  %v3071_v18 = vld [vmem:[#allocation2 + $0xf0] sm:$0xff] }
 0x1fa   : > { %1709 = vst.msk [vmem:[#allocation3 + $0xc] sm:$0xf] %vm1705_vm8, %v1616_v63  ;;  %v1789_v13 = vpack.c.bf16 %v3071_v18, %v3071_v18  ;;  %v1791_v63 = vpack.c.bf16 %v3073_v9, %v3073_v9 }
 0x1fb   : > { %v1441_v43 = vpop.permute.xlu1 %1440 }
 0x1fc   : > { %1509 = vst.msk [vmem:[#allocation3 + $0x70] sm:$0xf] %vm1480_vm7, %v1441_v43  ;;  %1859 = vrot.lane.b32.xlu0 %v1784_v30, %s3337_s10 }
 0x1fe   : > { %v1612_v56 = vpop.permute.xlu0 %1611 }
 0x1ff   : > { %1707 = vst.msk [vmem:[#allocation3 + $0x4] sm:$0xf] %vm1705_vm8, %v1612_v56  ;;  %1851 = vrot.lane.b32.xlu2 %v1780_v59, %s3337_s10  ;;  %v1796_v59 = vpack.c.bf16 %v3078_v19, %v3078_v19  ;;  %v3076_v56 = vld [vmem:[#allocation2 + $0x128] sm:$0xff] }
 0x201   : > { %1855 = vrot.lane.b32.xlu1 %v1782_v20, %s3337_s10  ;;  %v1622_v32 = vpop.permute.xlu2 %1621  ;;  %v3074_v20 = vld [vmem:[#allocation2 + $0x110] sm:$0xff] }
 0x202   : > { %1712 = vst.msk [vmem:[#allocation3 + $0x18] sm:$0xf] %vm1705_vm8, %v1622_v32  ;;  %v1792_v31 = vpack.c.bf16 %v3074_v20, %v3074_v20  ;;  %v1794_v32 = vpack.c.bf16 %v3076_v56, %v3076_v56  ;;  %v3089_v56 = vld [vmem:[#allocation2 + $0x49] sm:$0xff] }
 0x203   : > { %v1447_v35 = vpop.permute.xlu1 %1446 }
 0x204   : > { %1512 = vst.msk [vmem:[#allocation3 + $0x7c] sm:$0xf] %vm1480_vm7, %v1447_v35  ;;  %1865 = vrot.lane.b32.xlu0 %v1787_v28, %s3337_s10 }
 0x206   : > { %v1618_v42 = vpop.permute.xlu0 %1617 }
 0x207   : > { %1710 = vst.msk [vmem:[#allocation3 + $0x10] sm:$0xf] %vm1705_vm8, %v1618_v42  ;;  %1857 = vrot.lane.b32.xlu2 %v1783_v36, %s3337_s10  ;;  %v1799_v36 = vpack.c.bf16 %v3081_v41, %v3081_v41  ;;  %v3079_v42 = vld [vmem:[#allocation2 + $0x150] sm:$0xff] }
 0x209   : > { %1861 = vrot.lane.b32.xlu1 %v1785_v46, %s3337_s10  ;;  %v1628_v51 = vpop.permute.xlu2 %1627  ;;  %v3077_v46 = vld [vmem:[#allocation2 + $0x138] sm:$0xff] }
 0x20a   : > { %1715 = vst.msk [vmem:[#allocation3 + $0x24] sm:$0xf] %vm1705_vm8, %v1628_v51  ;;  %v1795_v39 = vpack.c.bf16 %v3077_v46, %v3077_v46  ;;  %v1797_v51 = vpack.c.bf16 %v3079_v42, %v3079_v42 }
 0x20b   : > { %v1614_v58 = vpop.permute.xlu1 %1613 }
 0x20c   : > { %1708 = vst.msk [vmem:[#allocation3 + $0x8] sm:$0xf] %vm1705_vm8, %v1614_v58  ;;  %1871 = vrot.lane.b32.xlu0 %v1790_v3, %s3337_s10  ;;  %v3080_v58 = vld [vmem:[#allocation2 + $0x158] sm:$0xff] }
 0x20e   : > { %v1624_v37 = vpop.permute.xlu0 %1623 }
 0x20f   : > { %1713 = vst.msk [vmem:[#allocation3 + $0x1c] sm:$0xf] %vm1705_vm8, %v1624_v37  ;;  %1863 = vrot.lane.b32.xlu2 %v1786_v61, %s3337_s10  ;;  %v1798_v37 = vpack.c.bf16 %v3080_v58, %v3080_v58 }
 0x211   : > { %1867 = vrot.lane.b32.xlu1 %v1788_v5, %s3337_s10  ;;  %v1634_v50 = vpop.permute.xlu2 %1633  ;;  %v3082_v5 = vld [vmem:[#allocation2 + $0x170] sm:$0xff] }
 0x212   : > { %1718 = vst.msk [vmem:[#allocation3 + $0x30] sm:$0xf] %vm1705_vm8, %v1634_v50  ;;  %v3083_v50 = vld [vmem:[#allocation2 + $0x180] sm:$0xff] }
 0x213   : > { %v1620_v30 = vpop.permute.xlu1 %1619 }
 0x214   : > { %1711 = vst.msk [vmem:[#allocation3 + $0x14] sm:$0xf] %vm1705_vm8, %v1620_v30  ;;  %1877 = vrot.lane.b32.xlu0 %v1793_v22, %s3337_s10  ;;  %v1800_v22 = vpack.c.bf16 %v3082_v5, %v3082_v5  ;;  %v3085_v30 = vld [vmem:[#allocation2 + $0x198] sm:$0xff] }
 0x216   : > { %v1630_v43 = vpop.permute.xlu0 %1629 }
 0x217   : > { %1716 = vst.msk [vmem:[#allocation3 + $0x28] sm:$0xf] %vm1705_vm8, %v1630_v43  ;;  %1869 = vrot.lane.b32.xlu2 %v1789_v13, %s3337_s10  ;;  %v3086_v43 = vld [vmem:[#allocation2 + $0x1a0] sm:$0xff] }
 0x219   : > { %1873 = vrot.lane.b32.xlu1 %v1791_v63, %s3337_s10  ;;  %v1640_v38 = vpop.permute.xlu2 %1639  ;;  %v1801_v63 = vpack.c.bf16 %v3083_v50, %v3083_v50 }
 0x21a   : > { %1721 = vst.msk [vmem:[#allocation3 + $0x3c] sm:$0xf] %vm1705_vm8, %v1640_v38  ;;  %v1804_v38 = vpack.c.bf16 %v3086_v43, %v3086_v43 }
 0x21b   : > { %v1626_v28 = vpop.permute.xlu1 %1625 }
 0x21c   : > { %1714 = vst.msk [vmem:[#allocation3 + $0x20] sm:$0xf] %vm1705_vm8, %v1626_v28  ;;  %1883 = vrot.lane.b32.xlu0 %v1796_v59, %s3337_s10 }
 0x21e   : > { %v1636_v35 = vpop.permute.xlu0 %1635 }
 0x21f   : > { %1719 = vst.msk [vmem:[#allocation3 + $0x34] sm:$0xf] %vm1705_vm8, %v1636_v35  ;;  %1875 = vrot.lane.b32.xlu2 %v1792_v31, %s3337_s10 }
 0x221   : > { %1879 = vrot.lane.b32.xlu1 %v1794_v32, %s3337_s10  ;;  %v1646_v40 = vpop.permute.xlu2 %1645  ;;  %v2000_v32 = vpack.c.bf16 %v3089_v56, %v3089_v56  ;;  %v3099_v56 = vld [vmem:[#allocation2 + $0xc1] sm:$0xff] }
 0x222   : > { %1724 = vst.msk [vmem:[#allocation3 + $0x48] sm:$0xf] %vm1705_vm8, %v1646_v40 }
 0x223   : > { %v1632_v3 = vpop.permute.xlu1 %1631 }
 0x224   : > { %1717 = vst.msk [vmem:[#allocation3 + $0x2c] sm:$0xf] %vm1705_vm8, %v1632_v3  ;;  %1889 = vrot.lane.b32.xlu0 %v1799_v36, %s3337_s10 }
 0x226   : > { %v1642_v53 = vpop.permute.xlu0 %1641 }
 0x227   : > { %1722 = vst.msk [vmem:[#allocation3 + $0x40] sm:$0xf] %vm1705_vm8, %v1642_v53  ;;  %1881 = vrot.lane.b32.xlu2 %v1795_v39, %s3337_s10  ;;  %v3145_v39 = vld [vmem:[#allocation2 + $0x16a] sm:$0xff] }
 0x229   : > { %1885 = vrot.lane.b32.xlu1 %v1797_v51, %s3337_s10  ;;  %v1652_v61 = vpop.permute.xlu2 %1651  ;;  %v2249_v51 = vpack.c.bf16 %v3145_v39, %v3145_v39 }
 0x22a   : > { %1727 = vst.msk [vmem:[#allocation3 + $0x54] sm:$0xf] %vm1705_vm8, %v1652_v61 }
 0x22b   : > { %v1638_v7 = vpop.permute.xlu1 %1637 }
 0x22c   : > { %1720 = vst.msk [vmem:[#allocation3 + $0x38] sm:$0xf] %vm1705_vm8, %v1638_v7  ;;  %1895 = vrot.lane.b32.xlu0 %v3951_v55, %s3337_s10  ;;  %v1803_v55 = vpack.c.bf16 %v3085_v30, %v3085_v30  ;;  %v3097_v7 = vld [vmem:[#allocation2 + $0xa9] sm:$0xff] }
 0x22e   : > { %v1648_v18 = vpop.permute.xlu0 %1647 }
 0x22f   : > { %1725 = vst.msk [vmem:[#allocation3 + $0x4c] sm:$0xf] %vm1705_vm8, %v1648_v18  ;;  %1887 = vrot.lane.b32.xlu2 %v1798_v37, %s3337_s10  ;;  %v2008_v37 = vpack.c.bf16 %v3097_v7, %v3097_v7 }
 0x231   : > { %1891 = vrot.lane.b32.xlu1 %v1800_v22, %s3337_s10  ;;  %v1658_v9 = vpop.permute.xlu2 %1657 }
 0x232   : > { %1730 = vst.msk [vmem:[#allocation3 + $0x60] sm:$0xf] %vm1705_vm8, %v1658_v9 }
 0x233   : > { %v1644_v13 = vpop.permute.xlu1 %1643 }
 0x234   : > { %1723 = vst.msk [vmem:[#allocation3 + $0x44] sm:$0xf] %vm1705_vm8, %v1644_v13  ;;  %2062 = vrot.lane.b32.xlu0 %v3961_v10, %s3338_s11 }
 0x236   : > { %v1654_v19 = vpop.permute.xlu0 %1653 }
 0x237   : > { %1728 = vst.msk [vmem:[#allocation3 + $0x58] sm:$0xf] %vm1705_vm8, %v1654_v19  ;;  %1893 = vrot.lane.b32.xlu2 %v1801_v63, %s3337_s10  ;;  %v3115_v63 = vld [vmem:[#allocation2 + $0x181] sm:$0xff] }
 0x239   : > { %1897 = vrot.lane.b32.xlu1 %v1803_v55, %s3337_s10  ;;  %v1664_v59 = vpop.permute.xlu2 %1663 }
 0x23a   : > { %1733 = vst.msk [vmem:[#allocation3 + $0x6c] sm:$0xf] %vm1705_vm8, %v1664_v59 }
 0x23b   : > { %v1650_v20 = vpop.permute.xlu1 %1649 }
 0x23c   : > { %1726 = vst.msk [vmem:[#allocation3 + $0x50] sm:$0xf] %vm1705_vm8, %v1650_v20  ;;  %2068 = vrot.lane.b32.xlu0 %v3970_v62, %s3338_s11  ;;  %v3136_v62 = vld [vmem:[#allocation2 + $0xfa] sm:$0xff] }
 0x23d   : > { %v2240_v35 = vpack.c.bf16 %v3136_v62, %v3136_v62  ;;  %v2010_v62 = vpack.c.bf16 %v3099_v56, %v3099_v56 }
 0x23e   : > { %v1660_v10 = vpop.permute.xlu0 %1659 }
 0x23f   : > { %1731 = vst.msk [vmem:[#allocation3 + $0x64] sm:$0xf] %vm1705_vm8, %v1660_v10  ;;  %1899 = vrot.lane.b32.xlu2 %v1804_v38, %s3337_s10  ;;  %v2452_v10 = vld [vmem:[%s4685_s3 + $0x10] sm:$0x3] }
 0x241   : > { %2064 = vrot.lane.b32.xlu1 %v3947_v2, %s3338_s11  ;;  %v1670_v28 = vpop.permute.xlu2 %1669 }
 0x242   : > { %1736 = vst.msk [vmem:[#allocation3 + $0x78] sm:$0xf] %vm1705_vm8, %v1670_v28  ;;  %v2542_v28 = vunpack.c.l.b16 %v2452_v10 }
 0x243   : > { %v1656_v31 = vpop.permute.xlu1 %1655 }
 0x244   : > { %1729 = vst.msk [vmem:[#allocation3 + $0x5c] sm:$0xf] %vm1705_vm8, %v1656_v31  ;;  %2110 = vrot.lane.b32.xlu0 %v4039_v54, %s3338_s11 }
 0x246   : > { %v1666_v41 = vpop.permute.xlu0 %1665 }
 0x247   : > { %1734 = vst.msk [vmem:[#allocation3 + $0x70] sm:$0xf] %vm1705_vm8, %v1666_v41  ;;  %2066 = vrot.lane.b32.xlu2 %v2000_v32, %s3338_s11  ;;  %v2545_v32 = vpack.c.b16 %v2542_v28, %v2542_v28 }
 0x249   : > { %2094 = vrot.lane.b32.xlu1 %v3995_v27, %s3338_s11  ;;  %v1840_v2 = vpop.permute.xlu2 %1839 }
 0x24a   : > { %1935 = vst.msk [vmem:[#allocation3 + $0x4] sm:$0xf] %vm1933_vm9, %v1840_v2 }
 0x24b   : > { %v1662_v36 = vpop.permute.xlu1 %1661 }
 0x24c   : > { %1732 = vst.msk [vmem:[#allocation3 + $0x68] sm:$0xf] %vm1705_vm8, %v1662_v36  ;;  %2321 = vrot.lane.b32.xlu0 %v2240_v35, %s3339_s12  ;;  %v3091_v35 = vld [vmem:[#allocation2 + $0x61] sm:$0xff] }
 0x24d   : > { %v3260_v36 = vld [vmem:[%s4685_s3 + $0x8] sm:$0xff] }
 0x24e   : > { %v1672_v54 = vpop.permute.xlu0 %1671 }
 0x24f   : > { %1737 = vst.msk [vmem:[#allocation3 + $0x7c] sm:$0xf] %vm1705_vm8, %v1672_v54  ;;  %2096 = vrot.lane.b32.xlu2 %v4011_v57, %s3338_s11  ;;  %v3124_v54 = vld [vmem:[#allocation2 + $0x6a] sm:$0xff] }
 0x251   : > { %2112 = vrot.lane.b32.xlu1 %v4025_v8, %s3338_s11  ;;  %v1846_v27 = vpop.permute.xlu2 %1845 }
 0x252   : > { %1938 = vst.msk [vmem:[#allocation3 + $0x10] sm:$0xf] %vm1933_vm9, %v1846_v27 }
 0x253   : > { %v1668_v46 = vpop.permute.xlu1 %1667 }
 0x254   : > { %1735 = vst.msk [vmem:[#allocation3 + $0x74] sm:$0xf] %vm1705_vm8, %v1668_v46  ;;  %2078 = vrot.lane.b32.xlu0 %v3981_v25, %s3338_s11  ;;  %v2228_v46 = vpack.c.bf16 %v3124_v54, %v3124_v54 }
 0x256   : > { %v1842_v40 = vpop.permute.xlu0 %1841 }
 0x257   : > { %1936 = vst.msk [vmem:[#allocation3 + $0x8] sm:$0xf] %vm1933_vm9, %v1842_v40  ;;  %2319 = vrot.lane.b32.xlu2 %v4125_v44, %s3339_s12  ;;  %v3127_v44 = vld [vmem:[#allocation2 + $0x92] sm:$0xff]  ;;  %v3092_v40 = vld [vmem:[#allocation2 + $0x69] sm:$0xff] }
 0x259   : > { %2335 = vrot.lane.b32.xlu1 %v4156_v48, %s3339_s12  ;;  %v1852_v57 = vpop.permute.xlu2 %1851 }
 0x25a   : > { %1941 = vst.msk [vmem:[#allocation3 + $0x1c] sm:$0xf] %vm1933_vm9, %v1852_v57  ;;  %v3259_v57 = vld [vmem:[%s4685_s3] sm:$0xff] }
 0x25b   : > { %v1838_v8 = vpop.permute.xlu1 %1837 }
 0x25c   : > { %1934 = vst.msk [vmem:[#allocation3] sm:$0xf] %vm1933_vm9, %v1838_v8  ;;  %2289 = vrot.lane.b32.xlu0 %v4072_v0, %s3339_s12  ;;  %v2231_v0 = vpack.c.bf16 %v3127_v44, %v3127_v44  ;;  %v2003_v44 = vpack.c.bf16 %v3092_v40, %v3092_v40 }
 0x25e   : > { %v1848_v42 = vpop.permute.xlu0 %1847 }
 0x25f   : > { %1939 = vst.msk [vmem:[#allocation3 + $0x14] sm:$0xf] %vm1933_vm9, %v1848_v42  ;;  %2337 = vrot.lane.b32.xlu2 %v4166_v15, %s3339_s12  ;;  %v3100_v42 = vld [vmem:[#allocation2 + $0xc9] sm:$0xff] }
 0x261   : > { %2080 = vrot.lane.b32.xlu1 %v3988_v33, %s3338_s11  ;;  %v1858_v25 = vpop.permute.xlu2 %1857 }
 0x262   : > { %1944 = vst.msk [vmem:[#allocation3 + $0x28] sm:$0xf] %vm1933_vm9, %v1858_v25 }
 0x263   : > { %v1844_v48 = vpop.permute.xlu1 %1843 }
 0x264   : > { %1937 = vst.msk [vmem:[#allocation3 + $0xc] sm:$0xf] %vm1933_vm9, %v1844_v48  ;;  %2098 = vrot.lane.b32.xlu0 %v4018_v12, %s3338_s11  ;;  %v3109_v48 = vld [vmem:[#allocation2 + $0x139] sm:$0xff] }
 0x266   : > { %v1854_v3 = vpop.permute.xlu0 %1853 }
 0x267   : > { %1942 = vst.msk [vmem:[#allocation3 + $0x20] sm:$0xf] %vm1933_vm9, %v1854_v3  ;;  %2287 = vrot.lane.b32.xlu2 %v4065_v49, %s3339_s12  ;;  %v2020_v3 = vpack.c.bf16 %v3109_v48, %v3109_v48 }
 0x269   : > { %2303 = vrot.lane.b32.xlu1 %v2231_v0, %s3339_s12  ;;  %v1864_v33 = vpop.permute.xlu2 %1863 }
 0x26a   : > { %1947 = vst.msk [vmem:[#allocation3 + $0x34] sm:$0xf] %vm1933_vm9, %v1864_v33  ;;  %v3123_v33 = vld [vmem:[#allocation2 + $0x62] sm:$0xff] }
 0x26b   : > { %v1850_v15 = vpop.permute.xlu1 %1849 }
 0x26c   : > { %1940 = vst.msk [vmem:[#allocation3 + $0x18] sm:$0xf] %vm1933_vm9, %v1850_v15  ;;  %2116 = vrot.lane.b32.xlu0 %v4051_v52, %s3338_s11  ;;  %v3098_v52 = vld [vmem:[#allocation2 + $0xb1] sm:$0xff] }
 0x26e   : > { %v1860_v12 = vpop.permute.xlu0 %1859 }
 0x26f   : > { %1945 = vst.msk [vmem:[#allocation3 + $0x2c] sm:$0xf] %vm1933_vm9, %v1860_v12  ;;  %2305 = vrot.lane.b32.xlu2 %v4095_v1, %s3339_s12  ;;  %v2009_v1 = vpack.c.bf16 %v3098_v52, %v3098_v52  ;;  %v2227_v12 = vpack.c.bf16 %v3123_v33, %v3123_v33 }
 0x271   : > { %2100 = vrot.lane.b32.xlu1 %v4004_v45, %s3338_s11  ;;  %v1870_v49 = vpop.permute.xlu2 %1869 }
 0x272   : > { %1950 = vst.msk [vmem:[#allocation3 + $0x40] sm:$0xf] %vm1933_vm9, %v1870_v49 }
 0x273   : > { %v1856_v53 = vpop.permute.xlu1 %1855 }
 0x274   : > { %1943 = vst.msk [vmem:[#allocation3 + $0x24] sm:$0xf] %vm1933_vm9, %v1856_v53  ;;  %2339 = vrot.lane.b32.xlu0 %v2249_v51, %s3339_s12  ;;  %v3118_v51 = vld [vmem:[#allocation2 + $0x1a1] sm:$0xff] }
 0x275   : > { %v2029_v53 = vpack.c.bf16 %v3118_v51, %v3118_v51 }
 0x276   : > { %v1866_v58 = vpop.permute.xlu0 %1865 }
 0x277   : > { %1948 = vst.msk [vmem:[#allocation3 + $0x38] sm:$0xf] %vm1933_vm9, %v1866_v58  ;;  %2114 = vrot.lane.b32.xlu2 %v4043_v14, %s3338_s11  ;;  %v3110_v58 = vld [vmem:[#allocation2 + $0x141] sm:$0xff] }
 0x279   : > { %2323 = vrot.lane.b32.xlu1 %v4130_v60, %s3339_s12  ;;  %v1876_v45 = vpop.permute.xlu2 %1875 }
 0x27a   : > { %1953 = vst.msk [vmem:[#allocation3 + $0x4c] sm:$0xf] %vm1933_vm9, %v1876_v45  ;;  %v2021_v45 = vpack.c.bf16 %v3110_v58, %v3110_v58 }
 0x27b   : > { %v1862_v61 = vpop.permute.xlu1 %1861 }
 0x27c   : > { %1946 = vst.msk [vmem:[#allocation3 + $0x30] sm:$0xf] %vm1933_vm9, %v1862_v61  ;;  %2084 = vrot.lane.b32.xlu0 %v2009_v1, %s3338_s11  ;;  %v3149_v61 = vld [vmem:[#allocation2 + $0x19a] sm:$0xff] }
 0x27d   : > { %v2253_v7 = vpack.c.bf16 %v3149_v61, %v3149_v61 }
 0x27e   : > { %v1872_v5 = vpop.permute.xlu0 %1871 }
 0x27f   : > { %1951 = vst.msk [vmem:[#allocation3 + $0x44] sm:$0xf] %vm1933_vm9, %v1872_v5  ;;  %2325 = vrot.lane.b32.xlu2 %v4138_v29, %s3339_s12 }
 0x281   : > { %2341 = vrot.lane.b32.xlu1 %v4171_v17, %s3339_s12  ;;  %v1882_v14 = vpop.permute.xlu2 %1881  ;;  %v3130_v17 = vld [vmem:[#allocation2 + $0xb2] sm:$0xff] }
 0x282   : > { %1956 = vst.msk [vmem:[#allocation3 + $0x58] sm:$0xf] %vm1933_vm9, %v1882_v14  ;;  %v2234_v50 = vpack.c.bf16 %v3130_v17, %v3130_v17 }
 0x283   : > { %v1868_v60 = vpop.permute.xlu1 %1867 }
 0x284   : > { %1949 = vst.msk [vmem:[#allocation3 + $0x3c] sm:$0xf] %vm1933_vm9, %v1868_v60  ;;  %2307 = vrot.lane.b32.xlu0 %v4102_v26, %s3339_s12  ;;  %v3139_v26 = vld [vmem:[#allocation2 + $0x122] sm:$0xff] }
 0x285   : > { %v2243_v30 = vpack.c.bf16 %v3139_v26, %v3139_v26  ;;  %v3150_v26 = vld [vmem:[#allocation2 + $0x1a2] sm:$0xff] }
 0x286   : > { %v1878_v22 = vpop.permute.xlu0 %1877 }
 0x287   : > { %1954 = vst.msk [vmem:[#allocation3 + $0x50] sm:$0xf] %vm1933_vm9, %v1878_v22  ;;  %2082 = vrot.lane.b32.xlu2 %v2008_v37, %s3338_s11  ;;  %v3094_v22 = vld [vmem:[#allocation2 + $0x81] sm:$0xff] }
 0x289   : > { %2291 = vrot.lane.b32.xlu1 %v4058_v11, %s3339_s12  ;;  %v1888_v29 = vpop.permute.xlu2 %1887  ;;  %v3107_v11 = vld [vmem:[#allocation2 + $0x121] sm:$0xff] }
 0x28a   : > { %1959 = vst.msk [vmem:[#allocation3 + $0x64] sm:$0xf] %vm1933_vm9, %v1888_v29  ;;  %v2018_v19 = vpack.c.bf16 %v3107_v11, %v3107_v11  ;;  %v2254_v11 = vpack.c.bf16 %v3150_v26, %v3150_v26 }
 0x28b   : > { %v1874_v18 = vpop.permute.xlu1 %1873 }
 0x28c   : > { %1952 = vst.msk [vmem:[#allocation3 + $0x48] sm:$0xf] %vm1933_vm9, %v1874_v18  ;;  %2104 = vrot.lane.b32.xlu0 %v4029_v47, %s3338_s11  ;;  %v2026_v47 = vpack.c.bf16 %v3115_v63, %v3115_v63  ;;  %v3142_v18 = vld [vmem:[#allocation2 + $0x142] sm:$0xff] }
 0x28e   : > { %v1884_v9 = vpop.permute.xlu0 %1883 }
 0x28f   : > { %1957 = vst.msk [vmem:[#allocation3 + $0x5c] sm:$0xf] %vm1933_vm9, %v1884_v9  ;;  %2293 = vrot.lane.b32.xlu2 %v4077_v4, %s3339_s12  ;;  %v3116_v4 = vld [vmem:[#allocation2 + $0x189] sm:$0xff] }
 0x290   : > { %v2027_v38 = vpack.c.bf16 %v3116_v4, %v3116_v4 }
 0x291   : > { %2309 = vrot.lane.b32.xlu1 %v2234_v50, %s3339_s12  ;;  %v1894_v13 = vpop.permute.xlu2 %1893 }
 0x292   : > { %1962 = vst.msk [vmem:[#allocation3 + $0x70] sm:$0xf] %vm1933_vm9, %v1894_v13  ;;  %v3125_v13 = vld [vmem:[#allocation2 + $0x7a] sm:$0xff] }
 0x293   : > { %v1880_v55 = vpop.permute.xlu1 %1879 }
 0x294   : > { %1955 = vst.msk [vmem:[#allocation3 + $0x54] sm:$0xf] %vm1933_vm9, %v1880_v55  ;;  %2327 = vrot.lane.b32.xlu0 %v2243_v30, %s3339_s12  ;;  %v2246_v30 = vpack.c.bf16 %v3142_v18, %v3142_v18  ;;  %v2229_v55 = vpack.c.bf16 %v3125_v13, %v3125_v13 }
 0x296   : > { %v1890_v43 = vpop.permute.xlu0 %1889 }
 0x297   : > { %1960 = vst.msk [vmem:[#allocation3 + $0x68] sm:$0xf] %vm1933_vm9, %v1890_v43  ;;  %2102 = vrot.lane.b32.xlu2 %v2018_v19, %s3338_s11  ;;  %v3093_v19 = vld [vmem:[#allocation2 + $0x79] sm:$0xff] }
 0x299   : > { %2118 = vrot.lane.b32.xlu1 %v2026_v47, %s3338_s11  ;;  %v1900_v59 = vpop.permute.xlu2 %1899  ;;  %v3101_v47 = vld [vmem:[#allocation2 + $0xd9] sm:$0xff] }
 0x29a   : > { %1965 = vst.msk [vmem:[#allocation3 + $0x7c] sm:$0xf] %vm1933_vm9, %v1900_v59  ;;  %v2004_v59 = vpack.c.bf16 %v3093_v19, %v3093_v19 }
 0x29b   : > { %v1886_v20 = vpop.permute.xlu1 %1885 }
 0x29c   : > { %1958 = vst.msk [vmem:[#allocation3 + $0x60] sm:$0xf] %vm1933_vm9, %v1886_v20  ;;  %2345 = vrot.lane.b32.xlu0 %v4161_v34, %s3339_s12  ;;  %v2599_v34 = vsel %vm2597_vm10, %v2545_v32, 0  ;;  %v2012_v20 = vpack.c.bf16 %v3101_v47, %v3101_v47 }
 0x29d   : > { %3262 = vmatpush.bf16.msra.mxu2 %v2599_v34  ;;  %3263 = vmatpush.bf16.msra.mxu3 %v2599_v34 }
 0x29e   : > { %v1896_v31 = vpop.permute.xlu0 %1895  ;;  %2606 = vmatpush.bf16.msra.mxu0 %v2599_v34  ;;  %3261 = vmatpush.bf16.msra.mxu1 %v2599_v34 }
 0x29f   : > { %1963 = vst.msk [vmem:[#allocation3 + $0x74] sm:$0xf] %vm1933_vm9, %v1896_v31  ;;  %2120 = vrot.lane.b32.xlu2 %v2027_v38, %s3338_s11  ;;  %v3134_v38 = vld [vmem:[#allocation2 + $0xe2] sm:$0xff] }
 0x2a0   : > { %v2238_v28 = vpack.c.bf16 %v3134_v38, %v3134_v38  ;;  %v3102_v31 = vld [vmem:[#allocation2 + $0xe1] sm:$0xff] }
 0x2a1   : > { %2329 = vrot.lane.b32.xlu1 %v4143_v23, %s3339_s12  ;;  %v2067_v41 = vpop.permute.xlu2 %2066  ;;  %v2002_v23 = vpack.c.bf16 %v3091_v35, %v3091_v35  ;;  %3265 = vmatpush.bf16.msra.mxu2 %v3260_v36  ;;  %v2013_v34 = vpack.c.bf16 %v3102_v31, %v3102_v31 }
 0x2a2   : > { %2161 = vst.msk [vmem:[#allocation3 + $0x8] sm:$0xf] %vm2158_vm11, %v2067_v41  ;;  %3266 = vmatpush.bf16.msra.mxu3 %v3260_v36  ;;  %2607 = vmatpush.bf16.msra.mxu0 %v3260_v36 }
 0x2a3   : > { %v1892_v2 = vpop.permute.xlu1 %1891  ;;  %3264 = vmatpush.bf16.msra.mxu1 %v3260_v36  ;;  %v3133_v36 = vld [vmem:[#allocation2 + $0xda] sm:$0xff] }
 0x2a4   : > { %1961 = vst.msk [vmem:[#allocation3 + $0x6c] sm:$0xf] %vm1933_vm9, %v1892_v2  ;;  %2086 = vrot.lane.b32.xlu0 %v2010_v62, %s3338_s11  ;;  %v3126_v62 = vld [vmem:[#allocation2 + $0x82] sm:$0xff] }
 0x2a5   : > { %3268 = vmatpush.bf16.msra.mxu2 %v3259_v57  ;;  %v2230_v35 = vpack.c.bf16 %v3126_v62, %v3126_v62 }
 0x2a6   : > { %v2063_v27 = vpop.permute.xlu0 %2062  ;;  %3269 = vmatpush.bf16.msra.mxu3 %v3259_v57  ;;  %2608 = vmatpush.bf16.msra.mxu0 %v3259_v57 }
 0x2a7   : > { %2159 = vst.msk [vmem:[#allocation3] sm:$0xf] %vm2158_vm11, %v2063_v27  ;;  %2343 = vrot.lane.b32.xlu2 %v4179_v6, %s3339_s12  ;;  %3267 = vmatpush.bf16.msra.mxu1 %v3259_v57  ;;  %v2011_v6 = vpack.c.bf16 %v3100_v42, %v3100_v42 }
 0x2a9   : > { %2070 = vrot.lane.b32.xlu1 %v2002_v23, %s3338_s11  ;;  %v2097_v8 = vpop.permute.xlu2 %2096 }
 0x2aa   : > { %2176 = vst.msk [vmem:[#allocation3 + $0x44] sm:$0xf] %vm2158_vm11, %v2097_v8 }
 0x2ab   : > { %v1898_v25 = vpop.permute.xlu1 %1897 }
 0x2ac   : > { %1964 = vst.msk [vmem:[#allocation3 + $0x78] sm:$0xf] %vm1933_vm9, %v1898_v25  ;;  %2297 = vrot.lane.b32.xlu0 %v2228_v46, %s3339_s12  ;;  %v2237_v46 = vpack.c.bf16 %v3133_v36, %v3133_v36 }
 0x2ae   : > { %v2069_v0 = vpop.permute.xlu0 %2068 }
 0x2af   : > { %2162 = vst.msk [vmem:[#allocation3 + $0xc] sm:$0xf] %vm2158_vm11, %v2069_v0  ;;  %2072 = vrot.lane.b32.xlu2 %v2003_v44, %s3338_s11 }
 0x2b1   : > { %2088 = vrot.lane.b32.xlu1 %v2011_v6, %s3338_s11  ;;  %v2320_v15 = vpop.permute.xlu2 %2319 }
 0x2b3   : > { %v2065_v39 = vpop.permute.xlu1 %2064 }
 0x2b4   : > { %2160 = vst.msk [vmem:[#allocation3 + $0x4] sm:$0xf] %vm2158_vm11, %v2065_v39  ;;  %2106 = vrot.lane.b32.xlu0 %v2020_v3, %s3338_s11 }
 0x2b6   : > { %v2111_v49 = vpop.permute.xlu0 %2110 }
 0x2b7   : > { %2183 = vst.msk [vmem:[#allocation3 + $0x60] sm:$0xf] %vm2158_vm11, %v2111_v49  ;;  %2295 = vrot.lane.b32.xlu2 %v2227_v12, %s3339_s12 }
 0x2b9   : > { %2311 = vrot.lane.b32.xlu1 %v4107_v21, %s3339_s12  ;;  %v2338_v52 = vpop.permute.xlu2 %2337  ;;  %v3117_v21 = vld [vmem:[#allocation2 + $0x199] sm:$0xff] }
 0x2ba   : > { %v2028_v37 = vpack.c.bf16 %v3117_v21, %v3117_v21 }
 0x2bb   : > { %v2095_v1 = vpop.permute.xlu1 %2094 }
 0x2bc   : > { %2175 = vst.msk [vmem:[#allocation3 + $0x40] sm:$0xf] %vm2158_vm11, %v2095_v1  ;;  %2124 = vrot.lane.b32.xlu0 %v2029_v53, %s3338_s11 }
 0x2bd   : > { %2400 = vst.msk [vmem:[#allocation3 + $0x40] sm:$0xf] %vm2383_vm12, %v2320_v15 }
 0x2be   : > { %v2322_v5 = vpop.permute.xlu0 %2321 }
 0x2bf   : > { %2401 = vst.msk [vmem:[#allocation3 + $0x44] sm:$0xf] %vm2383_vm12, %v2322_v5  ;;  %2313 = vrot.lane.b32.xlu2 %v4115_v16, %s3339_s12  ;;  %v2005_v16 = vpack.c.bf16 %v3094_v22, %v3094_v22 }
 0x2c1   : > { %2108 = vrot.lane.b32.xlu1 %v2021_v45, %s3338_s11  ;;  %v2288_v14 = vpop.permute.xlu2 %2287 }
 0x2c2   : > { %2384 = vst.msk [vmem:[#allocation3] sm:$0xf] %vm2383_vm12, %v2288_v14 }
 0x2c3   : > { %v2113_v60 = vpop.permute.xlu1 %2112 }
 0x2c4   : > { %2184 = vst.msk [vmem:[#allocation3 + $0x64] sm:$0xf] %vm2158_vm11, %v2113_v60  ;;  %2347 = vrot.lane.b32.xlu0 %v2253_v7, %s3339_s12 }
 0x2c5   : > { %2409 = vst.msk [vmem:[#allocation3 + $0x64] sm:$0xf] %vm2383_vm12, %v2338_v52 }
 0x2c6   : > { %v2079_v29 = vpop.permute.xlu0 %2078  ;;  %v3251_v17 = vld [vmem:[#allocation3 + $0x40] sm:$0xff] }
 0x2c7   : > { %2167 = vst.msk [vmem:[#allocation3 + $0x20] sm:$0xf] %vm2158_vm11, %v2079_v29  ;;  %2122 = vrot.lane.b32.xlu2 %v2028_v37, %s3338_s11  ;;  %3231 = vmatmul.msk.bf16.vlgmr.msra.gmra.mxu2 %vm2548_vm13, %v3251_v17 }
 0x2c9   : > { %2331 = vrot.lane.b32.xlu1 %v4151_v24, %s3339_s12  ;;  %v2306_v50 = vpop.permute.xlu2 %2305 }
 0x2cb   : > { %v2336_v9 = vpop.permute.xlu1 %2335 }
 0x2cc   : > { %2408 = vst.msk [vmem:[#allocation3 + $0x60] sm:$0xf] %vm2383_vm12, %v2336_v9  ;;  %2076 = vrot.lane.b32.xlu0 %v2005_v16, %s3338_s11 }
 0x2ce   : > { %v2290_v63 = vpop.permute.xlu0 %2289 }
 0x2cf   : > { %2385 = vst.msk [vmem:[#allocation3 + $0x4] sm:$0xf] %vm2383_vm12, %v2290_v63  ;;  %2333 = vrot.lane.b32.xlu2 %v2246_v30, %s3339_s12 }
 0x2d1   : > { %2349 = vrot.lane.b32.xlu1 %v2254_v11, %s3339_s12  ;;  %v2115_v24 = vpop.permute.xlu2 %2114 }
 0x2d2   : > { %2185 = vst.msk [vmem:[#allocation3 + $0x68] sm:$0xf] %vm2158_vm11, %v2115_v24 }
 0x2d3   : > { %v2081_v43 = vpop.permute.xlu1 %2080  ;;  %v3255_v4 = vld [vmem:[#allocation3 + $0x60] sm:$0xff] }
 0x2d4   : > { %2168 = vst.msk [vmem:[#allocation3 + $0x24] sm:$0xf] %vm2158_vm11, %v2081_v43  ;;  %2299 = vrot.lane.b32.xlu0 %v2229_v55, %s3339_s12  ;;  %3235 = vmatmul.msk.bf16.vlgmr.msra.gmra.mxu3 %vm2548_vm13, %v3255_v4 }
 0x2d5   : > { %2393 = vst.msk [vmem:[#allocation3 + $0x24] sm:$0xf] %vm2383_vm12, %v2306_v50 }
 0x2d6   : > { %v2099_v10 = vpop.permute.xlu0 %2098  ;;  %v3243_v56 = vld [vmem:[#allocation3] sm:$0xff] }
 0x2d7   : > { %2177 = vst.msk [vmem:[#allocation3 + $0x48] sm:$0xf] %vm2158_vm11, %v2099_v10  ;;  %2074 = vrot.lane.b32.xlu2 %v2004_v59, %s3338_s11  ;;  %3223 = vmatmul.msk.bf16.vlgmr.msra.gmra.mxu0 %vm2548_vm13, %v3243_v56 }
 0x2d9   : > { %2090 = vrot.lane.b32.xlu1 %v2012_v20, %s3338_s11  ;;  %v2326_v32 = vpop.permute.xlu2 %2325 }
 0x2db   : > { %v2304_v41 = vpop.permute.xlu1 %2303 }
 0x2dc   : > { %2392 = vst.msk [vmem:[#allocation3 + $0x20] sm:$0xf] %vm2383_vm12, %v2304_v41  ;;  %2317 = vrot.lane.b32.xlu0 %v2238_v28, %s3339_s12 }
 0x2de   : > { %v2117_v2 = vpop.permute.xlu0 %2116 }
 0x2df   : > { %2186 = vst.msk [vmem:[#allocation3 + $0x6c] sm:$0xf] %vm2158_vm11, %v2117_v2  ;;  %2092 = vrot.lane.b32.xlu2 %v2013_v34, %s3338_s11  ;;  %v447_v34 = vld [vmem:[%s3446_s23 + $0x8] sm:$0xff] }
 0x2e0   : > { %480 = vst.msk [vmem:[%s4483_s28 + $0x8] sm:$0xff] %vm364_vm0, %v447_v34 }
 0x2e1   : > { %2301 = vrot.lane.b32.xlu1 %v2230_v35, %s3339_s12  ;;  %v2083_v23 = vpop.permute.xlu2 %2082 }
 0x2e2   : > { %2169 = vst.msk [vmem:[#allocation3 + $0x28] sm:$0xf] %vm2158_vm11, %v2083_v23 }
 0x2e3   : > { %v2101_v54 = vpop.permute.xlu1 %2100  ;;  %v3247_v27 = vld [vmem:[#allocation3 + $0x20] sm:$0xff] }
 0x2e4   : > { %2178 = vst.msk [vmem:[#allocation3 + $0x4c] sm:$0xf] %vm2158_vm11, %v2101_v54  ;;  %3227 = vmatmul.msk.bf16.vlgmr.msra.gmra.mxu1 %vm2548_vm13, %v3247_v27  ;;  %v446_v27 = vld [vmem:[%s3446_s23] sm:$0xff] }
 0x2e5   : > { %2403 = vst.msk [vmem:[#allocation3 + $0x4c] sm:$0xf] %vm2383_vm12, %v2326_v32 }
 0x2e6   : > { %v2340_v40 = vpop.permute.xlu0 %2339  ;;  %479 = vst.msk [vmem:[%s4483_s28] sm:$0xff] %vm364_vm0, %v446_v27 }
 0x2e7   : > { %2410 = vst.msk [vmem:[#allocation3 + $0x68] sm:$0xf] %vm2383_vm12, %v2340_v40  ;;  %2315 = vrot.lane.b32.xlu2 %v2237_v46, %s3339_s12 }
 0x2e9   : > { %v2294_v57 = vpop.permute.xlu2 %2293 }
 0x2ea   : > { %2387 = vst.msk [vmem:[#allocation3 + $0xc] sm:$0xf] %vm2383_vm12, %v2294_v57 }
 0x2eb   : > { %v2324_v8 = vpop.permute.xlu1 %2323 }
 0x2ec   : > { %2402 = vst.msk [vmem:[#allocation3 + $0x48] sm:$0xf] %vm2383_vm12, %v2324_v8 }
 0x2ee   : > { %v2085_v42 = vpop.permute.xlu0 %2084 }
 0x2ef   : > { %2170 = vst.msk [vmem:[#allocation3 + $0x2c] sm:$0xf] %vm2158_vm11, %v2085_v42 }
 0x2f1   : > { %v2103_v25 = vpop.permute.xlu2 %2102 }
 0x2f2   : > { %2179 = vst.msk [vmem:[#allocation3 + $0x50] sm:$0xf] %vm2158_vm11, %v2103_v25 }
 0x2f3   : > { %v2342_v44 = vpop.permute.xlu1 %2341  ;;  %v3252_v6 = vld [vmem:[#allocation3 + $0x48] sm:$0xff] }
 0x2f4   : > { %2411 = vst.msk [vmem:[#allocation3 + $0x6c] sm:$0xf] %vm2383_vm12, %v2342_v44  ;;  %3232 = vmatmul.msk.bf16.gmra.mxu2 %vm2548_vm13, %v3252_v6 }
 0x2f6   : > { %v2308_v48 = vpop.permute.xlu0 %2307 }
 0x2f7   : > { %2394 = vst.msk [vmem:[#allocation3 + $0x28] sm:$0xf] %vm2383_vm12, %v2308_v48 }
 0x2f9   : > { %v2121_v0 = vpop.permute.xlu2 %2120 }
 0x2fa   : > { %2188 = vst.msk [vmem:[#allocation3 + $0x74] sm:$0xf] %vm2158_vm11, %v2121_v0 }
 0x2fb   : > { %v2292_v3 = vpop.permute.xlu1 %2291  ;;  %v3256_v33 = vld [vmem:[#allocation3 + $0x68] sm:$0xff] }
 0x2fc   : > { %2386 = vst.msk [vmem:[#allocation3 + $0x8] sm:$0xf] %vm2383_vm12, %v2292_v3  ;;  %3236 = vmatmul.msk.bf16.gmra.mxu3 %vm2548_vm13, %v3256_v33  ;;  %v448_v33 = vld [vmem:[%s3446_s23 + $0x10] sm:$0xff] }
 0x2fd   : > { %481 = vst.msk [vmem:[%s4483_s28 + $0x10] sm:$0xff] %vm364_vm0, %v448_v33 }
 0x2fe   : > { %v2105_v15 = vpop.permute.xlu0 %2104 }
 0x2ff   : > { %2180 = vst.msk [vmem:[#allocation3 + $0x54] sm:$0xf] %vm2158_vm11, %v2105_v15 }
 0x301   : > { %v2344_v39 = vpop.permute.xlu2 %2343 }
 0x303   : > { %v2310_v12 = vpop.permute.xlu1 %2309  ;;  %v3244_v51 = vld [vmem:[#allocation3 + $0x8] sm:$0xff] }
 0x304   : > { %2395 = vst.msk [vmem:[#allocation3 + $0x2c] sm:$0xf] %vm2383_vm12, %v2310_v12  ;;  %3224 = vmatmul.msk.bf16.gmra.mxu0 %vm2548_vm13, %v3244_v51 }
 0x306   : > { %v2328_v49 = vpop.permute.xlu0 %2327 }
 0x307   : > { %2404 = vst.msk [vmem:[#allocation3 + $0x50] sm:$0xf] %vm2383_vm12, %v2328_v49  ;;  %v449_v49 = vld [vmem:[%s3446_s23 + $0x18] sm:$0xff] }
 0x308   : > { %482 = vst.msk [vmem:[%s4483_s28 + $0x18] sm:$0xff] %vm364_vm0, %v449_v49 }
 0x309   : > { %v2073_v53 = vpop.permute.xlu2 %2072 }
 0x30a   : > { %2164 = vst.msk [vmem:[#allocation3 + $0x14] sm:$0xf] %vm2158_vm11, %v2073_v53 }
 0x30b   : > { %v2119_v52 = vpop.permute.xlu1 %2118  ;;  %v3248_v58 = vld [vmem:[#allocation3 + $0x28] sm:$0xff] }
 0x30c   : > { %2187 = vst.msk [vmem:[#allocation3 + $0x70] sm:$0xf] %vm2158_vm11, %v2119_v52  ;;  %3228 = vmatmul.msk.bf16.gmra.mxu1 %vm2548_vm13, %v3248_v58 }
 0x30d   : > { %2412 = vst.msk [vmem:[#allocation3 + $0x70] sm:$0xf] %vm2383_vm12, %v2344_v39 }
 0x30e   : > { %v2346_v1 = vpop.permute.xlu0 %2345 }
 0x30f   : > { %2413 = vst.msk [vmem:[#allocation3 + $0x74] sm:$0xf] %vm2383_vm12, %v2346_v1 }
 0x311   : > { %v2296_v45 = vpop.permute.xlu2 %2295 }
 0x313   : > { %v2330_v61 = vpop.permute.xlu1 %2329 }
 0x314   : > { %2405 = vst.msk [vmem:[#allocation3 + $0x54] sm:$0xf] %vm2383_vm12, %v2330_v61 }
 0x316   : > { %v2087_v5 = vpop.permute.xlu0 %2086  ;;  %v3257_v7 = vld [vmem:[#allocation3 + $0x70] sm:$0xff] }
 0x317   : > { %2171 = vst.msk [vmem:[#allocation3 + $0x30] sm:$0xf] %vm2158_vm11, %v2087_v5  ;;  %3237 = vmatmul.msk.bf16.gmra.mxu3 %vm2548_vm13, %v3257_v7 }
 0x319   : > { %v2314_v21 = vpop.permute.xlu2 %2313 }
 0x31b   : > { %v2071_v14 = vpop.permute.xlu1 %2070  ;;  %v3253_v60 = vld [vmem:[#allocation3 + $0x50] sm:$0xff] }
 0x31c   : > { %2163 = vst.msk [vmem:[#allocation3 + $0x10] sm:$0xf] %vm2158_vm11, %v2071_v14  ;;  %3233 = vmatmul.msk.bf16.gmra.mxu2 %vm2548_vm13, %v3253_v60  ;;  %v451_v14 = vld [vmem:[%s3446_s23 + $0x28] sm:$0xff] }
 0x31d   : > { %2388 = vst.msk [vmem:[#allocation3 + $0x10] sm:$0xf] %vm2383_vm12, %v2296_v45  ;;  %v450_v45 = vld [vmem:[%s3446_s23 + $0x20] sm:$0xff] }
 0x31e   : > { %v2298_v37 = vpop.permute.xlu0 %2297  ;;  %483 = vst.msk [vmem:[%s4483_s28 + $0x20] sm:$0xff] %vm364_vm0, %v450_v45 }
 0x31f   : > { %2389 = vst.msk [vmem:[#allocation3 + $0x14] sm:$0xf] %vm2383_vm12, %v2298_v37 }
 0x320   : > { %484 = vst.msk [vmem:[%s4483_s28 + $0x28] sm:$0xff] %vm364_vm0, %v451_v14 }
 0x321   : > { %v2123_v22 = vpop.permute.xlu2 %2122 }
 0x322   : > { %2189 = vst.msk [vmem:[#allocation3 + $0x78] sm:$0xf] %vm2158_vm11, %v2123_v22 }
 0x323   : > { %v2089_v29 = vpop.permute.xlu1 %2088 }
 0x324   : > { %2172 = vst.msk [vmem:[#allocation3 + $0x34] sm:$0xf] %vm2158_vm11, %v2089_v29  ;;  %v454_v29 = vld [vmem:[%s3446_s23 + $0x40] sm:$0xff] }
 0x325   : > { %2397 = vst.msk [vmem:[#allocation3 + $0x34] sm:$0xf] %vm2383_vm12, %v2314_v21 }
 0x326   : > { %v2107_v17 = vpop.permute.xlu0 %2106  ;;  %v3245_v16 = vld [vmem:[#allocation3 + $0x10] sm:$0xff]  ;;  %487 = vst.msk [vmem:[%s4483_s28 + $0x40] sm:$0xff] %vm364_vm0, %v454_v29 }
 0x327   : > { %2181 = vst.msk [vmem:[#allocation3 + $0x58] sm:$0xf] %vm2158_vm11, %v2107_v17  ;;  %3225 = vmatmul.msk.bf16.gmra.mxu0 %vm2548_vm13, %v3245_v16  ;;  %v457_v17 = vld [vmem:[%s3446_s23 + $0x58] sm:$0xff] }
 0x328   : > { %490 = vst.msk [vmem:[%s4483_s28 + $0x58] sm:$0xff] %vm364_vm0, %v457_v17  ;;  %v453_v16 = vld [vmem:[%s3446_s23 + $0x38] sm:$0xff] }
 0x329   : > { %v2334_v18 = vpop.permute.xlu2 %2333  ;;  %486 = vst.msk [vmem:[%s4483_s28 + $0x38] sm:$0xff] %vm364_vm0, %v453_v16 }
 0x32b   : > { %v2312_v50 = vpop.permute.xlu1 %2311 }
 0x32c   : > { %2396 = vst.msk [vmem:[#allocation3 + $0x30] sm:$0xf] %vm2383_vm12, %v2312_v50  ;;  %v456_v50 = vld [vmem:[%s3446_s23 + $0x50] sm:$0xff] }
 0x32d   : > { %489 = vst.msk [vmem:[%s4483_s28 + $0x50] sm:$0xff] %vm364_vm0, %v456_v50 }
 0x32e   : > { %v2125_v26 = vpop.permute.xlu0 %2124 }
 0x32f   : > { %2190 = vst.msk [vmem:[#allocation3 + $0x7c] sm:$0xf] %vm2158_vm11, %v2125_v26 }
 0x331   : > { %v2075_v9 = vpop.permute.xlu2 %2074 }
 0x332   : > { %2165 = vst.msk [vmem:[#allocation3 + $0x18] sm:$0xf] %vm2158_vm11, %v2075_v9 }
 0x333   : > { %v2109_v30 = vpop.permute.xlu1 %2108  ;;  %v3249_v11 = vld [vmem:[#allocation3 + $0x30] sm:$0xff] }
 0x334   : > { %2182 = vst.msk [vmem:[#allocation3 + $0x5c] sm:$0xf] %vm2158_vm11, %v2109_v30  ;;  %3229 = vmatmul.msk.bf16.gmra.mxu1 %vm2548_vm13, %v3249_v11  ;;  %v460_v30 = vld [vmem:[%s3446_s23 + $0x70] sm:$0xff] }
 0x335   : > { %2407 = vst.msk [vmem:[#allocation3 + $0x5c] sm:$0xf] %vm2383_vm12, %v2334_v18 }
 0x336   : > { %v2348_v13 = vpop.permute.xlu0 %2347  ;;  %493 = vst.msk [vmem:[%s4483_s28 + $0x70] sm:$0xff] %vm364_vm0, %v460_v30 }
 0x337   : > { %2414 = vst.msk [vmem:[#allocation3 + $0x78] sm:$0xf] %vm2383_vm12, %v2348_v13  ;;  %v452_v13 = vld [vmem:[%s3446_s23 + $0x30] sm:$0xff] }
 0x338   : > { %485 = vst.msk [vmem:[%s4483_s28 + $0x30] sm:$0xff] %vm364_vm0, %v452_v13 }
 0x339   : > { %v2093_v63 = vpop.permute.xlu2 %2092 }
 0x33a   : > { %2174 = vst.msk [vmem:[#allocation3 + $0x3c] sm:$0xf] %vm2158_vm11, %v2093_v63  ;;  %v459_v63 = vld [vmem:[%s3446_s23 + $0x68] sm:$0xff] }
 0x33b   : > { %v2332_v55 = vpop.permute.xlu1 %2331  ;;  %492 = vst.msk [vmem:[%s4483_s28 + $0x68] sm:$0xff] %vm364_vm0, %v459_v63 }
 0x33c   : > { %2406 = vst.msk [vmem:[#allocation3 + $0x58] sm:$0xf] %vm2383_vm12, %v2332_v55  ;;  %v463_v55 = vld [vmem:[%s3446_s23 + $0x88] sm:$0xff] }
 0x33d   : > { %496 = vst.msk [vmem:[%s4483_s28 + $0x88] sm:$0xff] %vm364_vm0, %v463_v55 }
 0x33e   : > { %v2077_v19 = vpop.permute.xlu0 %2076 }
 0x33f   : > { %2166 = vst.msk [vmem:[#allocation3 + $0x1c] sm:$0xf] %vm2158_vm11, %v2077_v19 }
 0x341   : > { %v2316_v4 = vpop.permute.xlu2 %2315 }
 0x343   : > { %v2350_v24 = vpop.permute.xlu1 %2349  ;;  %v3254_v47 = vld [vmem:[#allocation3 + $0x58] sm:$0xff] }
 0x344   : > { %2415 = vst.msk [vmem:[#allocation3 + $0x7c] sm:$0xf] %vm2383_vm12, %v2350_v24  ;;  %3234 = vmatmul.msk.bf16.gmra.mxu2 %vm2548_vm13, %v3254_v47  ;;  %v455_v24 = vld [vmem:[%s3446_s23 + $0x48] sm:$0xff]  ;;  %v462_v47 = vld [vmem:[%s3446_s23 + $0x80] sm:$0xff] }
 0x345   : > { %488 = vst.msk [vmem:[%s4483_s28 + $0x48] sm:$0xff] %vm364_vm0, %v455_v24 }
 0x346   : > { %v2300_v43 = vpop.permute.xlu0 %2299  ;;  %495 = vst.msk [vmem:[%s4483_s28 + $0x80] sm:$0xff] %vm364_vm0, %v462_v47 }
 0x347   : > { %2390 = vst.msk [vmem:[#allocation3 + $0x18] sm:$0xf] %vm2383_vm12, %v2300_v43  ;;  %v466_v43 = vld [vmem:[%s3446_s23 + $0xa0] sm:$0xff] }
 0x348   : > { %499 = vst.msk [vmem:[%s4483_s28 + $0xa0] sm:$0xff] %vm364_vm0, %v466_v43 }
 0x34a   : > { %v2650_v23 = vpop.f32.mrf.mxu2 }
 0x34b   : > { %v2091_v59 = vpop.permute.xlu1 %2090  ;;  %v3258_v20 = vld [vmem:[#allocation3 + $0x78] sm:$0xff] }
 0x34c   : > { %2173 = vst.msk [vmem:[#allocation3 + $0x38] sm:$0xf] %vm2158_vm11, %v2091_v59  ;;  %3238 = vmatmul.msk.bf16.gmra.mxu3 %vm2548_vm13, %v3258_v20  ;;  %v465_v20 = vld [vmem:[%s3446_s23 + $0x98] sm:$0xff] }
 0x34d   : > { %2398 = vst.msk [vmem:[#allocation3 + $0x38] sm:$0xf] %vm2383_vm12, %v2316_v4  ;;  %v458_v4 = vld [vmem:[%s3446_s23 + $0x60] sm:$0xff] }
 0x34e   : > { %v2318_v38 = vpop.permute.xlu0 %2317  ;;  %491 = vst.msk [vmem:[%s4483_s28 + $0x60] sm:$0xff] %vm364_vm0, %v458_v4 }
 0x34f   : > { %2399 = vst.msk [vmem:[#allocation3 + $0x3c] sm:$0xf] %vm2383_vm12, %v2318_v38  ;;  %v469_v38 = vld [vmem:[%s3446_s23 + $0xb8] sm:$0xff] }
 0x350   : > { %498 = vst.msk [vmem:[%s4483_s28 + $0x98] sm:$0xff] %vm364_vm0, %v465_v20 }
 0x351   : > { %502 = vst.msk [vmem:[%s4483_s28 + $0xb8] sm:$0xff] %vm364_vm0, %v469_v38 }
 0x352   : > { %v2652_v40 = vpop.f32.mrf.mxu2 }
 0x353   : > { %v2302_v10 = vpop.permute.xlu1 %2301 }
 0x354   : > { %2391 = vst.msk [vmem:[#allocation3 + $0x1c] sm:$0xf] %vm2383_vm12, %v2302_v10  ;;  %v2610_v56 = vpop.f32.mrf.mxu0  ;;  %v461_v10 = vld [vmem:[%s3446_s23 + $0x78] sm:$0xff] }
 0x355   : > { %2722 = vrot.lane.b32.xlu1 %v2610_v56, %s3332_s19  ;;  %494 = vst.msk [vmem:[%s4483_s28 + $0x78] sm:$0xff] %vm364_vm0, %v461_v10 }
 0x356   : > { %v3250_v28 = vld [vmem:[#allocation3 + $0x38] sm:$0xff] }
 0x357   : > { %3230 = vmatmul.msk.bf16.gmra.mxu1 %vm2548_vm13, %v3250_v28  ;;  %v2670_v0 = vpop.f32.mrf.mxu3  ;;  %v468_v28 = vld [vmem:[%s3446_s23 + $0xb0] sm:$0xff] }
 0x358   : > { %501 = vst.msk [vmem:[%s4483_s28 + $0xb0] sm:$0xff] %vm364_vm0, %v468_v28 }
 0x35b   : > { %v3246_v31 = vld [vmem:[#allocation3 + $0x18] sm:$0xff] }
 0x35c   : > { %3226 = vmatmul.msk.bf16.gmra.mxu0 %vm2548_vm13, %v3246_v31  ;;  %v2612_v32 = vpop.f32.mrf.mxu0  ;;  %v472_v31 = vld [vmem:[%s3446_s23 + $0xd0] sm:$0xff] }
 0x35d   : > { %2724 = vrot.lane.b32.xlu2 %v2612_v32, %s3332_s19  ;;  %505 = vst.msk [vmem:[%s4483_s28 + $0xd0] sm:$0xff] %vm364_vm0, %v472_v31 }
 0x35f   : > { %v2672_v39 = vpop.f32.mrf.mxu3 }
 0x361   : > { %v2630_v35 = vpop.f32.mrf.mxu1 }
 0x369   : > { %v2632_v36 = vpop.f32.mrf.mxu1 }
 0x377   : > { %v2655_v42 = vpop.f32.mrf.mxu2 }
 0x37f   : > { %v2657_v6 = vpop.f32.mrf.mxu2  ;;  %v2675_v53 = vpop.f32.mrf.mxu3 }
 0x381   : > { %v2615_v62 = vpop.f32.mrf.mxu0 }
 0x382   : > { %2726 = vrot.lane.b32.xlu0 %v2615_v62, %s3332_s19  ;;  %v464_v62 = vld [vmem:[%s3446_s23 + $0x90] sm:$0xff] }
 0x383   : > { %497 = vst.msk [vmem:[%s4483_s28 + $0x90] sm:$0xff] %vm364_vm0, %v464_v62 }
 0x387   : > { %v2677_v1 = vpop.f32.mrf.mxu3 }
 0x389   : > { %v2617_v41 = vpop.f32.mrf.mxu0  ;;  %v2635_v46 = vpop.f32.mrf.mxu1 }
 0x38a   : > { %2728 = vrot.lane.b32.xlu1 %v2617_v41, %s3332_s19 }
 0x391   : > { %v2637_v8 = vpop.f32.mrf.mxu1 }
 0x39a   : > { %v2680_v7 = vpop.f32.mrf.mxu3 }
 0x39f   : > { %v2660_v3 = vpop.f32.mrf.mxu2 }
 0x3a2   : > { %v2682_v60 = vpop.f32.mrf.mxu3 }
 0x3a4   : > { %v2620_v2 = vpop.f32.mrf.mxu0 }
 0x3a5   : > { %2730 = vrot.lane.b32.xlu2 %v2620_v2, %s3332_s19  ;;  %v475_v2 = vld [vmem:[%s3446_s23 + $0xe8] sm:$0xff] }
 0x3a6   : > { %508 = vst.msk [vmem:[%s4483_s28 + $0xe8] sm:$0xff] %vm364_vm0, %v475_v2 }
 0x3a7   : > { %v2662_v51 = vpop.f32.mrf.mxu2 }
 0x3ac   : > { %v2622_v54 = vpop.f32.mrf.mxu0 }
 0x3ad   : > { %2732 = vrot.lane.b32.xlu0 %v2622_v54, %s3332_s19 }
 0x3b1   : > { %v2640_v25 = vpop.f32.mrf.mxu1 }
 0x3b5   : > { %2738 = vrot.lane.b32.xlu0 %v2630_v35, %s3332_s19  ;;  %v471_v35 = vld [vmem:[%s3446_s23 + $0xc8] sm:$0xff] }
 0x3b6   : > { %504 = vst.msk [vmem:[%s4483_s28 + $0xc8] sm:$0xff] %vm364_vm0, %v471_v35 }
 0x3b7   : > { %v2725_v57 = vpop.permute.xlu2 %2724 }
 0x3b8   : > { %2820 = vst.msk [vmem:[%s4483_s28 + $0x8] sm:$0xff] %vm2818_vm14, %v2725_v57 }
 0x3b9   : > { %v2642_v48 = vpop.f32.mrf.mxu1 }
 0x3bd   : > { %2744 = vrot.lane.b32.xlu0 %v2637_v8, %s3332_s19 }
 0x3c7   : > { %v2723_v44 = vpop.permute.xlu1 %2722  ;;  %v2665_v58 = vpop.f32.mrf.mxu2 }
 0x3c8   : > { %2819 = vst.msk [vmem:[%s4483_s28] sm:$0xff] %vm2818_vm14, %v2723_v44  ;;  %v473_v44 = vld [vmem:[%s3446_s23 + $0xd8] sm:$0xff] }
 0x3c9   : > { %506 = vst.msk [vmem:[%s4483_s28 + $0xd8] sm:$0xff] %vm364_vm0, %v473_v44 }
 0x3cf   : > { %v2667_v61 = vpop.f32.mrf.mxu2  ;;  %v2685_v18 = vpop.f32.mrf.mxu3 }
 0x3d4   : > { %v2645_v15 = vpop.f32.mrf.mxu1 }
 0x3d5   : > { %2750 = vrot.lane.b32.xlu0 %v2645_v15, %s3332_s19 }
 0x3d7   : > { %v2687_v9 = vpop.f32.mrf.mxu3 }
 0x3d9   : > { %v2625_v12 = vpop.f32.mrf.mxu0 }
 0x3da   : > { %2734 = vrot.lane.b32.xlu1 %v2625_v12, %s3332_s19 }
 0x3dc   : > { %v2647_v5 = vpop.f32.mrf.mxu1 }
 0x3dd   : > { %2756 = vrot.lane.b32.xlu0 %v2652_v40, %s3332_s19  ;;  %v470_v40 = vld [vmem:[%s3446_s23 + $0xc0] sm:$0xff] }
 0x3de   : > { %503 = vst.msk [vmem:[%s4483_s28 + $0xc0] sm:$0xff] %vm364_vm0, %v470_v40 }
 0x3e1   : > { %v2627_v52 = vpop.f32.mrf.mxu0 }
 0x3e2   : > { %2740 = vrot.lane.b32.xlu1 %v2632_v36, %s3332_s19  ;;  %2736 = vrot.lane.b32.xlu2 %v2627_v52, %s3332_s19 }
 0x3e5   : > { %2762 = vrot.lane.b32.xlu0 %v2660_v3, %s3332_s19  ;;  %v476_v3 = vld [vmem:[%s3446_s23 + $0xf0] sm:$0xff] }
 0x3e6   : > { %509 = vst.msk [vmem:[%s4483_s28 + $0xf0] sm:$0xff] %vm364_vm0, %v476_v3 }
 0x3ea   : > { %2746 = vrot.lane.b32.xlu1 %v2640_v25, %s3332_s19  ;;  %2742 = vrot.lane.b32.xlu2 %v2635_v46, %s3332_s19  ;;  %v474_v46 = vld [vmem:[%s3446_s23 + $0xe0] sm:$0xff]  ;;  %v477_v25 = vld [vmem:[%s3446_s23 + $0xf8] sm:$0xff] }
 0x3eb   : > { %507 = vst.msk [vmem:[%s4483_s28 + $0xe0] sm:$0xff] %vm364_vm0, %v474_v46 }
 0x3ec   : > { %510 = vst.msk [vmem:[%s4483_s28 + $0xf8] sm:$0xff] %vm364_vm0, %v477_v25 }
 0x3ed   : > { %2768 = vrot.lane.b32.xlu0 %v2667_v61, %s3332_s19 }
 0x3f2   : > { %2752 = vrot.lane.b32.xlu1 %v2647_v5, %s3332_s19  ;;  %2748 = vrot.lane.b32.xlu2 %v2642_v48, %s3332_s19 }
 0x3f4   : > { %v2727_v21 = vpop.permute.xlu0 %2726 }
 0x3f5   : > { %2821 = vst.msk [vmem:[%s4483_s28 + $0x10] sm:$0xff] %vm2818_vm14, %v2727_v21  ;;  %2774 = vrot.lane.b32.xlu0 %v2675_v53, %s3332_s19 }
 0x3fa   : > { %2758 = vrot.lane.b32.xlu1 %v2655_v42, %s3332_s19  ;;  %2754 = vrot.lane.b32.xlu2 %v2650_v23, %s3332_s19  ;;  %v467_v23 = vld [vmem:[%s3446_s23 + $0xa8] sm:$0xff] }
 0x3fb   : > { %500 = vst.msk [vmem:[%s4483_s28 + $0xa8] sm:$0xff] %vm364_vm0, %v467_v23 }
 0x3fc   : > { %v2729_v37 = vpop.permute.xlu1 %2728 }
 0x3fd   : > { %2822 = vst.msk [vmem:[%s4483_s28 + $0x18] sm:$0xff] %vm2818_vm14, %v2729_v37  ;;  %2780 = vrot.lane.b32.xlu0 %v2682_v60, %s3332_s19 }
 0x3ff   : > { %v2731_v22 = vpop.permute.xlu2 %2730 }
 0x400   : > { %2823 = vst.msk [vmem:[%s4483_s28 + $0x20] sm:$0xff] %vm2818_vm14, %v2731_v22 }
 0x402   : > { %2764 = vrot.lane.b32.xlu1 %v2662_v51, %s3332_s19  ;;  %2760 = vrot.lane.b32.xlu2 %v2657_v6, %s3332_s19 }
 0x40a   : > { %2770 = vrot.lane.b32.xlu1 %v2670_v0, %s3332_s19  ;;  %2766 = vrot.lane.b32.xlu2 %v2665_v58, %s3332_s19 }
 0x412   : > { %2776 = vrot.lane.b32.xlu1 %v2677_v1, %s3332_s19  ;;  %2772 = vrot.lane.b32.xlu2 %v2672_v39, %s3332_s19 }
 0x41a   : > { %2782 = vrot.lane.b32.xlu1 %v2685_v18, %s3332_s19  ;;  %2778 = vrot.lane.b32.xlu2 %v2680_v7, %s3332_s19 }
 0x41f   : > { %v2733_v26 = vpop.permute.xlu0 %2732 }
 0x420   : > { %2824 = vst.msk [vmem:[%s4483_s28 + $0x28] sm:$0xff] %vm2818_vm14, %v2733_v26 }
 0x422   : > { %2784 = vrot.lane.b32.xlu2 %v2687_v9, %s3332_s19 }
 0x427   : > { %v2739_v11 = vpop.permute.xlu0 %2738 }
 0x428   : > { %2827 = vst.msk [vmem:[%s4483_s28 + $0x40] sm:$0xff] %vm2818_vm14, %v2739_v11 }
 0x42f   : > { %v2745_v19 = vpop.permute.xlu0 %2744 }
 0x430   : > { %2830 = vst.msk [vmem:[%s4483_s28 + $0x58] sm:$0xff] %vm2818_vm14, %v2745_v19 }
 0x43c   : > { %v2737_v59 = vpop.permute.xlu2 %2736 }
 0x43d   : > { %2826 = vst.msk [vmem:[%s4483_s28 + $0x38] sm:$0xff] %vm2818_vm14, %v2737_v59 }
 0x444   : > { %v2743_v56 = vpop.permute.xlu2 %2742 }
 0x445   : > { %2829 = vst.msk [vmem:[%s4483_s28 + $0x50] sm:$0xff] %vm2818_vm14, %v2743_v56 }
 0x447   : > { %v2751_v32 = vpop.permute.xlu0 %2750 }
 0x448   : > { %2833 = vst.msk [vmem:[%s4483_s28 + $0x70] sm:$0xff] %vm2818_vm14, %v2751_v32 }
 0x44c   : > { %v2735_v41 = vpop.permute.xlu1 %2734  ;;  %v2749_v34 = vpop.permute.xlu2 %2748 }
 0x44d   : > { %2825 = vst.msk [vmem:[%s4483_s28 + $0x30] sm:$0xff] %vm2818_vm14, %v2735_v41 }
 0x44e   : > { %2832 = vst.msk [vmem:[%s4483_s28 + $0x68] sm:$0xff] %vm2818_vm14, %v2749_v34 }
 0x44f   : > { %v2757_v36 = vpop.permute.xlu0 %2756 }
 0x450   : > { %2836 = vst.msk [vmem:[%s4483_s28 + $0x88] sm:$0xff] %vm2818_vm14, %v2757_v36 }
 0x454   : > { %v2741_v54 = vpop.permute.xlu1 %2740  ;;  %v2755_v27 = vpop.permute.xlu2 %2754 }
 0x455   : > { %2828 = vst.msk [vmem:[%s4483_s28 + $0x48] sm:$0xff] %vm2818_vm14, %v2741_v54 }
 0x456   : > { %2835 = vst.msk [vmem:[%s4483_s28 + $0x80] sm:$0xff] %vm2818_vm14, %v2755_v27 }
 0x457   : > { %v2763_v57 = vpop.permute.xlu0 %2762 }
 0x458   : > { %2839 = vst.msk [vmem:[%s4483_s28 + $0xa0] sm:$0xff] %vm2818_vm14, %v2763_v57 }
 0x45c   : > { %v2747_v8 = vpop.permute.xlu1 %2746  ;;  %v2761_v42 = vpop.permute.xlu2 %2760 }
 0x45d   : > { %2831 = vst.msk [vmem:[%s4483_s28 + $0x60] sm:$0xff] %vm2818_vm14, %v2747_v8 }
 0x45e   : > { %2838 = vst.msk [vmem:[%s4483_s28 + $0x98] sm:$0xff] %vm2818_vm14, %v2761_v42 }
 0x45f   : > { %v2769_v6 = vpop.permute.xlu0 %2768 }
 0x460   : > { %2842 = vst.msk [vmem:[%s4483_s28 + $0xb8] sm:$0xff] %vm2818_vm14, %v2769_v6 }
 0x464   : > { %v2753_v48 = vpop.permute.xlu1 %2752  ;;  %v2767_v0 = vpop.permute.xlu2 %2766 }
 0x465   : > { %2834 = vst.msk [vmem:[%s4483_s28 + $0x78] sm:$0xff] %vm2818_vm14, %v2753_v48 }
 0x466   : > { %2841 = vst.msk [vmem:[%s4483_s28 + $0xb0] sm:$0xff] %vm2818_vm14, %v2767_v0 }
 0x467   : > { %v2775_v33 = vpop.permute.xlu0 %2774 }
 0x468   : > { %2845 = vst.msk [vmem:[%s4483_s28 + $0xd0] sm:$0xff] %vm2818_vm14, %v2775_v33 }
 0x46c   : > { %v2759_v15 = vpop.permute.xlu1 %2758  ;;  %v2773_v39 = vpop.permute.xlu2 %2772 }
 0x46d   : > { %2837 = vst.msk [vmem:[%s4483_s28 + $0x90] sm:$0xff] %vm2818_vm14, %v2759_v15 }
 0x46e   : > { %2844 = vst.msk [vmem:[%s4483_s28 + $0xc8] sm:$0xff] %vm2818_vm14, %v2773_v39 }
 0x46f   : > { %v2781_v12 = vpop.permute.xlu0 %2780 }
 0x470   : > { %2848 = vst.msk [vmem:[%s4483_s28 + $0xe8] sm:$0xff] %vm2818_vm14, %v2781_v12 }
 0x474   : > { %v2765_v51 = vpop.permute.xlu1 %2764  ;;  %v2779_v49 = vpop.permute.xlu2 %2778 }
 0x475   : > { %2840 = vst.msk [vmem:[%s4483_s28 + $0xa8] sm:$0xff] %vm2818_vm14, %v2765_v51 }
 0x476   : > { %2847 = vst.msk [vmem:[%s4483_s28 + $0xe0] sm:$0xff] %vm2818_vm14, %v2779_v49 }
 0x47c   : > { %v2771_v53 = vpop.permute.xlu1 %2770  ;;  %v2785_v52 = vpop.permute.xlu2 %2784 }
 0x47d   : > { %2843 = vst.msk [vmem:[%s4483_s28 + $0xc0] sm:$0xff] %vm2818_vm14, %v2771_v53 }
 0x47e   : > { %2850 = vst.msk [vmem:[%s4483_s28 + $0xf8] sm:$0xff] %vm2818_vm14, %v2785_v52 }
 0x484   : > { %v2777_v58 = vpop.permute.xlu1 %2776 }
 0x485   : > { %2846 = vst.msk [vmem:[%s4483_s28 + $0xd8] sm:$0xff] %vm2818_vm14, %v2777_v58 }
 0x48c   : > { %v2783_v1 = vpop.permute.xlu1 %2782 }
 0x48d   : > { %2849 = vst.msk [vmem:[%s4483_s28 + $0xf0] sm:$0xff] %vm2818_vm14, %v2783_v1 }
 0x48e PF: > { %s14_s17 = sadd.s32 1, %s3329_s17   ;;  %s4687_s15 = smov %s3325_s16 }
 0x48f   : > { %p11_p5 = scmp.ge.s32.totalorder %s14_s17, 4   ;;  %s4688_s16 = smov %s4690_s18 }
 0x491   :  { %13 = sbr.rel (!%p11_p5) target bundleno = 2 (0x2), region = 76 }

</bundles_post_ra>
